<compile_context>
chip_gen: v5e
topology: v5e:2x2
jax: 0.10.0
libtpu: 0.0.40
codegen_flags: <defaults>
</compile_context>

<pallas_src>
import jax
import jax.numpy as jnp
from jax.experimental import pallas as pl
from jax.experimental.pallas import tpu as pltpu


def _round_up(x, m):
    return (x + m - 1) // m * m


def _vmem_capacity_bytes():
    """Physical VMEM per TensorCore (64 MiB on v7x, 128 MiB on v5e/v6e)."""
    try:
        cap = int(getattr(pltpu.get_tpu_info(), "vmem_capacity_bytes", 0))
        if cap > 0:
            return cap
    except Exception:
        pass
    return 64 * 1024 * 1024                       # conservative (v7x) fallback


def _pick_row_tile(H, Wp, Cin, C1, budget_bytes):
    """Largest image-row band `th` (dividing H) whose per-tile VMEM footprint
    fits the budget; prefers an even grid length so ("parallel",) can shard
    bands across v7x's two TensorCores."""
    feasible = []
    for th in range(1, H + 1):
        if H % th:
            continue
        grid = H // th
        if grid > 1 and (th * Wp) % 8 != 0:       # output-block sublane alignment
            continue
        band = _round_up((th + 2) * Wp, 8)
        foot = 4 * (2 * th * Wp * Cin             # double-buffered output tile
                    + (band + 8) * C1             # da1 staging scratch
                    + 2 * band * C1               # a1 / da1 temporaries
                    + th * Wp * Cin)              # dx temporary
        if foot <= budget_bytes:
            feasible.append((th, grid))
    if not feasible:
        return H
    even = [th for th, g in feasible if g >= 2 and g % 2 == 0]
    return max(even) if even else max(th for th, _ in feasible)


def make_fused_gbp_kernel(th, wp, cin, c1):
    """One grid step = one band of `th` image rows:
         a1  = conv3x3(x) on a (th+2)-row halo band         (9 shifted matmuls)
         da1 = mask * where(a1 > 0, seed, 0)                 (guided-ReLU rule)
         dx  = conv3x3_transposed(da1) for the th rows       (9 shifted matmuls)
       a1 / da1 never leave VMEM; the zero-padded da1 band is staged in a VMEM
       scratch buffer so the transposed conv reads it by constant row offsets."""
    tm = th * wp                                  # flattened output rows / step
    band = _round_up((th + 2) * wp, 8)            # flattened halo-band rows

    def kernel(xb_ref, mask_ref, wf_ref, wb_ref, b_ref, seed_ref, dx_ref, da_ref):
        base = pl.program_id(0) * tm
        if tm % 8 == 0:
            base = pl.multiple_of(base, 8)

        # -- forward conv: 9 row-shifted windows of the SAME flattened padded
        #    input (no im2col duplication), accumulated in f32. --
        a1 = jnp.dot(xb_ref[pl.ds(base, band), :], wf_ref[0],
                     preferred_element_type=jnp.float32) + b_ref[...]
        for k in range(1, 9):
            off = (k // 3) * wp + (k % 3)
            a1 = a1 + jnp.dot(xb_ref[pl.ds(base + off, band), :], wf_ref[k],
                              preferred_element_type=jnp.float32)

        # -- guided-backprop ReLU rule; seed relu hoisted to the wrapper. --
        da1 = mask_ref[pl.ds(base, band), :] * jnp.where(a1 > 0.0,
                                                         seed_ref[...], 0.0)

        # -- stage the zero-padded guided-gradient band in VMEM scratch
        #    (no HBM round trip for the intermediate). --
        da_ref[pl.ds(0, band), :] = da1
        da_ref[pl.ds(band, 8), :] = jnp.zeros((8, c1), jnp.float32)

        # -- transposed conv: 9 row-shifted windows of the staged band. --
        dx = jnp.dot(da_ref[pl.ds(0, tm), :], wb_ref[0],
                     preferred_element_type=jnp.float32)
        for k in range(1, 9):
            off = (k // 3) * wp + (k % 3)
            dx = dx + jnp.dot(da_ref[pl.ds(off, tm), :], wb_ref[k],
                              preferred_element_type=jnp.float32)
        dx_ref[...] = dx

    return kernel


def gbp_forward(x_nchw, target, params):
    """Guided-backprop gradient of logits[0, target] w.r.t. the input (NCHW),
    matching the PyTorch module's forward()."""
    w1, b1, wfc, bfc = params                     # bfc never reaches the input grad
    N, Cin, H, W = x_nchw.shape
    C1 = w1.shape[0]
    Wp, HW = W + 2, H * W

    # (review) only batch element 0 contributes to d logits[0, target]/dx.
    x0 = jnp.transpose(x_nchw[0].astype(jnp.float32), (1, 2, 0))          # (H, W, Cin)

    # Flattened zero-padded image: tap (kh, kw) of the 3x3 conv is the row
    # window starting at  base + kh*Wp + kw  of this ONE buffer.
    xb = jnp.pad(x0, ((2, 2), (1, 1), (0, 0))).reshape((H + 4) * Wp, Cin)
    xb = jnp.pad(xb, ((1, 16), (0, 0)))           # +1 leading shift row, +16 overhang

    # Mask (in the same flattened coordinates) of real positions of the
    # zero-padded guided-gradient image: 0 on the pad ring / wrap columns.
    rowv = jnp.pad(jnp.ones((H,), jnp.float32), (1, 1))                   # (H+2,)
    colv = jnp.pad(jnp.ones((W,), jnp.float32), (1, 1))                   # (Wp,)
    maskf = (rowv[:, None] * colv[None, :]).reshape((H + 2) * Wp, 1)
    maskf = jnp.pad(maskf, ((0, 8), (0, 0)))

    # Tap-major weights; guided seed with its relu hoisted out of the kernel.
    wf = jnp.transpose(w1, (2, 3, 1, 0)).reshape(9, Cin, C1).astype(jnp.float32)
    wb = jnp.transpose(w1[:, :, ::-1, ::-1], (2, 3, 0, 1))
    wb = wb.reshape(9, C1, Cin).astype(jnp.float32)
    b1r = b1.astype(jnp.float32).reshape(1, C1)
    seed = (jnp.maximum(wfc[target], 0.0) / HW).astype(jnp.float32).reshape(1, C1)

    # Generation-aware tile / VMEM sizing.
    cap = _vmem_capacity_bytes()
    vmem_limit = int(min(cap * 3 // 4, 100 * 1024 * 1024))
    resident = 4 * (xb.size + maskf.size + wf.size + wb.size + 2 * C1)
    th = _pick_row_tile(H, Wp, Cin, C1, max(vmem_limit - 2 * resident, 1 << 20))
    band = _round_up((th + 2) * Wp, 8)

    dx_ext = pl.pallas_call(
        make_fused_gbp_kernel(th, Wp, Cin, C1),
        out_shape=jax.ShapeDtypeStruct((H * Wp, Cin), jnp.float32),
        grid_spec=pltpu.PrefetchScalarGridSpec(
            num_scalar_prefetch=0,
            grid=(H // th,),
            in_specs=[pl.BlockSpec(xb.shape, lambda i: (0, 0)),       # resident
                      pl.BlockSpec(maskf.shape, lambda i: (0, 0)),    # resident
                      pl.BlockSpec((9, Cin, C1), lambda i: (0, 0, 0)),
                      pl.BlockSpec((9, C1, Cin), lambda i: (0, 0, 0)),
                      pl.BlockSpec((1, C1), lambda i: (0, 0)),
                      pl.BlockSpec((1, C1), lambda i: (0, 0))],
            out_specs=pl.BlockSpec((th * Wp, Cin), lambda i: (i, 0)),
            scratch_shapes=[pltpu.VMEM((band + 8, C1), jnp.float32)]),
        compiler_params=pltpu.CompilerParams(
            dimension_semantics=("parallel",),
            vmem_limit_bytes=vmem_limit),
    )(xb, maskf, wf, wb, b1r, seed)

    # Drop the 2 wrap-around columns, restore NCHW, zero-fill batches > 0.
    dx0 = jnp.transpose(dx_ext.reshape(H, Wp, Cin)[:, :W, :], (2, 0, 1))[None]
    if N > 1:
        dx0 = jnp.concatenate(
            [dx0, jnp.zeros((N - 1, Cin, H, W), dx0.dtype)], axis=0)
    return dx0


# -----------------------------------------------------------------------------
# Pure-JAX reference (guided ReLU via custom_vjp) for a correctness check
# -----------------------------------------------------------------------------
@jax.custom_vjp
def _guided_relu(x):
    return jnp.maximum(x, 0.0)

def _guided_relu_fwd(x):
    return jnp.maximum(x, 0.0), x

def _guided_relu_bwd(x, g):
    return (jnp.maximum(g, 0.0) * (x > 0.0).astype(g.dtype),)

_guided_relu.defvjp(_guided_relu_fwd, _guided_relu_bwd)


def _ref_gbp(x_nchw, target, params):
    w1, b1, wfc, bfc = params
    x_nhwc = jnp.transpose(x_nchw, (0, 2, 3, 1)).astype(jnp.float32)
    w_hwio = jnp.transpose(w1, (2, 3, 1, 0))

    def scalar_out(xh):
        a1 = jax.lax.conv_general_dilated(
            xh, w_hwio, window_strides=(1, 1), padding="SAME",
            dimension_numbers=("NHWC", "HWIO", "NHWC")) + b1
        r1 = _guided_relu(a1)
        p = jnp.mean(r1, axis=(1, 2))
        logits = p @ wfc.T + bfc
        return logits[0, target]

    g = jax.grad(scalar_out)(x_nhwc)
    return jnp.transpose(g, (0, 3, 1, 2))


# -----------------------------------------------------------------------------
if __name__ == "__main__":
    N, Cin, H, W = 2, 4, 16, 16
    C1, K = 8, 10
    target = 3

    key = jax.random.PRNGKey(0)
    k1, k2, k3, k4, kx = jax.random.split(key, 5)
    w1 = jax.random.normal(k1, (C1, Cin, 3, 3), jnp.float32) * 0.1
    b1 = jax.random.normal(k2, (C1,), jnp.float32) * 0.1
    wfc = jax.random.normal(k3, (K, C1), jnp.float32) * 0.1
    bfc = jax.random.normal(k4, (K,), jnp.float32) * 0.1
    x = jax.random.normal(kx, (N, Cin, H, W), jnp.float32)
    params = (w1, b1, wfc, bfc)

    gbp = jax.jit(gbp_forward, static_argnums=(1,))
    grad = jax.block_until_ready(gbp(x, target, params))

    ref = jax.block_until_ready(_ref_gbp(x, target, params))
    assert grad.shape == x.shape
    if not jnp.allclose(grad, ref, atol=2e-4, rtol=2e-4):
        raise AssertionError("Pallas GBP gradient mismatch vs JAX reference")
    print("KERNEL_OK")
</pallas_src>

<mosaic_0001>
module attributes {stable_mosaic.version = 11 : i64} {
  func.func @kernel(%arg0: i32, %arg1: memref<377x4xf32, #tpu.memory_space<vmem>>, %arg2: memref<332x1xf32, #tpu.memory_space<vmem>>, %arg3: memref<9x4x8xf32, #tpu.memory_space<vmem>>, %arg4: memref<9x8x4xf32, #tpu.memory_space<vmem>>, %arg5: memref<1x8xf32, #tpu.memory_space<vmem>>, %arg6: memref<1x8xf32, #tpu.memory_space<vmem>>, %arg7: memref<144x4xf32, #tpu.memory_space<vmem>>, %arg8: memref<192x8xf32, #tpu.memory_space<vmem>>) attributes {dimension_semantics = [#tpu.dimension_semantics<parallel>], iteration_bounds = array<i64: 2>, scalar_prefetch = 0 : i64, scratch_operands = 1 : i64, tpu.core_type = #tpu.core_type<tc>, window_params = [{pipeline_mode = #tpu.pipeline_mode<synchronous>, transform_indices = @transform_0, window_bounds = array<i64: 377, 4>}, {pipeline_mode = #tpu.pipeline_mode<synchronous>, transform_indices = @transform_1, window_bounds = array<i64: 332, 1>}, {pipeline_mode = #tpu.pipeline_mode<synchronous>, transform_indices = @transform_2, window_bounds = array<i64: 9, 4, 8>}, {pipeline_mode = #tpu.pipeline_mode<synchronous>, transform_indices = @transform_3, window_bounds = array<i64: 9, 8, 4>}, {pipeline_mode = #tpu.pipeline_mode<synchronous>, transform_indices = @transform_4, window_bounds = array<i64: 1, 8>}, {pipeline_mode = #tpu.pipeline_mode<synchronous>, transform_indices = @transform_5, window_bounds = array<i64: 1, 8>}, {transform_indices = @transform_6, window_bounds = array<i64: 144, 4>}]} {
    %c144_i32 = arith.constant 144 : i32
    %0 = arith.muli %arg0, %c144_i32 : i32
    %1 = tpu.assume_multiple %0, 8 : i32
    %2 = arith.index_cast %1 : i32 to index
    %c0 = arith.constant 0 : index
    %3 = vector.load %arg1[%2, %c0] : memref<377x4xf32, #tpu.memory_space<vmem>>, vector<184x4xf32>
    %c0_0 = arith.constant 0 : index
    %c0_1 = arith.constant 0 : index
    %c0_2 = arith.constant 0 : index
    %4 = vector.load %arg3[%c0_0, %c0_1, %c0_2] : memref<9x4x8xf32, #tpu.memory_space<vmem>>, vector<1x4x8xf32>
    %5 = vector.shape_cast %4 : vector<1x4x8xf32> to vector<4x8xf32>
    %cst = arith.constant dense<0.000000e+00> : vector<184x8xf32>
    %6 = tpu.matmul %3, %5, %cst {dimension_numbers = #tpu.dot_dimension_numbers<[1], [0], [0], [1], [0, 0, 1, 1], [], []>} : vector<184x4xf32>, vector<4x8xf32>, vector<184x8xf32> -> vector<184x8xf32>
    %c0_3 = arith.constant 0 : index
    %c0_4 = arith.constant 0 : index
    %7 = vector.load %arg5[%c0_3, %c0_4] : memref<1x8xf32, #tpu.memory_space<vmem>>, vector<1x8xf32>
    %8 = vector.broadcast %7 : vector<1x8xf32> to vector<184x8xf32>
    %9 = arith.addf %6, %8 : vector<184x8xf32>
    %c1_i32 = arith.constant 1 : i32
    %10 = arith.addi %1, %c1_i32 : i32
    %11 = arith.index_cast %10 : i32 to index
    %c0_5 = arith.constant 0 : index
    %12 = vector.load %arg1[%11, %c0_5] : memref<377x4xf32, #tpu.memory_space<vmem>>, vector<184x4xf32>
    %c1 = arith.constant 1 : index
    %c0_6 = arith.constant 0 : index
    %c0_7 = arith.constant 0 : index
    %13 = vector.load %arg3[%c1, %c0_6, %c0_7] : memref<9x4x8xf32, #tpu.memory_space<vmem>>, vector<1x4x8xf32>
    %14 = vector.shape_cast %13 : vector<1x4x8xf32> to vector<4x8xf32>
    %cst_8 = arith.constant dense<0.000000e+00> : vector<184x8xf32>
    %15 = tpu.matmul %12, %14, %cst_8 {dimension_numbers = #tpu.dot_dimension_numbers<[1], [0], [0], [1], [0, 0, 1, 1], [], []>} : vector<184x4xf32>, vector<4x8xf32>, vector<184x8xf32> -> vector<184x8xf32>
    %16 = arith.addf %9, %15 : vector<184x8xf32>
    %c2_i32 = arith.constant 2 : i32
    %17 = arith.addi %1, %c2_i32 : i32
    %18 = arith.index_cast %17 : i32 to index
    %c0_9 = arith.constant 0 : index
    %19 = vector.load %arg1[%18, %c0_9] : memref<377x4xf32, #tpu.memory_space<vmem>>, vector<184x4xf32>
    %c2 = arith.constant 2 : index
    %c0_10 = arith.constant 0 : index
    %c0_11 = arith.constant 0 : index
    %20 = vector.load %arg3[%c2, %c0_10, %c0_11] : memref<9x4x8xf32, #tpu.memory_space<vmem>>, vector<1x4x8xf32>
    %21 = vector.shape_cast %20 : vector<1x4x8xf32> to vector<4x8xf32>
    %cst_12 = arith.constant dense<0.000000e+00> : vector<184x8xf32>
    %22 = tpu.matmul %19, %21, %cst_12 {dimension_numbers = #tpu.dot_dimension_numbers<[1], [0], [0], [1], [0, 0, 1, 1], [], []>} : vector<184x4xf32>, vector<4x8xf32>, vector<184x8xf32> -> vector<184x8xf32>
    %23 = arith.addf %16, %22 : vector<184x8xf32>
    %c18_i32 = arith.constant 18 : i32
    %24 = arith.addi %1, %c18_i32 : i32
    %25 = arith.index_cast %24 : i32 to index
    %c0_13 = arith.constant 0 : index
    %26 = vector.load %arg1[%25, %c0_13] : memref<377x4xf32, #tpu.memory_space<vmem>>, vector<184x4xf32>
    %c3 = arith.constant 3 : index
    %c0_14 = arith.constant 0 : index
    %c0_15 = arith.constant 0 : index
    %27 = vector.load %arg3[%c3, %c0_14, %c0_15] : memref<9x4x8xf32, #tpu.memory_space<vmem>>, vector<1x4x8xf32>
    %28 = vector.shape_cast %27 : vector<1x4x8xf32> to vector<4x8xf32>
    %cst_16 = arith.constant dense<0.000000e+00> : vector<184x8xf32>
    %29 = tpu.matmul %26, %28, %cst_16 {dimension_numbers = #tpu.dot_dimension_numbers<[1], [0], [0], [1], [0, 0, 1, 1], [], []>} : vector<184x4xf32>, vector<4x8xf32>, vector<184x8xf32> -> vector<184x8xf32>
    %30 = arith.addf %23, %29 : vector<184x8xf32>
    %c19_i32 = arith.constant 19 : i32
    %31 = arith.addi %1, %c19_i32 : i32
    %32 = arith.index_cast %31 : i32 to index
    %c0_17 = arith.constant 0 : index
    %33 = vector.load %arg1[%32, %c0_17] : memref<377x4xf32, #tpu.memory_space<vmem>>, vector<184x4xf32>
    %c4 = arith.constant 4 : index
    %c0_18 = arith.constant 0 : index
    %c0_19 = arith.constant 0 : index
    %34 = vector.load %arg3[%c4, %c0_18, %c0_19] : memref<9x4x8xf32, #tpu.memory_space<vmem>>, vector<1x4x8xf32>
    %35 = vector.shape_cast %34 : vector<1x4x8xf32> to vector<4x8xf32>
    %cst_20 = arith.constant dense<0.000000e+00> : vector<184x8xf32>
    %36 = tpu.matmul %33, %35, %cst_20 {dimension_numbers = #tpu.dot_dimension_numbers<[1], [0], [0], [1], [0, 0, 1, 1], [], []>} : vector<184x4xf32>, vector<4x8xf32>, vector<184x8xf32> -> vector<184x8xf32>
    %37 = arith.addf %30, %36 : vector<184x8xf32>
    %c20_i32 = arith.constant 20 : i32
    %38 = arith.addi %1, %c20_i32 : i32
    %39 = arith.index_cast %38 : i32 to index
    %c0_21 = arith.constant 0 : index
    %40 = vector.load %arg1[%39, %c0_21] : memref<377x4xf32, #tpu.memory_space<vmem>>, vector<184x4xf32>
    %c5 = arith.constant 5 : index
    %c0_22 = arith.constant 0 : index
    %c0_23 = arith.constant 0 : index
    %41 = vector.load %arg3[%c5, %c0_22, %c0_23] : memref<9x4x8xf32, #tpu.memory_space<vmem>>, vector<1x4x8xf32>
    %42 = vector.shape_cast %41 : vector<1x4x8xf32> to vector<4x8xf32>
    %cst_24 = arith.constant dense<0.000000e+00> : vector<184x8xf32>
    %43 = tpu.matmul %40, %42, %cst_24 {dimension_numbers = #tpu.dot_dimension_numbers<[1], [0], [0], [1], [0, 0, 1, 1], [], []>} : vector<184x4xf32>, vector<4x8xf32>, vector<184x8xf32> -> vector<184x8xf32>
    %44 = arith.addf %37, %43 : vector<184x8xf32>
    %c36_i32 = arith.constant 36 : i32
    %45 = arith.addi %1, %c36_i32 : i32
    %46 = arith.index_cast %45 : i32 to index
    %c0_25 = arith.constant 0 : index
    %47 = vector.load %arg1[%46, %c0_25] : memref<377x4xf32, #tpu.memory_space<vmem>>, vector<184x4xf32>
    %c6 = arith.constant 6 : index
    %c0_26 = arith.constant 0 : index
    %c0_27 = arith.constant 0 : index
    %48 = vector.load %arg3[%c6, %c0_26, %c0_27] : memref<9x4x8xf32, #tpu.memory_space<vmem>>, vector<1x4x8xf32>
    %49 = vector.shape_cast %48 : vector<1x4x8xf32> to vector<4x8xf32>
    %cst_28 = arith.constant dense<0.000000e+00> : vector<184x8xf32>
    %50 = tpu.matmul %47, %49, %cst_28 {dimension_numbers = #tpu.dot_dimension_numbers<[1], [0], [0], [1], [0, 0, 1, 1], [], []>} : vector<184x4xf32>, vector<4x8xf32>, vector<184x8xf32> -> vector<184x8xf32>
    %51 = arith.addf %44, %50 : vector<184x8xf32>
    %c37_i32 = arith.constant 37 : i32
    %52 = arith.addi %1, %c37_i32 : i32
    %53 = arith.index_cast %52 : i32 to index
    %c0_29 = arith.constant 0 : index
    %54 = vector.load %arg1[%53, %c0_29] : memref<377x4xf32, #tpu.memory_space<vmem>>, vector<184x4xf32>
    %c7 = arith.constant 7 : index
    %c0_30 = arith.constant 0 : index
    %c0_31 = arith.constant 0 : index
    %55 = vector.load %arg3[%c7, %c0_30, %c0_31] : memref<9x4x8xf32, #tpu.memory_space<vmem>>, vector<1x4x8xf32>
    %56 = vector.shape_cast %55 : vector<1x4x8xf32> to vector<4x8xf32>
    %cst_32 = arith.constant dense<0.000000e+00> : vector<184x8xf32>
    %57 = tpu.matmul %54, %56, %cst_32 {dimension_numbers = #tpu.dot_dimension_numbers<[1], [0], [0], [1], [0, 0, 1, 1], [], []>} : vector<184x4xf32>, vector<4x8xf32>, vector<184x8xf32> -> vector<184x8xf32>
    %58 = arith.addf %51, %57 : vector<184x8xf32>
    %c38_i32 = arith.constant 38 : i32
    %59 = arith.addi %1, %c38_i32 : i32
    %60 = arith.index_cast %59 : i32 to index
    %c0_33 = arith.constant 0 : index
    %61 = vector.load %arg1[%60, %c0_33] : memref<377x4xf32, #tpu.memory_space<vmem>>, vector<184x4xf32>
    %c8 = arith.constant 8 : index
    %c0_34 = arith.constant 0 : index
    %c0_35 = arith.constant 0 : index
    %62 = vector.load %arg3[%c8, %c0_34, %c0_35] : memref<9x4x8xf32, #tpu.memory_space<vmem>>, vector<1x4x8xf32>
    %63 = vector.shape_cast %62 : vector<1x4x8xf32> to vector<4x8xf32>
    %cst_36 = arith.constant dense<0.000000e+00> : vector<184x8xf32>
    %64 = tpu.matmul %61, %63, %cst_36 {dimension_numbers = #tpu.dot_dimension_numbers<[1], [0], [0], [1], [0, 0, 1, 1], [], []>} : vector<184x4xf32>, vector<4x8xf32>, vector<184x8xf32> -> vector<184x8xf32>
    %65 = arith.addf %58, %64 : vector<184x8xf32>
    %66 = arith.index_cast %1 : i32 to index
    %c0_37 = arith.constant 0 : index
    %67 = vector.load %arg2[%66, %c0_37] : memref<332x1xf32, #tpu.memory_space<vmem>>, vector<184x1xf32>
    %cst_38 = arith.constant 0.000000e+00 : f32
    %68 = vector.broadcast %cst_38 : f32 to vector<184x8xf32>
    %69 = arith.cmpf ogt, %65, %68 : vector<184x8xf32>
    %c0_39 = arith.constant 0 : index
    %c0_40 = arith.constant 0 : index
    %70 = vector.load %arg6[%c0_39, %c0_40] : memref<1x8xf32, #tpu.memory_space<vmem>>, vector<1x8xf32>
    %cst_41 = arith.constant 0.000000e+00 : f32
    %71 = vector.shape_cast %70 : vector<1x8xf32> to vector<1x8xf32>
    %72 = vector.broadcast %71 : vector<1x8xf32> to vector<184x8xf32>
    %73 = vector.broadcast %cst_41 : f32 to vector<184x8xf32>
    %74 = arith.select %69, %72, %73 : vector<184x8xi1>, vector<184x8xf32>
    %75 = vector.broadcast %67 : vector<184x1xf32> to vector<184x8xf32>
    %76 = arith.mulf %75, %74 : vector<184x8xf32>
    %c0_42 = arith.constant 0 : index
    %c0_43 = arith.constant 0 : index
    %77 = vector.load %arg8[%c0_42, %c0_43] : memref<192x8xf32, #tpu.memory_space<vmem>>, vector<184x8xf32>
    tpu.vector_store %arg8[%c0_42, %c0_43], %76 {strides = array<i32>} : memref<192x8xf32, #tpu.memory_space<vmem>>, vector<184x8xf32>,
    %cst_44 = arith.constant 0.000000e+00 : f32
    %78 = vector.broadcast %cst_44 : f32 to vector<8x8xf32>
    %c184 = arith.constant 184 : index
    %c0_45 = arith.constant 0 : index
    %79 = vector.load %arg8[%c184, %c0_45] : memref<192x8xf32, #tpu.memory_space<vmem>>, vector<8x8xf32>
    tpu.vector_store %arg8[%c184, %c0_45], %78 {strides = array<i32>} : memref<192x8xf32, #tpu.memory_space<vmem>>, vector<8x8xf32>,
    %c0_46 = arith.constant 0 : index
    %c0_47 = arith.constant 0 : index
    %80 = vector.load %arg8[%c0_46, %c0_47] : memref<192x8xf32, #tpu.memory_space<vmem>>, vector<144x8xf32>
    %c0_48 = arith.constant 0 : index
    %c0_49 = arith.constant 0 : index
    %c0_50 = arith.constant 0 : index
    %81 = vector.load %arg4[%c0_48, %c0_49, %c0_50] : memref<9x8x4xf32, #tpu.memory_space<vmem>>, vector<1x8x4xf32>
    %82 = vector.shape_cast %81 : vector<1x8x4xf32> to vector<8x4xf32>
    %cst_51 = arith.constant dense<0.000000e+00> : vector<144x4xf32>
    %83 = tpu.matmul %80, %82, %cst_51 {dimension_numbers = #tpu.dot_dimension_numbers<[1], [0], [0], [1], [0, 0, 1, 1], [], []>} : vector<144x8xf32>, vector<8x4xf32>, vector<144x4xf32> -> vector<144x4xf32>
    %c1_52 = arith.constant 1 : index
    %c0_53 = arith.constant 0 : index
    %84 = vector.load %arg8[%c1_52, %c0_53] : memref<192x8xf32, #tpu.memory_space<vmem>>, vector<144x8xf32>
    %c1_54 = arith.constant 1 : index
    %c0_55 = arith.constant 0 : index
    %c0_56 = arith.constant 0 : index
    %85 = vector.load %arg4[%c1_54, %c0_55, %c0_56] : memref<9x8x4xf32, #tpu.memory_space<vmem>>, vector<1x8x4xf32>
    %86 = vector.shape_cast %85 : vector<1x8x4xf32> to vector<8x4xf32>
    %cst_57 = arith.constant dense<0.000000e+00> : vector<144x4xf32>
    %87 = tpu.matmul %84, %86, %cst_57 {dimension_numbers = #tpu.dot_dimension_numbers<[1], [0], [0], [1], [0, 0, 1, 1], [], []>} : vector<144x8xf32>, vector<8x4xf32>, vector<144x4xf32> -> vector<144x4xf32>
    %88 = arith.addf %83, %87 : vector<144x4xf32>
    %c2_58 = arith.constant 2 : index
    %c0_59 = arith.constant 0 : index
    %89 = vector.load %arg8[%c2_58, %c0_59] : memref<192x8xf32, #tpu.memory_space<vmem>>, vector<144x8xf32>
    %c2_60 = arith.constant 2 : index
    %c0_61 = arith.constant 0 : index
    %c0_62 = arith.constant 0 : index
    %90 = vector.load %arg4[%c2_60, %c0_61, %c0_62] : memref<9x8x4xf32, #tpu.memory_space<vmem>>, vector<1x8x4xf32>
    %91 = vector.shape_cast %90 : vector<1x8x4xf32> to vector<8x4xf32>
    %cst_63 = arith.constant dense<0.000000e+00> : vector<144x4xf32>
    %92 = tpu.matmul %89, %91, %cst_63 {dimension_numbers = #tpu.dot_dimension_numbers<[1], [0], [0], [1], [0, 0, 1, 1], [], []>} : vector<144x8xf32>, vector<8x4xf32>, vector<144x4xf32> -> vector<144x4xf32>
    %93 = arith.addf %88, %92 : vector<144x4xf32>
    %c18 = arith.constant 18 : index
    %c0_64 = arith.constant 0 : index
    %94 = vector.load %arg8[%c18, %c0_64] : memref<192x8xf32, #tpu.memory_space<vmem>>, vector<144x8xf32>
    %c3_65 = arith.constant 3 : index
    %c0_66 = arith.constant 0 : index
    %c0_67 = arith.constant 0 : index
    %95 = vector.load %arg4[%c3_65, %c0_66, %c0_67] : memref<9x8x4xf32, #tpu.memory_space<vmem>>, vector<1x8x4xf32>
    %96 = vector.shape_cast %95 : vector<1x8x4xf32> to vector<8x4xf32>
    %cst_68 = arith.constant dense<0.000000e+00> : vector<144x4xf32>
    %97 = tpu.matmul %94, %96, %cst_68 {dimension_numbers = #tpu.dot_dimension_numbers<[1], [0], [0], [1], [0, 0, 1, 1], [], []>} : vector<144x8xf32>, vector<8x4xf32>, vector<144x4xf32> -> vector<144x4xf32>
    %98 = arith.addf %93, %97 : vector<144x4xf32>
    %c19 = arith.constant 19 : index
    %c0_69 = arith.constant 0 : index
    %99 = vector.load %arg8[%c19, %c0_69] : memref<192x8xf32, #tpu.memory_space<vmem>>, vector<144x8xf32>
    %c4_70 = arith.constant 4 : index
    %c0_71 = arith.constant 0 : index
    %c0_72 = arith.constant 0 : index
    %100 = vector.load %arg4[%c4_70, %c0_71, %c0_72] : memref<9x8x4xf32, #tpu.memory_space<vmem>>, vector<1x8x4xf32>
    %101 = vector.shape_cast %100 : vector<1x8x4xf32> to vector<8x4xf32>
    %cst_73 = arith.constant dense<0.000000e+00> : vector<144x4xf32>
    %102 = tpu.matmul %99, %101, %cst_73 {dimension_numbers = #tpu.dot_dimension_numbers<[1], [0], [0], [1], [0, 0, 1, 1], [], []>} : vector<144x8xf32>, vector<8x4xf32>, vector<144x4xf32> -> vector<144x4xf32>
    %103 = arith.addf %98, %102 : vector<144x4xf32>
    %c20 = arith.constant 20 : index
    %c0_74 = arith.constant 0 : index
    %104 = vector.load %arg8[%c20, %c0_74] : memref<192x8xf32, #tpu.memory_space<vmem>>, vector<144x8xf32>
    %c5_75 = arith.constant 5 : index
    %c0_76 = arith.constant 0 : index
    %c0_77 = arith.constant 0 : index
    %105 = vector.load %arg4[%c5_75, %c0_76, %c0_77] : memref<9x8x4xf32, #tpu.memory_space<vmem>>, vector<1x8x4xf32>
    %106 = vector.shape_cast %105 : vector<1x8x4xf32> to vector<8x4xf32>
    %cst_78 = arith.constant dense<0.000000e+00> : vector<144x4xf32>
    %107 = tpu.matmul %104, %106, %cst_78 {dimension_numbers = #tpu.dot_dimension_numbers<[1], [0], [0], [1], [0, 0, 1, 1], [], []>} : vector<144x8xf32>, vector<8x4xf32>, vector<144x4xf32> -> vector<144x4xf32>
    %108 = arith.addf %103, %107 : vector<144x4xf32>
    %c36 = arith.constant 36 : index
    %c0_79 = arith.constant 0 : index
    %109 = vector.load %arg8[%c36, %c0_79] : memref<192x8xf32, #tpu.memory_space<vmem>>, vector<144x8xf32>
    %c6_80 = arith.constant 6 : index
    %c0_81 = arith.constant 0 : index
    %c0_82 = arith.constant 0 : index
    %110 = vector.load %arg4[%c6_80, %c0_81, %c0_82] : memref<9x8x4xf32, #tpu.memory_space<vmem>>, vector<1x8x4xf32>
    %111 = vector.shape_cast %110 : vector<1x8x4xf32> to vector<8x4xf32>
    %cst_83 = arith.constant dense<0.000000e+00> : vector<144x4xf32>
    %112 = tpu.matmul %109, %111, %cst_83 {dimension_numbers = #tpu.dot_dimension_numbers<[1], [0], [0], [1], [0, 0, 1, 1], [], []>} : vector<144x8xf32>, vector<8x4xf32>, vector<144x4xf32> -> vector<144x4xf32>
    %113 = arith.addf %108, %112 : vector<144x4xf32>
    %c37 = arith.constant 37 : index
    %c0_84 = arith.constant 0 : index
    %114 = vector.load %arg8[%c37, %c0_84] : memref<192x8xf32, #tpu.memory_space<vmem>>, vector<144x8xf32>
    %c7_85 = arith.constant 7 : index
    %c0_86 = arith.constant 0 : index
    %c0_87 = arith.constant 0 : index
    %115 = vector.load %arg4[%c7_85, %c0_86, %c0_87] : memref<9x8x4xf32, #tpu.memory_space<vmem>>, vector<1x8x4xf32>
    %116 = vector.shape_cast %115 : vector<1x8x4xf32> to vector<8x4xf32>
    %cst_88 = arith.constant dense<0.000000e+00> : vector<144x4xf32>
    %117 = tpu.matmul %114, %116, %cst_88 {dimension_numbers = #tpu.dot_dimension_numbers<[1], [0], [0], [1], [0, 0, 1, 1], [], []>} : vector<144x8xf32>, vector<8x4xf32>, vector<144x4xf32> -> vector<144x4xf32>
    %118 = arith.addf %113, %117 : vector<144x4xf32>
    %c38 = arith.constant 38 : index
    %c0_89 = arith.constant 0 : index
    %119 = vector.load %arg8[%c38, %c0_89] : memref<192x8xf32, #tpu.memory_space<vmem>>, vector<144x8xf32>
    %c8_90 = arith.constant 8 : index
    %c0_91 = arith.constant 0 : index
    %c0_92 = arith.constant 0 : index
    %120 = vector.load %arg4[%c8_90, %c0_91, %c0_92] : memref<9x8x4xf32, #tpu.memory_space<vmem>>, vector<1x8x4xf32>
    %121 = vector.shape_cast %120 : vector<1x8x4xf32> to vector<8x4xf32>
    %cst_93 = arith.constant dense<0.000000e+00> : vector<144x4xf32>
    %122 = tpu.matmul %119, %121, %cst_93 {dimension_numbers = #tpu.dot_dimension_numbers<[1], [0], [0], [1], [0, 0, 1, 1], [], []>} : vector<144x8xf32>, vector<8x4xf32>, vector<144x4xf32> -> vector<144x4xf32>
    %123 = arith.addf %118, %122 : vector<144x4xf32>
    %c0_94 = arith.constant 0 : index
    %c0_95 = arith.constant 0 : index
    %124 = vector.load %arg7[%c0_94, %c0_95] : memref<144x4xf32, #tpu.memory_space<vmem>>, vector<144x4xf32>
    tpu.vector_store %arg7[%c0_94, %c0_95], %123 {strides = array<i32>} : memref<144x4xf32, #tpu.memory_space<vmem>>, vector<144x4xf32>,
    return
  }
  func.func @transform_0(%arg0: i32) -> (i32, i32) {
    %c0_i32 = arith.constant 0 : i32
    %c0_i32_0 = arith.constant 0 : i32
    %c0_i32_1 = arith.constant 0 : i32
    return %c0_i32, %c0_i32_0 : i32, i32
  }
  func.func @transform_1(%arg0: i32) -> (i32, i32) {
    %c0_i32 = arith.constant 0 : i32
    %c0_i32_0 = arith.constant 0 : i32
    %c0_i32_1 = arith.constant 0 : i32
    return %c0_i32, %c0_i32_0 : i32, i32
  }
  func.func @transform_2(%arg0: i32) -> (i32, i32, i32) {
    %c0_i32 = arith.constant 0 : i32
    %c0_i32_0 = arith.constant 0 : i32
    %c0_i32_1 = arith.constant 0 : i32
    %c0_i32_2 = arith.constant 0 : i32
    return %c0_i32, %c0_i32_0, %c0_i32_1 : i32, i32, i32
  }
  func.func @transform_3(%arg0: i32) -> (i32, i32, i32) {
    %c0_i32 = arith.constant 0 : i32
    %c0_i32_0 = arith.constant 0 : i32
    %c0_i32_1 = arith.constant 0 : i32
    %c0_i32_2 = arith.constant 0 : i32
    return %c0_i32, %c0_i32_0, %c0_i32_1 : i32, i32, i32
  }
  func.func @transform_4(%arg0: i32) -> (i32, i32) {
    %c0_i32 = arith.constant 0 : i32
    %c0_i32_0 = arith.constant 0 : i32
    %c0_i32_1 = arith.constant 0 : i32
    return %c0_i32, %c0_i32_0 : i32, i32
  }
  func.func @transform_5(%arg0: i32) -> (i32, i32) {
    %c0_i32 = arith.constant 0 : i32
    %c0_i32_0 = arith.constant 0 : i32
    %c0_i32_1 = arith.constant 0 : i32
    return %c0_i32, %c0_i32_0 : i32, i32
  }
  func.func @transform_6(%arg0: i32) -> (i32, i32) {
    %c0_i32 = arith.constant 0 : i32
    %c0_i32_0 = arith.constant 0 : i32
    return %arg0, %c0_i32 : i32, i32
  }
}

</mosaic_0001>

<bundles_post_ra>
// kernel: gbp_forward.1
= control target key start
LH: loop header
LB: loop body
LE: loop exit
PB: predicated region body
PF: predicated region fallthrough
CT: control target
= control target key end

     0   :  { %s4493_s21 = smov 0   ;;  %s6139_s0 = inlined_call_operand.vmem [shape: f32[377,4], index: 0, kind: input, shape index: {}]   ;;  %s6140_s1 = inlined_call_operand.vmem [shape: f32[332,1], index: 1, kind: input, shape index: {}]   ;;  %s6141_s2 = inlined_call_operand.vmem [shape: f32[9,4,8], index: 2, kind: input, shape index: {}]   ;;  %s6142_s3 = inlined_call_operand.vmem [shape: f32[9,8,4], index: 3, kind: input, shape index: {}]   ;;  %s6143_s4 = inlined_call_operand.vmem [shape: f32[1,8], index: 4, kind: input, shape index: {}]   ;;  %s6144_s5 = inlined_call_operand.vmem [shape: f32[1,8], index: 5, kind: input, shape index: {}]   ;;  %s6145_s6 = inlined_call_operand.vmem [shape: f32[288,4], index: 6, kind: output, shape index: {}]  }
   0x1 LB: > { %s3844_s22 = sadd.s32 4294967295, %s4455_s21   ;;  %p3847_p0 = scmp.ge.s32.totalorder %s4455_s21, 1  ;;  %s4455_s21 = sphi %s4493_s21, %s16_s21  }
   0x2   : > { %p202_p1 = scmp.lt.s32.totalorder %s4455_s21, 3 }
   0x4   : > { %p203_p2 = pnand %p3847_p0, %p202_p1 }
   0x6   : > { %206 = sbr.rel (%p203_p2) target bundleno = 1134 (0x46e), region = 44 }
   0xb   : > { %v258_v0 = vld [vmem:[%s6141_s2] sm:$0xf]  ;;  %vm333_vm0 = vcmask 1043456   ;;  %s4506_s25 = smul.u32 144, %s3844_s22  ;;  %vm263_vm1 = vcmask 31744   ;;  %vm2299_vm2 = vcmask 64512  }
   0xc   : > { %3849 = vmatpush.msk.msra.mxu0 %vm333_vm0, %v258_v0  ;;  %4429 = vmatpush.msk.msra.mxu3 %vm333_vm0, %v258_v0  ;;  %v3944_v1 = vld [vmem:[%s6141_s2 + $0x8] sm:$0xf]  ;;  %v3896_v2 = vld [vmem:[%s6141_s2 + $0x4] sm:$0xf]  ;;  %v3992_v18 = vld [vmem:[%s6141_s2 + $0xc] sm:$0xf] }
   0xd   : > { %s4520_s8 = scalar_lea.vmem %s6139_s0, %s4506_s25  ;;  %3897 = vmatpush.msk.msra.mxu1 %vm333_vm0, %v3896_v2  ;;  %4431 = vmatpush.msk.msra.mxu2 %vm333_vm0, %v3944_v1  ;;  %s5053_s28 = scalar_lea.vmem %s6140_s1, %s4506_s25 }
   0xe   : > { %3945 = vmatpush.msk.msrb.mxu0 %vm333_vm0, %v3944_v1  ;;  %v235_v3 = vld [vmem:[%s4520_s8] sm:$0xff]  ;;  %v257_v4 = vld [vmem:[%s4520_s8 + $0xb0] sm:$0xff]  ;;  %4430 = vmatpush.msk.msrb.mxu3 %vm333_vm0, %v3896_v2  ;;  %v236_v6 = vld [vmem:[%s4520_s8 + $0x8] sm:$0xff]  ;;  %s227_s30 = smul.u32 18, %s3844_s22 }
   0xf   : > { %v3873_v5 = vld [vmem:[%s4520_s8 + $0x1] sm:$0xff]  ;;  %3850 = vmatmul.msk.f32.vlgmr.msra.gmra.mxu0 %vm263_vm1, %v235_v3  ;;  %3872 = vmatmul.msk.f32.vlgmr.msra.gmra.mxu3 %vm263_vm1, %v257_v4  ;;  %v3874_v8 = vld [vmem:[%s4520_s8 + $0x9] sm:$0xff]  ;;  %v3875_v12 = vld [vmem:[%s4520_s8 + $0x11] sm:$0xff] }
  0x10   : > { %3898 = vmatmul.msk.f32.vlgmr.msra.gmra.mxu1 %vm263_vm1, %v3873_v5  ;;  %v3889_v7 = vld [vmem:[%s4520_s8 + $0x81] sm:$0xff]  ;;  %v237_v10 = vld [vmem:[%s4520_s8 + $0x10] sm:$0xff]  ;;  %v238_v14 = vld [vmem:[%s4520_s8 + $0x18] sm:$0xff]  ;;  %3993 = vmatpush.msk.msra.mxu3 %vm333_vm0, %v3992_v18  ;;  %p228_p3 = scmp.lt.s32.totalorder %s227_s30, 35 }
  0x11   : > { %v4539_v9 = vld [vmem:[%s4520_s8 + $0x3a] sm:$0xff]  ;;  %v3890_v11 = vld [vmem:[%s4520_s8 + $0x89] sm:$0xff]  ;;  %v3891_v15 = vld [vmem:[%s4520_s8 + $0x91] sm:$0xff] }
  0x12   : > { %3953 = vmatmul.msk.f32.vlgmr.msra.gmra.mxu2 %vm263_vm1, %v4539_v9  ;;  %v4550_v13 = vld [vmem:[%s4520_s8 + $0x42] sm:$0xff]  ;;  %v3876_v16 = vld [vmem:[%s4520_s8 + $0x19] sm:$0xff]  ;;  %v4561_v17 = vld [vmem:[%s4520_s8 + $0x4a] sm:$0xff]  ;;  %s6305_s30 = smov (!%p228_p3, %s227_s30), 35 }
  0x13   : > { %v239_v19 = vld [vmem:[%s4520_s8 + $0x20] sm:$0xff]  ;;  %v4576_v22 = vld [vmem:[%s4520_s8 + $0x52] sm:$0xff]  ;;  %v240_v23 = vld [vmem:[%s4520_s8 + $0x28] sm:$0xff]  ;;  %s3848_s22 = sshll.u32 %s6305_s30, 3 }
  0x14   : > { %v3892_v20 = vld [vmem:[%s4520_s8 + $0x99] sm:$0xff]  ;;  %v3877_v21 = vld [vmem:[%s4520_s8 + $0x21] sm:$0xff]  ;;  %v3878_v25 = vld [vmem:[%s4520_s8 + $0x29] sm:$0xff]  ;;  %s6078_s10 = scalar_lea.vmem %s6145_s6, %s3848_s22 }
  0x15   : > { %v3893_v24 = vld [vmem:[%s4520_s8 + $0xa1] sm:$0xff]  ;;  %v241_v27 = vld [vmem:[%s4520_s8 + $0x30] sm:$0xff]  ;;  %v242_v31 = vld [vmem:[%s4520_s8 + $0x38] sm:$0xff] }
  0x16   : > { %v4587_v26 = vld [vmem:[%s4520_s8 + $0x5a] sm:$0xff]  ;;  %v3894_v28 = vld [vmem:[%s4520_s8 + $0xa9] sm:$0xff]  ;;  %v3879_v29 = vld [vmem:[%s4520_s8 + $0x31] sm:$0xff] }
  0x17   : > { %3851 = vmatmul.msk.f32.gmra.mxu0 %vm263_vm1, %v236_v6  ;;  %3914 = vmatmul.msk.f32.vlgmr.msrb.gmra.mxu3 %vm263_vm1, %v3889_v7  ;;  %v4598_v30 = vld [vmem:[%s4520_s8 + $0x62] sm:$0xff]  ;;  %v3895_v32 = vld [vmem:[%s4520_s8 + $0xb1] sm:$0xff]  ;;  %v3880_v33 = vld [vmem:[%s4520_s8 + $0x39] sm:$0xff] }
  0x18   : > { %3899 = vmatmul.msk.f32.gmra.mxu1 %vm263_vm1, %v3874_v8  ;;  %v4609_v34 = vld [vmem:[%s4520_s8 + $0x6a] sm:$0xff]  ;;  %v243_v35 = vld [vmem:[%s4520_s8 + $0x40] sm:$0xff]  ;;  %v4615_v36 = vld [vmem:[%s4520_s8 + $0x12] sm:$0xff] }
  0x19   : > { %v3881_v37 = vld [vmem:[%s4520_s8 + $0x41] sm:$0xff]  ;;  %v4623_v38 = vld [vmem:[%s4520_s8 + $0x72] sm:$0xff]  ;;  %v3882_v41 = vld [vmem:[%s4520_s8 + $0x49] sm:$0xff] }
  0x1a   : > { %3954 = vmatmul.msk.f32.gmra.mxu2 %vm263_vm1, %v4550_v13  ;;  %v244_v39 = vld [vmem:[%s4520_s8 + $0x48] sm:$0xff]  ;;  %v4629_v40 = vld [vmem:[%s4520_s8 + $0x1a] sm:$0xff]  ;;  %v245_v43 = vld [vmem:[%s4520_s8 + $0x50] sm:$0xff] }
  0x1b   : > { %v4637_v42 = vld [vmem:[%s4520_s8 + $0x7a] sm:$0xff]  ;;  %v4643_v44 = vld [vmem:[%s4520_s8 + $0x22] sm:$0xff]  ;;  %v3883_v45 = vld [vmem:[%s4520_s8 + $0x51] sm:$0xff] }
  0x1c   : > { %v4651_v46 = vld [vmem:[%s4520_s8 + $0x82] sm:$0xff]  ;;  %v246_v47 = vld [vmem:[%s4520_s8 + $0x58] sm:$0xff]  ;;  %v4657_v48 = vld [vmem:[%s4520_s8 + $0x2a] sm:$0xff] }
  0x1d   : > { %v3884_v49 = vld [vmem:[%s4520_s8 + $0x59] sm:$0xff]  ;;  %v4665_v50 = vld [vmem:[%s4520_s8 + $0x8a] sm:$0xff]  ;;  %v3885_v53 = vld [vmem:[%s4520_s8 + $0x61] sm:$0xff] }
  0x1e   : > { %v247_v51 = vld [vmem:[%s4520_s8 + $0x60] sm:$0xff]  ;;  %v4671_v52 = vld [vmem:[%s4520_s8 + $0x32] sm:$0xff]  ;;  %v248_v55 = vld [vmem:[%s4520_s8 + $0x68] sm:$0xff] }
  0x1f   : > { %3852 = vmatmul.msk.f32.gmra.mxu0 %vm263_vm1, %v237_v10  ;;  %3915 = vmatmul.msk.f32.gmra.mxu3 %vm263_vm1, %v3890_v11  ;;  %v4679_v54 = vld [vmem:[%s4520_s8 + $0x92] sm:$0xff]  ;;  %v3886_v56 = vld [vmem:[%s4520_s8 + $0x69] sm:$0xff]  ;;  %v4690_v57 = vld [vmem:[%s4520_s8 + $0x9a] sm:$0xff] }
  0x20   : > { %3900 = vmatmul.msk.f32.gmra.mxu1 %vm263_vm1, %v3875_v12  ;;  %v249_v58 = vld [vmem:[%s4520_s8 + $0x70] sm:$0xff]  ;;  %v4701_v60 = vld [vmem:[%s4520_s8 + $0xa2] sm:$0xff]  ;;  %v250_v61 = vld [vmem:[%s4520_s8 + $0x78] sm:$0xff] }
  0x21   : > { %v3887_v59 = vld [vmem:[%s4520_s8 + $0x71] sm:$0xff]  ;;  %v3888_v62 = vld [vmem:[%s4520_s8 + $0x79] sm:$0xff]  ;;  %v252_v5 = vld [vmem:[%s4520_s8 + $0x88] sm:$0xff] }
  0x22   : > { %3955 = vmatmul.msk.f32.gmra.mxu2 %vm263_vm1, %v4561_v17  ;;  %v4712_v63 = vld [vmem:[%s4520_s8 + $0xaa] sm:$0xff]  ;;  %v251_v1 = vld [vmem:[%s4520_s8 + $0x80] sm:$0xff]  ;;  %v4723_v3 = vld [vmem:[%s4520_s8 + $0xb2] sm:$0xff] }
  0x23   : > { %v253_v8 = vld [vmem:[%s4520_s8 + $0x90] sm:$0xff]  ;;  %v254_v12 = vld [vmem:[%s4520_s8 + $0x98] sm:$0xff]  ;;  %v256_v18 = vld [vmem:[%s4520_s8 + $0xa8] sm:$0xff] }
  0x27   : > { %3853 = vmatmul.msk.f32.gmra.mxu0 %vm263_vm1, %v238_v14  ;;  %3916 = vmatmul.msk.f32.gmra.mxu3 %vm263_vm1, %v3891_v15  ;;  %v255_v15 = vld [vmem:[%s4520_s8 + $0xa0] sm:$0xff] }
  0x28   : > { %3901 = vmatmul.msk.f32.gmra.mxu1 %vm263_vm1, %v3876_v16 }
  0x2a   : > { %3956 = vmatmul.msk.f32.gmra.mxu2 %vm263_vm1, %v4576_v22 }
  0x2f   : > { %3854 = vmatmul.msk.f32.gmra.mxu0 %vm263_vm1, %v239_v19  ;;  %3917 = vmatmul.msk.f32.gmra.mxu3 %vm263_vm1, %v3892_v20 }
  0x30   : > { %3902 = vmatmul.msk.f32.gmra.mxu1 %vm263_vm1, %v3877_v21  ;;  %v3921_v21 = vld [vmem:[%s4520_s8 + $0x2] sm:$0xff] }
  0x32   : > { %3957 = vmatmul.msk.f32.gmra.mxu2 %vm263_vm1, %v4587_v26 }
  0x37   : > { %3855 = vmatmul.msk.f32.gmra.mxu0 %vm263_vm1, %v240_v23  ;;  %3918 = vmatmul.msk.f32.gmra.mxu3 %vm263_vm1, %v3893_v24  ;;  %v3922_v24 = vld [vmem:[%s4520_s8 + $0xa] sm:$0xff] }
  0x38   : > { %3903 = vmatmul.msk.f32.gmra.mxu1 %vm263_vm1, %v3878_v25  ;;  %v4785_v25 = vld [vmem:[%s6143_s4] ss:$0 sm:$0xff] }
  0x3a   : > { %3958 = vmatmul.msk.f32.gmra.mxu2 %vm263_vm1, %v4598_v30 }
  0x3f   : > { %3856 = vmatmul.msk.f32.gmra.mxu0 %vm263_vm1, %v241_v27  ;;  %3919 = vmatmul.msk.f32.gmra.mxu3 %vm263_vm1, %v3894_v28 }
  0x40   : > { %3904 = vmatmul.msk.f32.gmra.mxu1 %vm263_vm1, %v3879_v29 }
  0x42   : > { %3959 = vmatmul.msk.f32.gmra.mxu2 %vm263_vm1, %v4609_v34 }
  0x47   : > { %3857 = vmatmul.msk.f32.gmra.mxu0 %vm263_vm1, %v242_v31  ;;  %3920 = vmatmul.msk.f32.gmra.mxu3 %vm263_vm1, %v3895_v32  ;;  %v4136_v31 = vld [vmem:[%s6141_s2 + $0x18] sm:$0xf] }
  0x48   : > { %3905 = vmatmul.msk.f32.gmra.mxu1 %vm263_vm1, %v3880_v33  ;;  %4137 = vmatpush.msk.msrb.mxu2 %vm333_vm0, %v4136_v31  ;;  %v4113_v33 = vld [vmem:[%s4520_s8 + $0x24] sm:$0xff] }
  0x4a   : > { %3960 = vmatmul.msk.f32.gmra.mxu2 %vm263_vm1, %v4623_v38 }
  0x4f   : > { %3858 = vmatmul.msk.f32.gmra.mxu0 %vm263_vm1, %v243_v35  ;;  %3994 = vmatmul.msk.f32.vlgmr.msra.gmra.mxu3 %vm263_vm1, %v4615_v36  ;;  %v4088_v35 = vld [vmem:[%s6141_s2 + $0x14] sm:$0xf] }
  0x50   : > { %3906 = vmatmul.msk.f32.gmra.mxu1 %vm263_vm1, %v3881_v37 }
  0x51   : > { %4089 = vmatpush.msk.msrb.mxu1 %vm333_vm0, %v4088_v35  ;;  %v4122_v35 = vld [vmem:[%s4520_s8 + $0x6c] sm:$0xff] }
  0x52   : > { %3961 = vmatmul.msk.f32.gmra.mxu2 %vm263_vm1, %v4637_v42 }
  0x57   : > { %3859 = vmatmul.msk.f32.gmra.mxu0 %vm263_vm1, %v244_v39  ;;  %3995 = vmatmul.msk.f32.gmra.mxu3 %vm263_vm1, %v4629_v40  ;;  %v4066_v39 = vld [vmem:[%s4520_s8 + $0x1c] sm:$0xff] }
  0x58   : > { %3907 = vmatmul.msk.f32.gmra.mxu1 %vm263_vm1, %v3882_v41  ;;  %v4115_v41 = vld [vmem:[%s4520_s8 + $0x34] sm:$0xff] }
  0x5a   : > { %3962 = vmatmul.msk.f32.gmra.mxu2 %vm263_vm1, %v4651_v46 }
  0x5f   : > { %3860 = vmatmul.msk.f32.gmra.mxu0 %vm263_vm1, %v245_v43  ;;  %3996 = vmatmul.msk.f32.gmra.mxu3 %vm263_vm1, %v4643_v44 }
  0x60   : > { %3908 = vmatmul.msk.f32.gmra.mxu1 %vm263_vm1, %v3883_v45 }
  0x62   : > { %3963 = vmatmul.msk.f32.gmra.mxu2 %vm263_vm1, %v4665_v50 }
  0x67   : > { %3861 = vmatmul.msk.f32.gmra.mxu0 %vm263_vm1, %v246_v47  ;;  %3997 = vmatmul.msk.f32.gmra.mxu3 %vm263_vm1, %v4657_v48  ;;  %v3990_v47 = vld [vmem:[%s4520_s8 + $0xba] sm:$0xff] }
  0x68   : > { %3909 = vmatmul.msk.f32.gmra.mxu1 %vm263_vm1, %v3884_v49  ;;  %v4117_v49 = vld [vmem:[%s4520_s8 + $0x44] sm:$0xff] }
  0x6a   : > { %3964 = vmatmul.msk.f32.gmra.mxu2 %vm263_vm1, %v4679_v54 }
  0x6f   : > { %3862 = vmatmul.msk.f32.gmra.mxu0 %vm263_vm1, %v247_v51  ;;  %3998 = vmatmul.msk.f32.gmra.mxu3 %vm263_vm1, %v4671_v52 }
  0x70   : > { %3910 = vmatmul.msk.f32.gmra.mxu1 %vm263_vm1, %v3885_v53  ;;  %v3991_v53 = vld [vmem:[%s4520_s8 + $0xc2] sm:$0xff] }
  0x72   : > { %3965 = vmatmul.msk.f32.gmra.mxu2 %vm263_vm1, %v4690_v57 }
  0x77   : > { %3863 = vmatmul.msk.f32.gmra.mxu0 %vm263_vm1, %v248_v55  ;;  %3999 = vmatmul.msk.f32.gmra.mxu3 %vm263_vm1, %v4539_v9  ;;  %v4040_v9 = vld [vmem:[%s6141_s2 + $0x10] sm:$0xf] }
  0x78   : > { %3911 = vmatmul.msk.f32.gmra.mxu1 %vm263_vm1, %v3886_v56  ;;  %4041 = vmatpush.msk.msra.mxu0 %vm333_vm0, %v4040_v9  ;;  %v4118_v55 = vld [vmem:[%s4520_s8 + $0x4c] sm:$0xff] }
  0x7a   : > { %3966 = vmatmul.msk.f32.gmra.mxu2 %vm263_vm1, %v4701_v60 }
  0x7f   : > { %3864 = vmatmul.msk.f32.gmra.mxu0 %vm263_vm1, %v249_v58  ;;  %4000 = vmatmul.msk.f32.gmra.mxu3 %vm263_vm1, %v4550_v13 }
  0x80   : > { %3912 = vmatmul.msk.f32.gmra.mxu1 %vm263_vm1, %v3887_v59 }
  0x82   : > { %3967 = vmatmul.msk.f32.gmra.mxu2 %vm263_vm1, %v4712_v63 }
  0x87   : > { %3865 = vmatmul.msk.f32.gmra.mxu0 %vm263_vm1, %v250_v61  ;;  %4001 = vmatmul.msk.f32.gmra.mxu3 %vm263_vm1, %v4561_v17  ;;  %v4161_v61 = vld [vmem:[%s4520_s8 + $0x25] sm:$0xff] }
  0x88   : > { %3913 = vmatmul.msk.f32.gmra.mxu1 %vm263_vm1, %v3888_v62  ;;  %v4119_v62 = vld [vmem:[%s4520_s8 + $0x54] sm:$0xff] }
  0x8a   : > { %3968 = vmatmul.msk.f32.gmra.mxu2 %vm263_vm1, %v4723_v3 }
  0x8c   : > { %v4716_v0 = vpop.f32.mrf.mxu0 }
  0x8d   : > { %v4875_v56 = vpop.f32.mrf.mxu1 }
  0x8f   : > { %3866 = vmatmul.msk.f32.gmra.mxu0 %vm263_vm1, %v251_v1  ;;  %4002 = vmatmul.msk.f32.gmra.mxu3 %vm263_vm1, %v4576_v22 }
  0x92   : > { %v420_v2 = vpop.f32.mrf.mxu3  ;;  %4138 = vmatmul.msk.f32.vlgmr.msrb.gmra.mxu2 %vm263_vm1, %v4113_v33 }
  0x94   : > { %v4727_v4 = vpop.f32.mrf.mxu0 }
  0x97   : > { %3867 = vmatmul.msk.f32.gmra.mxu0 %vm263_vm1, %v252_v5  ;;  %4003 = vmatmul.msk.f32.gmra.mxu3 %vm263_vm1, %v4587_v26  ;;  %v421_v26 = vadd.f32 %v4785_v25, %v420_v2  ;;  %v4020_v2 = vld [vmem:[%s4520_s8 + $0x2b] sm:$0xff]  ;;  %v4120_v5 = vld [vmem:[%s4520_s8 + $0x5c] sm:$0xff] }
  0x9a   : > { %v4733_v6 = vpop.f32.mrf.mxu3 }
  0x9b   : > { %6146 = vst [vmem:[#allocation3_spill] sm:$0xff] %v4733_v6 }
  0x9c   : > { %v4735_v7 = vpop.f32.mrf.mxu0 }
  0x9f   : > { %3868 = vmatmul.msk.f32.gmra.mxu0 %vm263_vm1, %v253_v8  ;;  %4004 = vmatmul.msk.f32.gmra.mxu3 %vm263_vm1, %v4598_v30  ;;  %v4184_v30 = vld [vmem:[%s6141_s2 + $0x1c] sm:$0xf] }
  0xa0   : > { %4185 = vmatpush.msk.msrb.mxu3 %vm333_vm0, %v4184_v30 }
  0xa2   : > { %v4745_v10 = vpop.f32.mrf.mxu3 }
  0xa3   : > { %6147 = vst [vmem:[#allocation4_spill] sm:$0xff] %v4745_v10 }
  0xa4   : > { %v4747_v11 = vpop.f32.mrf.mxu0 }
  0xa7   : > { %3869 = vmatmul.msk.f32.gmra.mxu0 %vm263_vm1, %v254_v12  ;;  %4005 = vmatmul.msk.f32.gmra.mxu3 %vm263_vm1, %v4609_v34  ;;  %v4232_v34 = vld [vmem:[%s6141_s2 + $0x20] sm:$0xf] }
  0xaa   : > { %v4753_v13 = vpop.f32.mrf.mxu3 }
  0xab   : > { %6148 = vst [vmem:[#allocation5_spill] sm:$0xff] %v4753_v13  ;;  %v4171_v13 = vld [vmem:[%s4520_s8 + $0x75] sm:$0xff] }
  0xac   : > { %v4755_v14 = vpop.f32.mrf.mxu0 }
  0xaf   : > { %3870 = vmatmul.msk.f32.gmra.mxu0 %vm263_vm1, %v255_v15  ;;  %4006 = vmatmul.msk.f32.gmra.mxu3 %vm263_vm1, %v4623_v38  ;;  %v4114_v38 = vld [vmem:[%s4520_s8 + $0x2c] sm:$0xff] }
  0xb0   : > { %4139 = vmatmul.msk.f32.gmra.mxu2 %vm263_vm1, %v4114_v38 }
  0xb2   : > { %v4761_v16 = vpop.f32.mrf.mxu3 }
  0xb3   : > { %6149 = vst [vmem:[#allocation6_spill] sm:$0xff] %v4761_v16 }
  0xb4   : > { %v4763_v17 = vpop.f32.mrf.mxu0 }
  0xb7   : > { %3871 = vmatmul.msk.f32.gmra.mxu0 %vm263_vm1, %v256_v18  ;;  %4007 = vmatmul.msk.f32.gmra.mxu3 %vm263_vm1, %v4637_v42  ;;  %v4021_v18 = vld [vmem:[%s4520_s8 + $0x33] sm:$0xff] }
  0xb8   : > { %4140 = vmatmul.msk.f32.gmra.mxu2 %vm263_vm1, %v4115_v41 }
  0xba   : > { %v4769_v19 = vpop.f32.mrf.mxu3 }
  0xbb   : > { %6150 = vst [vmem:[#allocation7_spill] sm:$0xff] %v4769_v19  ;;  %v4170_v19 = vld [vmem:[%s4520_s8 + $0x6d] sm:$0xff] }
  0xbc   : > { %v4771_v20 = vpop.f32.mrf.mxu0 }
  0xbf   : > { %3946 = vmatmul.msk.f32.vlgmr.msrb.gmra.mxu0 %vm263_vm1, %v3921_v21  ;;  %4008 = vmatmul.msk.f32.gmra.mxu3 %vm263_vm1, %v4651_v46  ;;  %v4163_v21 = vld [vmem:[%s4520_s8 + $0x35] sm:$0xff] }
  0xc0   : > { %4233 = vmatpush.msk.msrb.mxu0 %vm333_vm0, %v4232_v34  ;;  %v4164_v34 = vld [vmem:[%s4520_s8 + $0x3d] sm:$0xff] }
  0xc2   : > { %v4777_v22 = vpop.f32.mrf.mxu3 }
  0xc3   : > { %6151 = vst [vmem:[#allocation8_spill] sm:$0xff] %v4777_v22  ;;  %v4127_v22 = vld [vmem:[%s4520_s8 + $0x94] sm:$0xff] }
  0xc4   : > { %v4779_v23 = vpop.f32.mrf.mxu0 }
  0xc7   : > { %3947 = vmatmul.msk.f32.gmra.mxu0 %vm263_vm1, %v3922_v24  ;;  %4009 = vmatmul.msk.f32.gmra.mxu3 %vm263_vm1, %v4665_v50  ;;  %v4865_v50 = vpop.f32.mrf.mxu2  ;;  %v4121_v24 = vld [vmem:[%s4520_s8 + $0x64] sm:$0xff] }
  0xc8   : > { %6159 = vst [vmem:[#allocation16_spill] sm:$0xff] %v4865_v50 }
  0xca   : > { %v605_v27 = vpop.f32.mrf.mxu3 }
  0xcb   : > { %v4791_v28 = vadd.f32 %v605_v27, %v421_v26 }
  0xcc   : > { %v4793_v29 = vpop.f32.mrf.mxu0 }
  0xcd   : > { %6152 = vst [vmem:[#allocation9_spill] sm:$0xff] %v4791_v28  ;;  %v4169_v28 = vld [vmem:[%s4520_s8 + $0x65] sm:$0xff] }
  0xce   : > { %6153 = vst [vmem:[#allocation10_spill] sm:$0xff] %v4793_v29 }
  0xcf   : > { %3948 = vmatmul.msk.f32.gmra.mxu0 %vm263_vm1, %v4615_v36  ;;  %4010 = vmatmul.msk.f32.gmra.mxu3 %vm263_vm1, %v4679_v54  ;;  %v4065_v36 = vld [vmem:[%s4520_s8 + $0x14] sm:$0xff] }
  0xd0   : > { %4090 = vmatmul.msk.f32.vlgmr.msrb.gmra.mxu1 %vm263_vm1, %v4065_v36  ;;  %v4018_v54 = vld [vmem:[%s4520_s8 + $0x1b] sm:$0xff] }
  0xd2   : > { %v4838_v42 = vpop.f32.mrf.mxu3 }
  0xd4   : > { %v4806_v32 = vpop.f32.mrf.mxu0 }
  0xd5   : > { %6154 = vst [vmem:[#allocation11_spill] sm:$0xff] %v4806_v32  ;;  %v4221_v32 = vld [vmem:[%s4520_s8 + $0x86] sm:$0xff] }
  0xd7   : > { %3949 = vmatmul.msk.f32.gmra.mxu0 %vm263_vm1, %v4629_v40  ;;  %4011 = vmatmul.msk.f32.gmra.mxu3 %vm263_vm1, %v4690_v57  ;;  %v4881_v57 = vpop.f32.mrf.mxu2 }
  0xd8   : > { %4091 = vmatmul.msk.f32.gmra.mxu1 %vm263_vm1, %v4066_v39  ;;  %6161 = vst [vmem:[#allocation18_spill] sm:$0xff] %v4881_v57 }
  0xda   : > { %v4850_v45 = vpop.f32.mrf.mxu3 }
  0xdc   : > { %v4825_v37 = vpop.f32.mrf.mxu0 }
  0xdd   : > { %6155 = vst [vmem:[#allocation12_spill] sm:$0xff] %v4825_v37  ;;  %v4219_v37 = vld [vmem:[%s4520_s8 + $0x76] sm:$0xff] }
  0xdf   : > { %3950 = vmatmul.msk.f32.gmra.mxu0 %vm263_vm1, %v4643_v44  ;;  %4012 = vmatmul.msk.f32.gmra.mxu3 %vm263_vm1, %v4701_v60  ;;  %v4116_v44 = vld [vmem:[%s4520_s8 + $0x3c] sm:$0xff]  ;;  %v4901_v8 = vpop.f32.mrf.mxu2 }
  0xe0   : > { %4092 = vmatmul.msk.f32.gmra.mxu1 %vm263_vm1, %v4113_v33  ;;  %4141 = vmatmul.msk.f32.gmra.mxu2 %vm263_vm1, %v4116_v44  ;;  %v4019_v60 = vld [vmem:[%s4520_s8 + $0x23] sm:$0xff]  ;;  %6164 = vst [vmem:[#allocation21_spill] sm:$0xff] %v4901_v8  ;;  %v4022_v33 = vld [vmem:[%s4520_s8 + $0x3b] sm:$0xff] }
  0xe2   : > { %v4867_v51 = vpop.f32.mrf.mxu3 }
  0xe4   : > { %v4835_v40 = vpop.f32.mrf.mxu0 }
  0xe5   : > { %6156 = vst [vmem:[#allocation13_spill] sm:$0xff] %v4835_v40  ;;  %v4217_v40 = vld [vmem:[%s4520_s8 + $0x66] sm:$0xff] }
  0xe7   : > { %3951 = vmatmul.msk.f32.gmra.mxu0 %vm263_vm1, %v4657_v48  ;;  %4013 = vmatmul.msk.f32.gmra.mxu3 %vm263_vm1, %v4712_v63  ;;  %v4017_v48 = vld [vmem:[%s4520_s8 + $0x13] sm:$0xff]  ;;  %v4891_v63 = vpop.f32.mrf.mxu1  ;;  %v4917_v26 = vpop.f32.mrf.mxu2 }
  0xe8   : > { %4093 = vmatmul.msk.f32.gmra.mxu1 %vm263_vm1, %v4114_v38  ;;  %4142 = vmatmul.msk.f32.gmra.mxu2 %vm263_vm1, %v4117_v49  ;;  %6166 = vst [vmem:[#allocation23_spill] sm:$0xff] %v4917_v26  ;;  %v2108_v26 = vld [vmem:[%s5053_s28 + $0xa0] sm:$0xff] }
  0xea   : > { %v4883_v58 = vpop.f32.mrf.mxu3 }
  0xec   : > { %v4846_v43 = vpop.f32.mrf.mxu0 }
  0xed   : > { %6157 = vst [vmem:[#allocation14_spill] sm:$0xff] %v4846_v43  ;;  %v2110_v43 = vld [vmem:[%s5053_s28 + $0xb0] sm:$0xff] }
  0xef   : > { %3952 = vmatmul.msk.f32.gmra.mxu0 %vm263_vm1, %v4671_v52  ;;  %4014 = vmatmul.msk.f32.gmra.mxu3 %vm263_vm1, %v4723_v3  ;;  %v4162_v3 = vld [vmem:[%s4520_s8 + $0x2d] sm:$0xff]  ;;  %v4908_v12 = vpop.f32.mrf.mxu1  ;;  %v4934_v36 = vpop.f32.mrf.mxu2 }
  0xf0   : > { %4094 = vmatmul.msk.f32.gmra.mxu1 %vm263_vm1, %v4115_v41  ;;  %4143 = vmatmul.msk.f32.gmra.mxu2 %vm263_vm1, %v4118_v55  ;;  %6168 = vst [vmem:[#allocation25_spill] sm:$0xff] %v4934_v36  ;;  %v4023_v41 = vld [vmem:[%s4520_s8 + $0x43] sm:$0xff]  ;;  %v2107_v36 = vld [vmem:[%s5053_s28 + $0x98] sm:$0xff] }
  0xf2   : > { %v4903_v9 = vpop.f32.mrf.mxu3 }
  0xf4   : > { %v4857_v46 = vpop.f32.mrf.mxu0 }
  0xf5   : > { %6158 = vst [vmem:[#allocation15_spill] sm:$0xff] %v4857_v46  ;;  %v4176_v46 = vld [vmem:[%s4520_s8 + $0x9d] sm:$0xff] }
  0xf7   : > { %4015 = vmatmul.msk.f32.gmra.mxu3 %vm263_vm1, %v3990_v47  ;;  %4042 = vmatmul.msk.f32.vlgmr.msra.gmra.mxu0 %vm263_vm1, %v4017_v48  ;;  %v4924_v30 = vpop.f32.mrf.mxu1  ;;  %v4123_v47 = vld [vmem:[%s4520_s8 + $0x74] sm:$0xff] }
  0xf8   : > { %4095 = vmatmul.msk.f32.gmra.mxu1 %vm263_vm1, %v4116_v44  ;;  %4144 = vmatmul.msk.f32.gmra.mxu2 %vm263_vm1, %v4119_v62  ;;  %v4165_v44 = vld [vmem:[%s4520_s8 + $0x45] sm:$0xff] }
  0xfa   : > { %v4919_v27 = vpop.f32.mrf.mxu3 }
  0xfc   : > { %v4870_v52 = vpop.f32.mrf.mxu0 }
  0xfd   : > { %6160 = vst [vmem:[#allocation17_spill] sm:$0xff] %v4870_v52  ;;  %v4175_v52 = vld [vmem:[%s4520_s8 + $0x95] sm:$0xff] }
  0xff   : > { %4016 = vmatmul.msk.f32.gmra.mxu3 %vm263_vm1, %v3991_v53  ;;  %4043 = vmatmul.msk.f32.gmra.mxu0 %vm263_vm1, %v4018_v54  ;;  %v4944_v48 = vpop.f32.mrf.mxu1 }
 0x100   : > { %4096 = vmatmul.msk.f32.gmra.mxu1 %vm263_vm1, %v4117_v49  ;;  %4145 = vmatmul.msk.f32.gmra.mxu2 %vm263_vm1, %v4120_v5  ;;  %v4950_v49 = vpop.f32.mrf.mxu2 }
 0x101   : > { %6170 = vst [vmem:[#allocation27_spill] sm:$0xff] %v4950_v49 }
 0x102   : > { %v4936_v38 = vpop.f32.mrf.mxu3 }
 0x104   : > { %v4885_v59 = vpop.f32.mrf.mxu0 }
 0x105   : > { %6162 = vst [vmem:[#allocation19_spill] sm:$0xff] %v4885_v59 }
 0x107   : > { %4044 = vmatmul.msk.f32.gmra.mxu0 %vm263_vm1, %v4019_v60  ;;  %4186 = vmatmul.msk.f32.vlgmr.msrb.gmra.mxu3 %vm263_vm1, %v4161_v61  ;;  %v4166_v60 = vld [vmem:[%s4520_s8 + $0x4d] sm:$0xff]  ;;  %v4124_v61 = vld [vmem:[%s4520_s8 + $0x7c] sm:$0xff] }
 0x108   : > { %4097 = vmatmul.msk.f32.gmra.mxu1 %vm263_vm1, %v4118_v55  ;;  %4146 = vmatmul.msk.f32.gmra.mxu2 %vm263_vm1, %v4121_v24  ;;  %v4024_v55 = vld [vmem:[%s4520_s8 + $0x4b] sm:$0xff] }
 0x10a   : > { %v4952_v53 = vpop.f32.mrf.mxu3 }
 0x10b   : > { %6171 = vst [vmem:[#allocation28_spill] sm:$0xff] %v4952_v53 }
 0x10c   : > { %v4896_v1 = vpop.f32.mrf.mxu0 }
 0x10d   : > { %6163 = vst [vmem:[#allocation20_spill] sm:$0xff] %v4896_v1  ;;  %v4457_v1 = vmov 0  }
 0x10e   : > { %4442 = vset.pattern.permute.xlu0 %v4457_v1  ;;  %4443 = vset.pattern.permute.xlu1 %v4457_v1 }
 0x10f   : > { %4045 = vmatmul.msk.f32.gmra.mxu0 %vm263_vm1, %v4020_v2  ;;  %4187 = vmatmul.msk.f32.gmra.mxu3 %vm263_vm1, %v4162_v3  ;;  %v4025_v3 = vld [vmem:[%s4520_s8 + $0x53] sm:$0xff] }
 0x110   : > { %4098 = vmatmul.msk.f32.gmra.mxu1 %vm263_vm1, %v4119_v62  ;;  %4147 = vmatmul.msk.f32.gmra.mxu2 %vm263_vm1, %v4122_v35  ;;  %v4960_v62 = vpop.f32.mrf.mxu1 }
 0x111   : > { %4444 = vset.pattern.permute.xlu2 %v4457_v1  ;;  %v2089_v1 = vld [vmem:[%s5053_s28 + $0x8] sm:$0xff] }
 0x114   : > { %v4911_v15 = vpop.f32.mrf.mxu0 }
 0x115   : > { %6165 = vst [vmem:[#allocation22_spill] sm:$0xff] %v4911_v15 }
 0x117   : > { %4046 = vmatmul.msk.f32.gmra.mxu0 %vm263_vm1, %v4021_v18  ;;  %4188 = vmatmul.msk.f32.gmra.mxu3 %vm263_vm1, %v4163_v21  ;;  %v4125_v18 = vld [vmem:[%s4520_s8 + $0x84] sm:$0xff]  ;;  %v4970_v21 = vpop.f32.mrf.mxu2 }
 0x118   : > { %4099 = vmatmul.msk.f32.gmra.mxu1 %vm263_vm1, %v4120_v5  ;;  %4148 = vmatmul.msk.f32.gmra.mxu2 %vm263_vm1, %v4123_v47  ;;  %v4167_v5 = vld [vmem:[%s4520_s8 + $0x55] sm:$0xff]  ;;  %6174 = vst [vmem:[#allocation31_spill] sm:$0xff] %v4970_v21 }
 0x11c   : > { %v4926_v31 = vpop.f32.mrf.mxu0 }
 0x11d   : > { %6167 = vst [vmem:[#allocation24_spill] sm:$0xff] %v4926_v31  ;;  %v4129_v31 = vld [vmem:[%s4520_s8 + $0xa4] sm:$0xff] }
 0x11f   : > { %4047 = vmatmul.msk.f32.gmra.mxu0 %vm263_vm1, %v4022_v33  ;;  %4189 = vmatmul.msk.f32.gmra.mxu3 %vm263_vm1, %v4164_v34  ;;  %v4977_v33 = vpop.f32.mrf.mxu1 }
 0x120   : > { %4100 = vmatmul.msk.f32.gmra.mxu1 %vm263_vm1, %v4121_v24  ;;  %4149 = vmatmul.msk.f32.gmra.mxu2 %vm263_vm1, %v4124_v61  ;;  %v4972_v24 = vpop.f32.mrf.mxu3 }
 0x121   : > { %6175 = vst [vmem:[#allocation32_spill] sm:$0xff] %v4972_v24  ;;  %v4220_v24 = vld [vmem:[%s4520_s8 + $0x7e] sm:$0xff] }
 0x124   : > { %v4939_v39 = vpop.f32.mrf.mxu0 }
 0x125   : > { %6169 = vst [vmem:[#allocation26_spill] sm:$0xff] %v4939_v39  ;;  %v4029_v39 = vld [vmem:[%s4520_s8 + $0x73] sm:$0xff] }
 0x127   : > { %4048 = vmatmul.msk.f32.gmra.mxu0 %vm263_vm1, %v4023_v41  ;;  %4190 = vmatmul.msk.f32.gmra.mxu3 %vm263_vm1, %v4165_v44  ;;  %v4168_v41 = vld [vmem:[%s4520_s8 + $0x5d] sm:$0xff]  ;;  %v4126_v44 = vld [vmem:[%s4520_s8 + $0x8c] sm:$0xff] }
 0x128   : > { %4101 = vmatmul.msk.f32.gmra.mxu1 %vm263_vm1, %v4122_v35  ;;  %4150 = vmatmul.msk.f32.gmra.mxu2 %vm263_vm1, %v4125_v18  ;;  %v4026_v35 = vld [vmem:[%s4520_s8 + $0x5b] sm:$0xff] }
 0x12c   : > { %v4954_v54 = vpop.f32.mrf.mxu0 }
 0x12d   : > { %6172 = vst [vmem:[#allocation29_spill] sm:$0xff] %v4954_v54  ;;  %v4128_v54 = vld [vmem:[%s4520_s8 + $0x9c] sm:$0xff] }
 0x12f   : > { %4049 = vmatmul.msk.f32.gmra.mxu0 %vm263_vm1, %v4024_v55  ;;  %4191 = vmatmul.msk.f32.gmra.mxu3 %vm263_vm1, %v4166_v60  ;;  %v4986_v55 = vpop.f32.mrf.mxu2  ;;  %v4988_v60 = vpop.f32.mrf.mxu3 }
 0x130   : > { %4102 = vmatmul.msk.f32.gmra.mxu1 %vm263_vm1, %v4123_v47  ;;  %4151 = vmatmul.msk.f32.gmra.mxu2 %vm263_vm1, %v4126_v44  ;;  %6176 = vst [vmem:[#allocation33_spill] sm:$0xff] %v4986_v55  ;;  %v4993_v47 = vpop.f32.mrf.mxu1  ;;  %v2342_v55 = vld [vmem:[%s6142_s3] sm:$0xff] }
 0x131   : > { %6177 = vst [vmem:[#allocation34_spill] sm:$0xff] %v4988_v60  ;;  %2557 = vmatpush.msra.mxu2 %v2342_v55 }
 0x134   : > { %v4965_v2 = vpop.f32.mrf.mxu0 }
 0x135   : > { %6173 = vst [vmem:[#allocation30_spill] sm:$0xff] %v4965_v2  ;;  %v4028_v2 = vld [vmem:[%s4520_s8 + $0x6b] sm:$0xff] }
 0x137   : > { %4050 = vmatmul.msk.f32.gmra.mxu0 %vm263_vm1, %v4025_v3  ;;  %4192 = vmatmul.msk.f32.gmra.mxu3 %vm263_vm1, %v4167_v5  ;;  %v4027_v5 = vld [vmem:[%s4520_s8 + $0x63] sm:$0xff] }
 0x138   : > { %4103 = vmatmul.msk.f32.gmra.mxu1 %vm263_vm1, %v4124_v61  ;;  %4152 = vmatmul.msk.f32.gmra.mxu2 %vm263_vm1, %v4127_v22  ;;  %v5013_v16 = vpop.f32.mrf.mxu1 }
 0x139   : > { %6180 = vst [vmem:[#allocation37_spill] sm:$0xff] %v5013_v16  ;;  %v4222_v16 = vld [vmem:[%s4520_s8 + $0x8e] sm:$0xff] }
 0x13c   : > { %v4980_v34 = vpop.f32.mrf.mxu0 }
 0x13f   : > { %4051 = vmatmul.msk.f32.gmra.mxu0 %vm263_vm1, %v4026_v35  ;;  %4193 = vmatmul.msk.f32.gmra.mxu3 %vm263_vm1, %v4168_v41  ;;  %v5003_v35 = vpop.f32.mrf.mxu2  ;;  %v5005_v41 = vpop.f32.mrf.mxu3 }
 0x140   : > { %6178 = vst [vmem:[#allocation35_spill] sm:$0xff] %v5003_v35  ;;  %4104 = vmatmul.msk.f32.gmra.mxu1 %vm263_vm1, %v4125_v18  ;;  %4153 = vmatmul.msk.f32.gmra.mxu2 %vm263_vm1, %v4128_v54  ;;  %v5029_v10 = vpop.f32.mrf.mxu1  ;;  %v4131_v35 = vld [vmem:[%s4520_s8 + $0xb4] sm:$0xff] }
 0x141   : > { %6179 = vst [vmem:[#allocation36_spill] sm:$0xff] %v5005_v41 }
 0x142   : > { %6183 = vst [vmem:[#allocation40_spill] sm:$0xff] %v5029_v10 }
 0x144   : > { %v4995_v3 = vpop.f32.mrf.mxu0 }
 0x147   : > { %4052 = vmatmul.msk.f32.gmra.mxu0 %vm263_vm1, %v4027_v5  ;;  %4194 = vmatmul.msk.f32.gmra.mxu3 %vm263_vm1, %v4169_v28  ;;  %v5019_v28 = vpop.f32.mrf.mxu2  ;;  %v5021_v18 = vpop.f32.mrf.mxu3 }
 0x148   : > { %4105 = vmatmul.msk.f32.gmra.mxu1 %vm263_vm1, %v4126_v44  ;;  %6181 = vst [vmem:[#allocation38_spill] sm:$0xff] %v5019_v28  ;;  %4154 = vmatmul.msk.f32.gmra.mxu2 %vm263_vm1, %v4129_v31  ;;  %v4172_v44 = vld [vmem:[%s4520_s8 + $0x7d] sm:$0xff]  ;;  %v4130_v28 = vld [vmem:[%s4520_s8 + $0xac] sm:$0xff] }
 0x149   : > { %6182 = vst [vmem:[#allocation39_spill] sm:$0xff] %v5021_v18  ;;  %v2109_v18 = vld [vmem:[%s5053_s28 + $0xa8] sm:$0xff] }
 0x14c   : > { %v5008_v61 = vpop.f32.mrf.mxu0 }
 0x14f   : > { %4053 = vmatmul.msk.f32.gmra.mxu0 %vm263_vm1, %v4028_v2  ;;  %4195 = vmatmul.msk.f32.gmra.mxu3 %vm263_vm1, %v4170_v19  ;;  %v4030_v2 = vld [vmem:[%s4520_s8 + $0x7b] sm:$0xff]  ;;  %v5039_v15 = vpop.f32.mrf.mxu2  ;;  %v5041_v6 = vpop.f32.mrf.mxu3 }
 0x150   : > { %4106 = vmatmul.msk.f32.gmra.mxu1 %vm263_vm1, %v4127_v22  ;;  %6184 = vst [vmem:[#allocation41_spill] sm:$0xff] %v5039_v15  ;;  %4155 = vmatmul.msk.f32.gmra.mxu2 %vm263_vm1, %v4130_v28  ;;  %v4173_v15 = vld [vmem:[%s4520_s8 + $0x85] sm:$0xff] }
 0x151   : > { %6185 = vst [vmem:[#allocation42_spill] sm:$0xff] %v5041_v6  ;;  %v4133_v6 = vld [vmem:[%s4520_s8 + $0xc4] sm:$0xff] }
 0x154   : > { %v5023_v5 = vpop.f32.mrf.mxu0 }
 0x157   : > { %4054 = vmatmul.msk.f32.gmra.mxu0 %vm263_vm1, %v4029_v39  ;;  %4196 = vmatmul.msk.f32.gmra.mxu3 %vm263_vm1, %v4171_v13  ;;  %v5046_v13 = vpop.f32.mrf.mxu1  ;;  %v4031_v39 = vld [vmem:[%s4520_s8 + $0x83] sm:$0xff] }
 0x158   : > { %6186 = vst [vmem:[#allocation43_spill] sm:$0xff] %v5046_v13  ;;  %4107 = vmatmul.msk.f32.gmra.mxu1 %vm263_vm1, %v4128_v54  ;;  %4156 = vmatmul.msk.f32.gmra.mxu2 %vm263_vm1, %v4131_v35  ;;  %v5062_v54 = vpop.f32.mrf.mxu2 }
 0x159   : > { %6187 = vst [vmem:[#allocation44_spill] sm:$0xff] %v5062_v54  ;;  %v4257_v54 = vld [vmem:[%s6142_s3 + $0x8] sm:$0xff] }
 0x15a   : > { %2432 = vmatpush.msra.mxu1 %v4257_v54  ;;  %v4033_v54 = vld [vmem:[%s4520_s8 + $0x93] sm:$0xff] }
 0x15c   : > { %v5034_v19 = vpop.f32.mrf.mxu0 }
 0x15f   : > { %4055 = vmatmul.msk.f32.gmra.mxu0 %vm263_vm1, %v4030_v2  ;;  %4197 = vmatmul.msk.f32.gmra.mxu3 %vm263_vm1, %v4172_v44  ;;  %v2088_v2 = vld [vmem:[%s5053_s28] sm:$0xff]  ;;  %v5064_v44 = vpop.f32.mrf.mxu3 }
 0x160   : > { %2163 = vperm.xlu0 %4442, %v2088_v2   ;;  %6188 = vst [vmem:[#allocation45_spill] sm:$0xff] %v5064_v44  ;;  %4108 = vmatmul.msk.f32.gmra.mxu1 %vm263_vm1, %v4129_v31  ;;  %v5072_v2 = vpop.f32.mrf.mxu1  ;;  %v4132_v44 = vld [vmem:[%s4520_s8 + $0xbc] sm:$0xff]  ;;  %v5086_v31 = vpop.f32.mrf.mxu2 }
 0x161   : > { %6189 = vst [vmem:[#allocation46_spill] sm:$0xff] %v5072_v2  ;;  %4157 = vmatmul.msk.f32.gmra.mxu2 %vm263_vm1, %v4132_v44  ;;  %v4212_v2 = vld [vmem:[%s4520_s8 + $0x3e] sm:$0xff] }
 0x162   : > { %6190 = vst [vmem:[#allocation47_spill] sm:$0xff] %v5086_v31 }
 0x164   : > { %v5055_v22 = vpop.f32.mrf.mxu0 }
 0x167   : > { %4056 = vmatmul.msk.f32.gmra.mxu0 %vm263_vm1, %v4031_v39  ;;  %4198 = vmatmul.msk.f32.gmra.mxu3 %vm263_vm1, %v4173_v15  ;;  %v4032_v15 = vld [vmem:[%s4520_s8 + $0x8b] sm:$0xff]  ;;  %v5088_v55 = vpop.f32.mrf.mxu3 }
 0x168   : > { %v4174_v39 = vld [vmem:[%s4520_s8 + $0x8d] sm:$0xff]  ;;  %2168 = vperm.xlu0 %4442, %v2089_v1   ;;  %6191 = vst [vmem:[#allocation48_spill] sm:$0xff] %v5088_v55  ;;  %4109 = vmatmul.msk.f32.gmra.mxu1 %vm263_vm1, %v4130_v28  ;;  %v5096_v49 = vpop.f32.mrf.mxu1  ;;  %v5104_v28 = vpop.f32.mrf.mxu2  ;;  %v4034_v55 = vld [vmem:[%s4520_s8 + $0x9b] sm:$0xff] }
 0x169   : > { %6192 = vst [vmem:[#allocation49_spill] sm:$0xff] %v5096_v49  ;;  %4158 = vmatmul.msk.f32.gmra.mxu2 %vm263_vm1, %v4133_v6  ;;  %v4134_v49 = vld [vmem:[%s4520_s8 + $0xcc] sm:$0xff] }
 0x16a   : > { %6193 = vst [vmem:[#allocation50_spill] sm:$0xff] %v5104_v28  ;;  %v4135_v28 = vld [vmem:[%s4520_s8 + $0xd4] sm:$0xff] }
 0x16c   : > { %v5077_v59 = vpop.f32.mrf.mxu0 }
 0x16f   : > { %4057 = vmatmul.msk.f32.gmra.mxu0 %vm263_vm1, %v4032_v15  ;;  %4199 = vmatmul.msk.f32.gmra.mxu3 %vm263_vm1, %v4174_v39  ;;  %v2090_v15 = vld [vmem:[%s5053_s28 + $0x10] sm:$0xff]  ;;  %v5106_v1 = vpop.f32.mrf.mxu3 }
 0x170   : > { %v2094_v39 = vld [vmem:[%s5053_s28 + $0x30] sm:$0xff]  ;;  %2173 = vperm.xlu1 %4443, %v2090_v15   ;;  %4110 = vmatmul.msk.f32.gmra.mxu1 %vm263_vm1, %v4131_v35  ;;  %6194 = vst [vmem:[#allocation51_spill] sm:$0xff] %v5106_v1  ;;  %v5116_v35 = vpop.f32.mrf.mxu1  ;;  %v5126_v1 = vpop.f32.mrf.mxu2 }
 0x171   : > { %2193 = vperm.xlu0 %4442, %v2094_v39   ;;  %4159 = vmatmul.msk.f32.gmra.mxu2 %vm263_vm1, %v4134_v49  ;;  %6195 = vst [vmem:[#allocation52_spill] sm:$0xff] %v5116_v35  ;;  %v4035_v39 = vld [vmem:[%s4520_s8 + $0xa3] sm:$0xff]  ;;  %v2103_v35 = vld [vmem:[%s5053_s28 + $0x78] sm:$0xff] }
 0x172   : > { %v4177_v49 = vld [vmem:[%s4520_s8 + $0xa5] sm:$0xff]  ;;  %6196 = vst [vmem:[#allocation53_spill] sm:$0xff] %v5126_v1 }
 0x173   : > { %v4036_v1 = vld [vmem:[%s4520_s8 + $0xab] sm:$0xff] }
 0x174   : > { %v5091_v21 = vpop.f32.mrf.mxu0 }
 0x177   : > { %4058 = vmatmul.msk.f32.gmra.mxu0 %vm263_vm1, %v4033_v54  ;;  %4200 = vmatmul.msk.f32.gmra.mxu3 %vm263_vm1, %v4175_v52  ;;  %v2091_v54 = vld [vmem:[%s5053_s28 + $0x18] sm:$0xff]  ;;  %v2097_v52 = vld [vmem:[%s5053_s28 + $0x48] sm:$0xff] }
 0x178   : > { %2178 = vperm.xlu1 %4443, %v2091_v54   ;;  %4111 = vmatmul.msk.f32.gmra.mxu1 %vm263_vm1, %v4132_v44  ;;  %v5128_v54 = vpop.f32.mrf.mxu3  ;;  %v5210_v41 = vpop.f32.mrf.mxu2 }
 0x179   : > { %2208 = vperm.xlu0 %4442, %v2097_v52   ;;  %6197 = vst [vmem:[#allocation54_spill] sm:$0xff] %v5128_v54  ;;  %4160 = vmatmul.msk.f32.gmra.mxu2 %vm263_vm1, %v4135_v28  ;;  %v2100_v52 = vld [vmem:[%s5053_s28 + $0x60] sm:$0xff]  ;;  %v4178_v28 = vld [vmem:[%s4520_s8 + $0xad] sm:$0xff] }
 0x17a   : > { %v2098_v54 = vld [vmem:[%s5053_s28 + $0x50] sm:$0xff]  ;;  %6210 = vst [vmem:[#allocation67_spill] sm:$0xff] %v5210_v41 }
 0x17b   : > { %v4215_v41 = vld [vmem:[%s4520_s8 + $0x56] sm:$0xff] }
 0x17c   : > { %v5108_v31 = vpop.f32.mrf.mxu0 }
 0x17f   : > { %4059 = vmatmul.msk.f32.gmra.mxu0 %vm263_vm1, %v4034_v55  ;;  %4201 = vmatmul.msk.f32.gmra.mxu3 %vm263_vm1, %v4176_v46  ;;  %v2095_v55 = vld [vmem:[%s5053_s28 + $0x38] sm:$0xff]  ;;  %v5135_v46 = vpop.f32.mrf.mxu1 }
 0x180   : > { %2198 = vperm.xlu1 %4443, %v2095_v55   ;;  %6198 = vst [vmem:[#allocation55_spill] sm:$0xff] %v5135_v46  ;;  %4112 = vmatmul.msk.f32.gmra.mxu1 %vm263_vm1, %v4133_v6  ;;  %v4037_v6 = vld [vmem:[%s4520_s8 + $0xb3] sm:$0xff] }
 0x181   : > { %2223 = vperm.xlu0 %4442, %v2100_v52   ;;  %v4179_v55 = vld [vmem:[%s4520_s8 + $0xb5] sm:$0xff]  ;;  %v2101_v52 = vld [vmem:[%s5053_s28 + $0x68] sm:$0xff] }
 0x182   : > { %v2106_v46 = vld [vmem:[%s5053_s28 + $0x90] sm:$0xff] }
 0x184   : > { %v5121_v15 = vpop.f32.mrf.mxu0 }
 0x187   : > { %4060 = vmatmul.msk.f32.gmra.mxu0 %vm263_vm1, %v4035_v39  ;;  %4202 = vmatmul.msk.f32.gmra.mxu3 %vm263_vm1, %v4177_v49  ;;  %v5144_v39 = vpop.f32.mrf.mxu3 }
 0x188   : > { %2213 = vperm.xlu1 %4443, %v2098_v54   ;;  %6199 = vst [vmem:[#allocation56_spill] sm:$0xff] %v5144_v39  ;;  %v4038_v54 = vld [vmem:[%s4520_s8 + $0xbb] sm:$0xff] }
 0x189   : > { %2238 = vperm.xlu0 %4442, %v2103_v35   ;;  %v2104_v39 = vld [vmem:[%s5053_s28 + $0x80] sm:$0xff] }
 0x18c   : > { %v5138_v44 = vpop.f32.mrf.mxu0 }
 0x18f   : > { %4061 = vmatmul.msk.f32.gmra.mxu0 %vm263_vm1, %v4036_v1  ;;  %4203 = vmatmul.msk.f32.gmra.mxu3 %vm263_vm1, %v4178_v28  ;;  %v5156_v1 = vpop.f32.mrf.mxu3  ;;  %v4180_v28 = vld [vmem:[%s4520_s8 + $0xbd] sm:$0xff] }
 0x190   : > { %2228 = vperm.xlu1 %4443, %v2101_v52   ;;  %6200 = vst [vmem:[#allocation57_spill] sm:$0xff] %v5156_v1  ;;  %v4181_v52 = vld [vmem:[%s4520_s8 + $0xc5] sm:$0xff] }
 0x191   : > { %2253 = vperm.xlu0 %4442, %v2106_v46   ;;  %v2092_v1 = vld [vmem:[%s5053_s28 + $0x20] sm:$0xff] }
 0x192   : > { %2183 = vperm.xlu2 %4444, %v2092_v1   ;;  %v4183_v1 = vld [vmem:[%s4520_s8 + $0xd5] sm:$0xff] }
 0x194   : > { %v5148_v49 = vpop.f32.mrf.mxu0 }
 0x197   : > { %4062 = vmatmul.msk.f32.gmra.mxu0 %vm263_vm1, %v4037_v6  ;;  %4204 = vmatmul.msk.f32.gmra.mxu3 %vm263_vm1, %v4179_v55  ;;  %v5166_v46 = vpop.f32.mrf.mxu3  ;;  %v4039_v55 = vld [vmem:[%s4520_s8 + $0xc3] sm:$0xff] }
 0x198   : > { %2243 = vperm.xlu1 %4443, %v2104_v39   ;;  %6201 = vst [vmem:[#allocation58_spill] sm:$0xff] %v5166_v46  ;;  %v4182_v39 = vld [vmem:[%s4520_s8 + $0xcd] sm:$0xff] }
 0x199   : > { %2268 = vperm.xlu0 %4442, %v2109_v18   ;;  %v2093_v46 = vld [vmem:[%s5053_s28 + $0x28] sm:$0xff] }
 0x19a   : > { %2188 = vperm.xlu2 %4444, %v2093_v46   ;;  %v4211_v46 = vld [vmem:[%s4520_s8 + $0x36] sm:$0xff] }
 0x19c   : > { %v5158_v35 = vpop.f32.mrf.mxu0 }
 0x19f   : > { %4063 = vmatmul.msk.f32.gmra.mxu0 %vm263_vm1, %v4038_v54  ;;  %4205 = vmatmul.msk.f32.gmra.mxu3 %vm263_vm1, %v4180_v28  ;;  %v4209_v54 = vld [vmem:[%s4520_s8 + $0x26] sm:$0xff]  ;;  %v5180_v28 = vpop.f32.mrf.mxu3 }
 0x1a0   : > { %2258 = vperm.xlu1 %4443, %v2107_v36   ;;  %6204 = vst [vmem:[#allocation61_spill] sm:$0xff] %v5180_v28 }
 0x1a4   : > { %v5168_v6 = vpop.f32.mrf.mxu0 }
 0x1a5   : > { %6202 = vst [vmem:[#allocation59_spill] sm:$0xff] %v5168_v6  ;;  %v358_v6 = vadd.f32 %v4785_v25, %v4727_v4  ;;  %v4332_v4 = vld [vmem:[%s6142_s3 + $0x20] sm:$0xff] }
 0x1a6   : > { %3028 = vmatpush.msrb.mxu2 %v4332_v4 }
 0x1a7   : > { %4064 = vmatmul.msk.f32.gmra.mxu0 %vm263_vm1, %v4039_v55  ;;  %4206 = vmatmul.msk.f32.gmra.mxu3 %vm263_vm1, %v4181_v52  ;;  %v4210_v55 = vld [vmem:[%s4520_s8 + $0x2e] sm:$0xff]  ;;  %v2096_v52 = vld [vmem:[%s5053_s28 + $0x40] sm:$0xff]  ;;  %v5191_v28 = vpop.f32.mrf.mxu3 }
 0x1a8   : > { %2273 = vperm.xlu1 %4443, %v2110_v43   ;;  %2203 = vperm.xlu2 %4444, %v2096_v52   ;;  %6206 = vst [vmem:[#allocation63_spill] sm:$0xff] %v5191_v28  ;;  %v2102_v52 = vld [vmem:[%s5053_s28 + $0x70] sm:$0xff] }
 0x1ac   : > { %v5176_v18 = vpop.f32.mrf.mxu0 }
 0x1ad   : > { %6203 = vst [vmem:[#allocation60_spill] sm:$0xff] %v5176_v18 }
 0x1af   : > { %4207 = vmatmul.msk.f32.gmra.mxu3 %vm263_vm1, %v4182_v39  ;;  %4234 = vmatmul.msk.f32.vlgmr.msrb.gmra.mxu0 %vm263_vm1, %v4209_v54  ;;  %v2099_v39 = vld [vmem:[%s5053_s28 + $0x58] sm:$0xff] }
 0x1b0   : > { %2218 = vperm.xlu2 %4444, %v2099_v39   ;;  %v5212_v39 = vpop.f32.mrf.mxu1 }
 0x1b1   : > { %6211 = vst [vmem:[#allocation68_spill] sm:$0xff] %v5212_v39 }
 0x1b4   : > { %v5186_v36 = vpop.f32.mrf.mxu0 }
 0x1b5   : > { %6205 = vst [vmem:[#allocation62_spill] sm:$0xff] %v5186_v36 }
 0x1b7   : > { %4208 = vmatmul.msk.f32.gmra.mxu3 %vm263_vm1, %v4183_v1  ;;  %4235 = vmatmul.msk.f32.gmra.mxu0 %vm263_vm1, %v4210_v55  ;;  %v4213_v1 = vld [vmem:[%s4520_s8 + $0x46] sm:$0xff] }
 0x1b8   : > { %2233 = vperm.xlu2 %4444, %v2102_v52   ;;  %v2105_v55 = vld [vmem:[%s5053_s28 + $0x88] sm:$0xff]  ;;  %v5221_v52 = vpop.f32.mrf.mxu2 }
 0x1bc   : > { %v5195_v43 = vpop.f32.mrf.mxu0 }
 0x1bd   : > { %6207 = vst [vmem:[#allocation64_spill] sm:$0xff] %v5195_v43 }
 0x1bf   : > { %4236 = vmatmul.msk.f32.gmra.mxu0 %vm263_vm1, %v4211_v46 }
 0x1c0   : > { %2248 = vperm.xlu2 %4444, %v2105_v55   ;;  %v5223_v55 = vpop.f32.mrf.mxu1 }
 0x1c4   : > { %v5200_v54 = vpop.f32.mrf.mxu0 }
 0x1c5   : > { %6208 = vst [vmem:[#allocation65_spill] sm:$0xff] %v5200_v54  ;;  %v4214_v54 = vld [vmem:[%s4520_s8 + $0x4e] sm:$0xff] }
 0x1c7   : > { %4237 = vmatmul.msk.f32.gmra.mxu0 %vm263_vm1, %v4212_v2  ;;  %v5219_v2 = vpop.f32.mrf.mxu3 }
 0x1c8   : > { %2263 = vperm.xlu2 %4444, %v2108_v26   ;;  %6213 = vst [vmem:[#allocation70_spill] sm:$0xff] %v5219_v2  ;;  %v4216_v26 = vld [vmem:[%s4520_s8 + $0x5e] sm:$0xff] }
 0x1cc   : > { %v5205_v28 = vpop.f32.mrf.mxu0 }
 0x1cd   : > { %6209 = vst [vmem:[#allocation66_spill] sm:$0xff] %v5205_v28 }
 0x1cf   : > { %4238 = vmatmul.msk.f32.gmra.mxu0 %vm263_vm1, %v4213_v1  ;;  %v5229_v39 = vpop.f32.mrf.mxu3 }
 0x1d4   : > { %v5214_v46 = vpop.f32.mrf.mxu0 }
 0x1d5   : > { %6212 = vst [vmem:[#allocation69_spill] sm:$0xff] %v5214_v46  ;;  %v5231_v46 = vpop.f32.mrf.mxu2 }
 0x1d7   : > { %4239 = vmatmul.msk.f32.gmra.mxu0 %vm263_vm1, %v4214_v54  ;;  %v5236_v54 = vpop.f32.mrf.mxu1 }
 0x1dc   : > { %v5225_v1 = vpop.f32.mrf.mxu0 }
 0x1dd   : > { %6214 = vst [vmem:[#allocation71_spill] sm:$0xff] %v5225_v1  ;;  %v5242_v1 = vpop.f32.mrf.mxu3  ;;  %v5244_v43 = vpop.f32.mrf.mxu2 }
 0x1df   : > { %4240 = vmatmul.msk.f32.gmra.mxu0 %vm263_vm1, %v4215_v41  ;;  %v5247_v41 = vpop.f32.mrf.mxu1 }
 0x1e4   : > { %v5233_v28 = vpop.f32.mrf.mxu0 }
 0x1e5   : > { %6215 = vst [vmem:[#allocation72_spill] sm:$0xff] %v5233_v28  ;;  %v4294_v28 = vld [vmem:[%s6142_s3 + $0x10] sm:$0xff]  ;;  %v5255_v60 = vpop.f32.mrf.mxu3 }
 0x1e6   : > { %2702 = vmatpush.msra.mxu3 %v4294_v28 }
 0x1e7   : > { %4241 = vmatmul.msk.f32.gmra.mxu0 %vm263_vm1, %v4216_v26  ;;  %v4218_v26 = vld [vmem:[%s4520_s8 + $0x6e] sm:$0xff]  ;;  %v5260_v8 = vpop.f32.mrf.mxu1 }
 0x1ec   : > { %v5239_v2 = vpop.f32.mrf.mxu0 }
 0x1ed   : > { %6216 = vst [vmem:[#allocation73_spill] sm:$0xff] %v5239_v2  ;;  %v5258_v2 = vpop.f32.mrf.mxu2  ;;  %v5266_v36 = vpop.f32.mrf.mxu3 }
 0x1ef   : > { %4242 = vmatmul.msk.f32.gmra.mxu0 %vm263_vm1, %v4217_v40 }
 0x1f4   : > { %v5252_v13 = vpop.f32.mrf.mxu0 }
 0x1f5   : > { %6217 = vst [vmem:[#allocation74_spill] sm:$0xff] %v5252_v13  ;;  %v5268_v28 = vpop.f32.mrf.mxu2  ;;  %v5270_v13 = vpop.f32.mrf.mxu1 }
 0x1f7   : > { %4243 = vmatmul.msk.f32.gmra.mxu0 %vm263_vm1, %v4218_v26  ;;  %v5276_v26 = vpop.f32.mrf.mxu3 }
 0x1fc   : > { %v5262_v40 = vpop.f32.mrf.mxu0 }
 0x1fd   : > { %6218 = vst [vmem:[#allocation75_spill] sm:$0xff] %v5262_v40  ;;  %v5278_v57 = vpop.f32.mrf.mxu2 }
 0x1ff   : > { %4244 = vmatmul.msk.f32.gmra.mxu0 %vm263_vm1, %v4219_v37  ;;  %v5283_v37 = vpop.f32.mrf.mxu1 }
 0x204   : > { %v5272_v10 = vpop.f32.mrf.mxu0 }
 0x205   : > { %6219 = vst [vmem:[#allocation76_spill] sm:$0xff] %v5272_v10  ;;  %v355_v10 = vadd.f32 %v4785_v25, %v4716_v0  ;;  %v5293_v53 = vpop.f32.mrf.mxu2 }
 0x206   : > { %6223 = vst [vmem:[#allocation80_spill] sm:$0xff] %v5293_v53  ;;  %v609_v53 = vadd.f32 %v4891_v63, %v358_v6  ;;  %v361_v63 = vadd.f32 %v4785_v25, %v4735_v7 }
 0x207   : > { %4245 = vmatmul.msk.f32.gmra.mxu0 %vm263_vm1, %v4220_v24  ;;  %v5291_v24 = vpop.f32.mrf.mxu3  ;;  %v5296_v50 = vpop.f32.mrf.mxu1 }
 0x208   : > { %6222 = vst [vmem:[#allocation79_spill] sm:$0xff] %v5291_v24 }
 0x20c   : > { %v5280_v40 = vpop.f32.mrf.mxu0 }
 0x20d   : > { %6220 = vst [vmem:[#allocation77_spill] sm:$0xff] %v5280_v40  ;;  %v608_v40 = vadd.f32 %v4875_v56, %v355_v10 }
 0x20f   : > { %4246 = vmatmul.msk.f32.gmra.mxu0 %vm263_vm1, %v4221_v32  ;;  %v816_v32 = vadd.f32 %v4980_v34, %v608_v40  ;;  %v5306_v24 = vpop.f32.mrf.mxu3  ;;  %v5313_v56 = vpop.f32.mrf.mxu1  ;;  %v817_v34 = vadd.f32 %v4995_v3, %v609_v53  ;;  %v610_v3 = vadd.f32 %v4908_v12, %v361_v63  ;;  %v4225_v12 = vld [vmem:[%s4520_s8 + $0xa6] sm:$0xff] }
 0x211   : > { %v1024_v0 = vadd.f32 %v4838_v42, %v816_v32  ;;  %v4224_v42 = vld [vmem:[%s4520_s8 + $0x9e] sm:$0xff]  ;;  %v1025_v53 = vadd.f32 %v4850_v45, %v817_v34 }
 0x212   : > { %v5344_v45 = vld [vmem:[%s6144_s5] ss:$0 sm:$0xff] }
 0x213   : > { %v1232_v10 = vadd.f32 %v5091_v21, %v1024_v0  ;;  %v1233_v32 = vadd.f32 %v5108_v31, %v1025_v53  ;;  %v364_v31 = vadd.f32 %v4785_v25, %v4747_v11 }
 0x214   : > { %v5286_v18 = vpop.f32.mrf.mxu0 }
 0x215   : > { %6221 = vst [vmem:[#allocation78_spill] sm:$0xff] %v5286_v18  ;;  %v4223_v18 = vld [vmem:[%s4520_s8 + $0x96] sm:$0xff]  ;;  %v1440_v21 = vadd.f32 %v5223_v55, %v1232_v10 }
 0x217   : > { %4247 = vmatmul.msk.f32.gmra.mxu0 %vm263_vm1, %v4222_v16  ;;  %v5309_v16 = vpop.f32.mrf.mxu2  ;;  %v1648_v6 = vadd.f32 %v5221_v52, %v1440_v21  ;;  %v5333_v0 = vpop.f32.mrf.mxu3  ;;  %v1441_v52 = vadd.f32 %v5236_v54, %v1233_v32 }
 0x218   : > { %v5339_v55 = vpop.f32.mrf.mxu1 }
 0x219   : > { %v1856_v7 = vadd.f32 %v5229_v39, %v1648_v6  ;;  %v1649_v63 = vadd.f32 %v5231_v46, %v1441_v52  ;;  %v4226_v6 = vld [vmem:[%s4520_s8 + $0xae] sm:$0xff] }
 0x21b   : > { %v1857_v54 = vadd.f32 %v5242_v1, %v1649_v63 }
 0x21c   : > { %v5300_v29 = vpop.f32.mrf.mxu0 }
 0x21f   : > { %4248 = vmatmul.msk.f32.gmra.mxu0 %vm263_vm1, %v4223_v18  ;;  %v4313_v18 = vld [vmem:[%s6142_s3 + $0x18] sm:$0xff]  ;;  %v5335_v4 = vpop.f32.mrf.mxu2 }
 0x220   : > { %2865 = vmatpush.msrb.mxu1 %v4313_v18  ;;  %v611_v18 = vadd.f32 %v4924_v30, %v364_v31  ;;  %v367_v30 = vadd.f32 %v4785_v25, %v4755_v14 }
 0x222   : > { %v819_v11 = vadd.f32 %v5023_v5, %v611_v18  ;;  %v2174_v18 = vpop.permute.xlu1 %2173 }
 0x224   : > { %v5319_v40 = vpop.f32.mrf.mxu0  ;;  %v1027_v5 = vadd.f32 %v4883_v58, %v819_v11 }
 0x225   : > { %6224 = vst [vmem:[#allocation81_spill] sm:$0xff] %v5319_v40  ;;  %v818_v40 = vadd.f32 %v5008_v61, %v610_v3  ;;  %v5358_v3 = vpop.f32.mrf.mxu3 }
 0x226   : > { %v1235_v14 = vadd.f32 %v5138_v44, %v1027_v5 }
 0x227   : > { %4249 = vmatmul.msk.f32.gmra.mxu0 %vm263_vm1, %v4224_v42  ;;  %v2164_v42 = vpop.permute.xlu0 %2163  ;;  %v1026_v61 = vadd.f32 %v4867_v51, %v818_v40  ;;  %v5361_v51 = vpop.f32.mrf.mxu2 }
 0x229   : > { %v1234_v21 = vadd.f32 %v5121_v15, %v1026_v61  ;;  %v5367_v15 = vpop.f32.mrf.mxu1  ;;  %v370_v61 = vadd.f32 %v4785_v25, %v4763_v17 }
 0x22b   : > { %v1442_v46 = vadd.f32 %v5247_v41, %v1234_v21  ;;  %v613_v17 = vadd.f32 %v4960_v62, %v370_v61 }
 0x22c   : > { %v1995_v10 = vpop.f32.mrf.mxu0 }
 0x22d   : > { %v2064_v34 = vadd.f32 %v1995_v10, %v1856_v7  ;;  %v612_v10 = vadd.f32 %v4944_v48, %v367_v30  ;;  %v1443_v48 = vadd.f32 %v5260_v8, %v1235_v14 }
 0x22f   : > { %vm2111_vm3 = vcmp.gt.f32.partialorder %v2064_v34, 0.0  ;;  %4250 = vmatmul.msk.f32.gmra.mxu0 %vm263_vm1, %v4225_v12  ;;  %v2169_v1 = vpop.permute.xlu0 %2168  ;;  %v1650_v12 = vadd.f32 %v5244_v43, %v1442_v46  ;;  %v820_v52 = vadd.f32 %v5034_v19, %v612_v10  ;;  %v5383_v43 = vpop.f32.mrf.mxu3  ;;  %v1651_v8 = vadd.f32 %v5258_v2, %v1443_v48  ;;  %v4228_v2 = vld [vmem:[%s4520_s8 + $0xbe] sm:$0xff] }
 0x230   : > { %v2138_v39 = vsel %vm2111_vm3, %v5344_v45, 0.0 }
 0x231   : > { %v2276_v53 = vmul.f32 %v2164_v42, %v2138_v39  ;;  %v1858_v34 = vadd.f32 %v5255_v60, %v1650_v12  ;;  %v4227_v42 = vld [vmem:[%s4520_s8 + $0xb6] sm:$0xff]  ;;  %v5385_v39 = vpop.f32.mrf.mxu2  ;;  %v1028_v19 = vadd.f32 %v4903_v9, %v820_v52  ;;  %v5389_v60 = vpop.f32.mrf.mxu1  ;;  %v821_v9 = vadd.f32 %v5055_v22, %v613_v17 }
 0x232   : > { %v4370_v22 = vld [vmem:[%s6142_s3 + $0x30] sm:$0xff] }
 0x233   : > { %2300 = vst.msk [vmem:[#allocation2] sm:$0xff] %vm2299_vm2, %v2276_v53  ;;  %v1236_v21 = vadd.f32 %v5148_v49, %v1028_v19  ;;  %v373_v49 = vadd.f32 %v4785_v25, %v4771_v20  ;;  %3354 = vmatpush.msra.mxu0 %v4370_v22 }
 0x234   : > { %v1998_v40 = vpop.f32.mrf.mxu0 }
 0x235   : > { %v2065_v32 = vadd.f32 %v1998_v40, %v1857_v54  ;;  %v1444_v30 = vadd.f32 %v5270_v13, %v1236_v21  ;;  %v614_v20 = vadd.f32 %v4977_v33, %v373_v49  ;;  %v6226_v21 = vld [vmem:[#allocation79_spill] sm:$0xff]  ;;  %v6229_v49 = vld [vmem:[#allocation28_spill] sm:$0xff] }
 0x237   : > { %vm2112_vm4 = vcmp.gt.f32.partialorder %v2065_v32, 0.0  ;;  %4251 = vmatmul.msk.f32.gmra.mxu0 %vm263_vm1, %v4226_v6  ;;  %v1859_v6 = vadd.f32 %v5266_v36, %v1651_v8  ;;  %v1029_v36 = vadd.f32 %v4919_v27, %v821_v9  ;;  %v5409_v32 = vpop.f32.mrf.mxu3  ;;  %v1652_v25 = vadd.f32 %v5268_v28, %v1444_v30  ;;  %v5430_v28 = vld [vmem:[%s6143_s4] ss:$0 sm:$0xff]  ;;  %v6228_v9 = vld [vmem:[#allocation16_spill] sm:$0xff] }
 0x238   : > { %v2139_v7 = vsel %vm2112_vm4, %v5344_v45, 0.0 }
 0x239   : > { %v2277_v31 = vmul.f32 %v2169_v1, %v2139_v7  ;;  %v5412_v5 = vpop.f32.mrf.mxu2  ;;  %v2179_v1 = vpop.permute.xlu1 %2178  ;;  %v1237_v13 = vadd.f32 %v5158_v35, %v1029_v36  ;;  %v1860_v52 = vadd.f32 %v5276_v26, %v1652_v25  ;;  %v4229_v35 = vld [vmem:[%s4520_s8 + $0xc6] sm:$0xff]  ;;  %v6230_v36 = vld [vmem:[#allocation37_spill] sm:$0xff] }
 0x23a   : > { %v2324_v41 = vld [vmem:[#allocation2] sm:$0xff]  ;;  %v5418_v27 = vpop.f32.mrf.mxu1  ;;  %v6232_v25 = vld [vmem:[#allocation60_spill] sm:$0xff] }
 0x23b   : > { %2301 = vst.msk [vmem:[#allocation2 + $0x8] sm:$0xff] %vm2299_vm2, %v2277_v31  ;;  %4276 = vmatmul.msk.f32.vlgmr.msra.gmra.mxu2 %vm2299_vm2, %v2324_v41  ;;  %v822_v41 = vadd.f32 %v5077_v59, %v614_v20  ;;  %v376_v59 = vadd.f32 %v5430_v28, %v4779_v23  ;;  %v1445_v26 = vadd.f32 %v5283_v37, %v1237_v13 }
 0x23c   : > { %v2001_v58 = vpop.f32.mrf.mxu0 }
 0x23d   : > { %v2066_v44 = vadd.f32 %v2001_v58, %v1858_v34  ;;  %v2184_v58 = vpop.permute.xlu2 %2183  ;;  %v615_v48 = vadd.f32 %v4993_v47, %v376_v59  ;;  %v6233_v59 = vld [vmem:[#allocation11_spill] sm:$0xff] }
 0x23f   : > { %vm2113_vm5 = vcmp.gt.f32.partialorder %v2066_v44, 0.0  ;;  %4252 = vmatmul.msk.f32.gmra.mxu0 %vm263_vm1, %v4227_v42  ;;  %v1030_v42 = vadd.f32 %v4936_v38, %v822_v41  ;;  %v1653_v44 = vadd.f32 %v5278_v57, %v1445_v26  ;;  %v382_v26 = vadd.f32 %v5430_v28, %v6233_v59 }
 0x240   : > { %v2140_v63 = vsel %vm2113_vm5, %v5344_v45, 0.0 }
 0x241   : > { %v2278_v53 = vmul.f32 %v2174_v18, %v2140_v63  ;;  %v6225_v18 = vld [vmem:[#allocation59_spill] sm:$0xff]  ;;  %v5441_v63 = vpop.f32.mrf.mxu3  ;;  %v5443_v37 = vpop.f32.mrf.mxu2 }
 0x242   : > { %v2343_v11 = vld [vmem:[#allocation2 + $0x1] sm:$0xff]  ;;  %v1238_v19 = vadd.f32 %v6225_v18, %v1030_v42  ;;  %v5451_v57 = vpop.f32.mrf.mxu1  ;;  %v2194_v18 = vpop.permute.xlu0 %2193 }
 0x243   : > { %v2325_v54 = vld [vmem:[#allocation2 + $0x8] sm:$0xff]  ;;  %2302 = vst.msk [vmem:[#allocation2 + $0x10] sm:$0xff] %vm2299_vm2, %v2278_v53  ;;  %4258 = vmatmul.msk.f32.vlgmr.msra.gmra.mxu1 %vm2299_vm2, %v2343_v11  ;;  %v1861_v53 = vadd.f32 %v6226_v21, %v1653_v44  ;;  %v6237_v21 = vld [vmem:[#allocation62_spill] sm:$0xff] }
 0x244   : > { %v2613_v40 = vld [vmem:[#allocation2 + $0x2] sm:$0xff]  ;;  %4277 = vmatmul.msk.f32.gmra.mxu2 %vm2299_vm2, %v2325_v54  ;;  %v2004_v62 = vpop.f32.mrf.mxu0  ;;  %v4230_v11 = vld [vmem:[%s4520_s8 + $0xce] sm:$0xff]  ;;  %v6227_v54 = vld [vmem:[#allocation10_spill] sm:$0xff] }
 0x245   : > { %4295 = vmatmul.msk.f32.vlgmr.msra.gmra.mxu3 %vm2299_vm2, %v2613_v40  ;;  %v2067_v46 = vadd.f32 %v2004_v62, %v1859_v6  ;;  %v379_v40 = vadd.f32 %v5430_v28, %v6227_v54  ;;  %v823_v6 = vadd.f32 %v6228_v9, %v615_v48  ;;  %v1446_v62 = vadd.f32 %v5296_v50, %v1238_v19  ;;  %v6235_v48 = vld [vmem:[#allocation32_spill] sm:$0xff] }
 0x247   : > { %vm2114_vm6 = vcmp.gt.f32.partialorder %v2067_v46, 0.0  ;;  %4253 = vmatmul.msk.f32.gmra.mxu0 %vm263_vm1, %v4228_v2  ;;  %v1031_v30 = vadd.f32 %v6229_v49, %v823_v6  ;;  %v2189_v46 = vpop.permute.xlu2 %2188 }
 0x248   : > { %v2141_v7 = vsel %vm2114_vm6, %v5344_v45, 0.0 }
 0x249   : > { %v2279_v10 = vmul.f32 %v2179_v1, %v2141_v7  ;;  %v616_v1 = vadd.f32 %v6230_v36, %v379_v40  ;;  %v6231_v7 = vld [vmem:[#allocation80_spill] sm:$0xff]  ;;  %v1239_v13 = vadd.f32 %v6232_v25, %v1031_v30  ;;  %v5469_v41 = vpop.f32.mrf.mxu3  ;;  %v6240_v36 = vld [vmem:[#allocation34_spill] sm:$0xff] }
 0x24a   : > { %v2344_v12 = vld [vmem:[#allocation2 + $0x9] sm:$0xff]  ;;  %v1654_v20 = vadd.f32 %v6231_v7, %v1446_v62 }
 0x24b   : > { %v2326_v14 = vld [vmem:[#allocation2 + $0x10] sm:$0xff]  ;;  %2303 = vst.msk [vmem:[#allocation2 + $0x18] sm:$0xff] %vm2299_vm2, %v2279_v10  ;;  %4259 = vmatmul.msk.f32.gmra.mxu1 %vm2299_vm2, %v2344_v12 }
 0x24c   : > { %v2614_v31 = vld [vmem:[#allocation2 + $0xa] sm:$0xff]  ;;  %4278 = vmatmul.msk.f32.gmra.mxu2 %vm2299_vm2, %v2326_v14  ;;  %v2007_v33 = vpop.f32.mrf.mxu0 }
 0x24d   : > { %4296 = vmatmul.msk.f32.gmra.mxu3 %vm2299_vm2, %v2614_v31  ;;  %v2068_v34 = vadd.f32 %v2007_v33, %v1860_v52  ;;  %v1862_v31 = vadd.f32 %v5306_v24, %v1654_v20  ;;  %v5474_v52 = vpop.f32.mrf.mxu2  ;;  %v6239_v62 = vld [vmem:[#allocation21_spill] sm:$0xff]  ;;  %v2199_v20 = vpop.permute.xlu1 %2198 }
 0x24f   : > { %vm2115_vm7 = vcmp.gt.f32.partialorder %v2068_v34, 0.0  ;;  %4254 = vmatmul.msk.f32.gmra.mxu0 %vm263_vm1, %v4229_v35  ;;  %v4231_v35 = vld [vmem:[%s4520_s8 + $0xd6] sm:$0xff] }
 0x250   : > { %v2142_v61 = vsel %vm2115_vm7, %v5344_v45, 0.0  ;;  %v6234_v34 = vld [vmem:[#allocation18_spill] sm:$0xff] }
 0x251   : > { %v2280_v23 = vmul.f32 %v2184_v58, %v2142_v61  ;;  %v824_v24 = vadd.f32 %v6234_v34, %v616_v1  ;;  %v1447_v58 = vadd.f32 %v5313_v56, %v1239_v13  ;;  %v5483_v61 = vpop.f32.mrf.mxu1  ;;  %v5503_v30 = vpop.f32.mrf.mxu3  ;;  %v6241_v13 = vld [vmem:[#allocation43_spill] sm:$0xff] }
 0x252   : > { %v2345_v17 = vld [vmem:[#allocation2 + $0x11] sm:$0xff] }
 0x253   : > { %v2327_v8 = vld [vmem:[#allocation2 + $0x18] sm:$0xff]  ;;  %2304 = vst.msk [vmem:[#allocation2 + $0x20] sm:$0xff] %vm2299_vm2, %v2280_v23  ;;  %4260 = vmatmul.msk.f32.gmra.mxu1 %vm2299_vm2, %v2345_v17  ;;  %v1032_v44 = vadd.f32 %v6235_v48, %v824_v24  ;;  %v6236_v23 = vld [vmem:[#allocation40_spill] sm:$0xff] }
 0x254   : > { %v5445_v38 = vld [vmem:[#allocation2 + $0x12] sm:$0xff]  ;;  %4279 = vmatmul.msk.f32.gmra.mxu2 %vm2299_vm2, %v2327_v8  ;;  %v2010_v47 = vpop.f32.mrf.mxu0  ;;  %v617_v17 = vadd.f32 %v6236_v23, %v382_v26  ;;  %v1655_v8 = vadd.f32 %v5309_v16, %v1447_v58  ;;  %v6238_v16 = vld [vmem:[#allocation12_spill] sm:$0xff]  ;;  %v6244_v58 = vld [vmem:[#allocation23_spill] sm:$0xff] }
 0x255   : > { %4297 = vmatmul.msk.f32.gmra.mxu3 %vm2299_vm2, %v5445_v38  ;;  %v2069_v2 = vadd.f32 %v2010_v47, %v1861_v53  ;;  %v1240_v53 = vadd.f32 %v6237_v21, %v1032_v44  ;;  %v385_v6 = vadd.f32 %v5430_v28, %v6238_v16 }
 0x256   : > { %v1863_v40 = vadd.f32 %v5333_v0, %v1655_v8  ;;  %v2204_v8 = vpop.permute.xlu2 %2203 }
 0x257   : > { %vm2116_vm8 = vcmp.gt.f32.partialorder %v2069_v2, 0.0  ;;  %4255 = vmatmul.msk.f32.gmra.mxu0 %vm263_vm1, %v4230_v11  ;;  %v825_v2 = vadd.f32 %v6239_v62, %v617_v17  ;;  %v1448_v49 = vadd.f32 %v5339_v55, %v1240_v53  ;;  %v618_v55 = vadd.f32 %v6241_v13, %v385_v6  ;;  %v6246_v53 = vld [vmem:[#allocation46_spill] sm:$0xff] }
 0x258   : > { %v2143_v22 = vsel %vm2116_vm8, %v5344_v45, 0.0 }
 0x259   : > { %v2281_v10 = vmul.f32 %v2189_v46, %v2143_v22  ;;  %v5505_v46 = vpop.f32.mrf.mxu2  ;;  %v1033_v1 = vadd.f32 %v6240_v36, %v825_v2  ;;  %v5512_v7 = vpop.f32.mrf.mxu1  ;;  %v6249_v36 = vld [vmem:[#allocation25_spill] sm:$0xff] }
 0x25a   : > { %v2346_v12 = vld [vmem:[#allocation2 + $0x19] sm:$0xff]  ;;  %v5533_v23 = vpop.f32.mrf.mxu3 }
 0x25b   : > { %v2328_v14 = vld [vmem:[#allocation2 + $0x20] sm:$0xff]  ;;  %2305 = vst.msk [vmem:[#allocation2 + $0x28] sm:$0xff] %vm2299_vm2, %v2281_v10  ;;  %4261 = vmatmul.msk.f32.gmra.mxu1 %vm2299_vm2, %v2346_v12  ;;  %v1656_v10 = vadd.f32 %v5335_v4, %v1448_v49  ;;  %v6242_v12 = vld [vmem:[#allocation64_spill] sm:$0xff]  ;;  %v6243_v4 = vld [vmem:[#allocation13_spill] sm:$0xff] }
 0x25c   : > { %v5466_v50 = vld [vmem:[#allocation2 + $0x1a] sm:$0xff]  ;;  %4280 = vmatmul.msk.f32.gmra.mxu2 %vm2299_vm2, %v2328_v14  ;;  %v2013_v33 = vpop.f32.mrf.mxu0  ;;  %v1241_v14 = vadd.f32 %v6242_v12, %v1033_v1  ;;  %v388_v24 = vadd.f32 %v5430_v28, %v6243_v4 }
 0x25d   : > { %4298 = vmatmul.msk.f32.gmra.mxu3 %vm2299_vm2, %v5466_v50  ;;  %v2070_v42 = vadd.f32 %v2013_v33, %v1862_v31  ;;  %v1864_v26 = vadd.f32 %v5358_v3, %v1656_v10  ;;  %v6245_v3 = vld [vmem:[#allocation36_spill] sm:$0xff]  ;;  %v6248_v49 = vld [vmem:[#allocation14_spill] sm:$0xff]  ;;  %v2209_v10 = vpop.permute.xlu0 %2208 }
 0x25e   : > { %v1449_v48 = vadd.f32 %v5367_v15, %v1241_v14  ;;  %v6251_v14 = vld [vmem:[#allocation49_spill] sm:$0xff] }
 0x25f   : > { %vm2117_vm9 = vcmp.gt.f32.partialorder %v2070_v42, 0.0  ;;  %4256 = vmatmul.msk.f32.gmra.mxu0 %vm263_vm1, %v4231_v35  ;;  %v826_v42 = vadd.f32 %v6244_v58, %v618_v55 }
 0x260   : > { %v2144_v19 = vsel %vm2117_vm9, %v5344_v45, 0.0  ;;  %v1657_v15 = vadd.f32 %v5361_v51, %v1449_v48 }
 0x261   : > { %v2282_v47 = vmul.f32 %v2194_v18, %v2144_v19  ;;  %v1034_v19 = vadd.f32 %v6245_v3, %v826_v42  ;;  %v5537_v17 = vpop.f32.mrf.mxu2  ;;  %v6253_v3 = vld [vmem:[#allocation15_spill] sm:$0xff] }
 0x262   : > { %v2347_v11 = vld [vmem:[#allocation2 + $0x21] sm:$0xff]  ;;  %v1865_v2 = vadd.f32 %v5383_v43, %v1657_v15  ;;  %v6255_v15 = vld [vmem:[#allocation42_spill] sm:$0xff] }
 0x263   : > { %v2329_v56 = vld [vmem:[#allocation2 + $0x28] sm:$0xff]  ;;  %2306 = vst.msk [vmem:[#allocation2 + $0x30] sm:$0xff] %vm2299_vm2, %v2282_v47  ;;  %4262 = vmatmul.msk.f32.gmra.mxu1 %vm2299_vm2, %v2347_v11  ;;  %v619_v47 = vadd.f32 %v6246_v53, %v388_v24  ;;  %v6247_v11 = vld [vmem:[#allocation65_spill] sm:$0xff]  ;;  %v6250_v43 = vld [vmem:[#allocation39_spill] sm:$0xff] }
 0x264   : > { %v5491_v54 = vld [vmem:[#allocation2 + $0x22] sm:$0xff]  ;;  %4281 = vmatmul.msk.f32.gmra.mxu2 %vm2299_vm2, %v2329_v56  ;;  %v2016_v9 = vpop.f32.mrf.mxu0  ;;  %v1242_v56 = vadd.f32 %v6247_v11, %v1034_v19  ;;  %v394_v19 = vadd.f32 %v5430_v28, %v6253_v3 }
 0x265   : > { %4299 = vmatmul.msk.f32.gmra.mxu3 %vm2299_vm2, %v5491_v54  ;;  %v2071_v0 = vadd.f32 %v2016_v9, %v1863_v40  ;;  %v5507_v22 = vld [vmem:[#allocation2 + $0x24] sm:$0xff]  ;;  %v5543_v9 = vpop.f32.mrf.mxu1  ;;  %v827_v1 = vadd.f32 %v6249_v36, %v619_v47 }
 0x267   : > { %vm2118_vm10 = vcmp.gt.f32.partialorder %v2071_v0, 0.0  ;;  %4371 = vmatmul.msk.f32.vlgmr.msra.gmra.mxu0 %vm2299_vm2, %v5507_v22  ;;  %v391_v0 = vadd.f32 %v5430_v28, %v6248_v49  ;;  %v1035_v55 = vadd.f32 %v6250_v43, %v827_v1 }
 0x268   : > { %v2145_v25 = vsel %vm2118_vm10, %v5344_v45, 0.0 }
 0x269   : > { %v2283_v31 = vmul.f32 %v2199_v20, %v2145_v25  ;;  %v1450_v20 = vadd.f32 %v5389_v60, %v1242_v56  ;;  %v5568_v4 = vpop.f32.mrf.mxu2  ;;  %v2214_v56 = vpop.permute.xlu1 %2213 }
 0x26a   : > { %v2348_v33 = vld [vmem:[#allocation2 + $0x29] sm:$0xff] }
 0x26b   : > { %v2330_v35 = vld [vmem:[#allocation2 + $0x30] sm:$0xff]  ;;  %2307 = vst.msk [vmem:[#allocation2 + $0x38] sm:$0xff] %vm2299_vm2, %v2283_v31  ;;  %4263 = vmatmul.msk.f32.gmra.mxu1 %vm2299_vm2, %v2348_v33  ;;  %v620_v31 = vadd.f32 %v6251_v14, %v391_v0  ;;  %v1658_v33 = vadd.f32 %v5385_v39, %v1450_v20 }
 0x26c   : > { %v5518_v59 = vld [vmem:[#allocation2 + $0x2a] sm:$0xff]  ;;  %4282 = vmatmul.msk.f32.gmra.mxu2 %vm2299_vm2, %v2330_v35  ;;  %v2019_v34 = vpop.f32.mrf.mxu0  ;;  %v6252_v35 = vld [vmem:[#allocation66_spill] sm:$0xff] }
 0x26d   : > { %4300 = vmatmul.msk.f32.gmra.mxu3 %vm2299_vm2, %v5518_v59  ;;  %v2072_v44 = vadd.f32 %v2019_v34, %v1864_v26  ;;  %v5530_v18 = vld [vmem:[#allocation2 + $0x2c] sm:$0xff]  ;;  %v1243_v26 = vadd.f32 %v6252_v35, %v1035_v55  ;;  %v5566_v34 = vpop.f32.mrf.mxu3  ;;  %v1866_v48 = vadd.f32 %v5409_v32, %v1658_v33  ;;  %v5576_v39 = vpop.f32.mrf.mxu1 }
 0x26e   : > { %v6258_v55 = vld [vmem:[#allocation17_spill] sm:$0xff] }
 0x26f   : > { %vm2119_vm11 = vcmp.gt.f32.partialorder %v2072_v44, 0.0  ;;  %4372 = vmatmul.msk.f32.gmra.mxu0 %vm2299_vm2, %v5530_v18  ;;  %v1451_v53 = vadd.f32 %v5418_v27, %v1243_v26  ;;  %v6260_v26 = vld [vmem:[#allocation45_spill] sm:$0xff] }
 0x270   : > { %v2146_v21 = vsel %vm2119_vm11, %v5344_v45, 0.0 }
 0x271   : > { %v2284_v40 = vmul.f32 %v2204_v8, %v2146_v21  ;;  %v6254_v8 = vld [vmem:[#allocation27_spill] sm:$0xff]  ;;  %v5601_v43 = vpop.f32.mrf.mxu2 }
 0x272   : > { %v2349_v16 = vld [vmem:[#allocation2 + $0x31] sm:$0xff]  ;;  %v828_v21 = vadd.f32 %v6254_v8, %v620_v31 }
 0x273   : > { %v2331_v6 = vld [vmem:[#allocation2 + $0x38] sm:$0xff]  ;;  %2308 = vst.msk [vmem:[#allocation2 + $0x40] sm:$0xff] %vm2299_vm2, %v2284_v40  ;;  %4264 = vmatmul.msk.f32.gmra.mxu1 %vm2299_vm2, %v2349_v16  ;;  %v6256_v16 = vld [vmem:[#allocation52_spill] sm:$0xff] }
 0x274   : > { %v5545_v62 = vld [vmem:[#allocation2 + $0x32] sm:$0xff]  ;;  %4283 = vmatmul.msk.f32.gmra.mxu2 %vm2299_vm2, %v2331_v6  ;;  %v2022_v51 = vpop.f32.mrf.mxu0  ;;  %v1036_v11 = vadd.f32 %v6255_v15, %v828_v21  ;;  %v621_v6 = vadd.f32 %v6256_v16, %v394_v19  ;;  %v6262_v19 = vld [vmem:[#allocation71_spill] sm:$0xff] }
 0x275   : > { %4301 = vmatmul.msk.f32.gmra.mxu3 %vm2299_vm2, %v5545_v62  ;;  %v2073_v25 = vadd.f32 %v2022_v51, %v1865_v2  ;;  %v5557_v13 = vld [vmem:[#allocation2 + $0x34] sm:$0xff]  ;;  %v1659_v2 = vadd.f32 %v5412_v5, %v1451_v53  ;;  %v5609_v33 = vpop.f32.mrf.mxu1 }
 0x276   : > { %v6257_v51 = vld [vmem:[#allocation69_spill] sm:$0xff] }
 0x277   : > { %vm2120_vm12 = vcmp.gt.f32.partialorder %v2073_v25, 0.0  ;;  %4373 = vmatmul.msk.f32.gmra.mxu0 %vm2299_vm2, %v5557_v13  ;;  %v1244_v49 = vadd.f32 %v6257_v51, %v1036_v11  ;;  %v1867_v20 = vadd.f32 %v5441_v63, %v1659_v2  ;;  %v5596_v25 = vpop.f32.mrf.mxu3 }
 0x278   : > { %v2147_v12 = vsel %vm2120_vm12, %v5344_v45, 0.0 }
 0x279   : > { %v2285_v60 = vmul.f32 %v2209_v10, %v2147_v12  ;;  %v397_v10 = vadd.f32 %v5430_v28, %v6258_v55  ;;  %v6259_v12 = vld [vmem:[#allocation31_spill] sm:$0xff]  ;;  %v1452_v63 = vadd.f32 %v5451_v57, %v1244_v49  ;;  %v5634_v51 = vpop.f32.mrf.mxu2  ;;  %v6266_v55 = vld [vmem:[#allocation68_spill] sm:$0xff] }
 0x27a   : > { %v2350_v24 = vld [vmem:[#allocation2 + $0x39] sm:$0xff]  ;;  %v829_v14 = vadd.f32 %v6259_v12, %v621_v6  ;;  %v6267_v12 = vld [vmem:[#allocation72_spill] sm:$0xff] }
 0x27b   : > { %v2332_v58 = vld [vmem:[#allocation2 + $0x40] sm:$0xff]  ;;  %2309 = vst.msk [vmem:[#allocation2 + $0x48] sm:$0xff] %vm2299_vm2, %v2285_v60  ;;  %4265 = vmatmul.msk.f32.gmra.mxu1 %vm2299_vm2, %v2350_v24  ;;  %v2219_v24 = vpop.permute.xlu2 %2218  ;;  %v1660_v3 = vadd.f32 %v5443_v37, %v1452_v63 }
 0x27c   : > { %v5570_v42 = vld [vmem:[#allocation2 + $0x3a] sm:$0xff]  ;;  %4284 = vmatmul.msk.f32.gmra.mxu2 %vm2299_vm2, %v2332_v58  ;;  %v2025_v44 = vpop.f32.mrf.mxu0  ;;  %v1037_v60 = vadd.f32 %v6260_v26, %v829_v14 }
 0x27d   : > { %4302 = vmatmul.msk.f32.gmra.mxu3 %vm2299_vm2, %v5570_v42  ;;  %v2074_v32 = vadd.f32 %v2025_v44, %v1866_v48  ;;  %v5584_v47 = vld [vmem:[#allocation2 + $0x3c] sm:$0xff]  ;;  %v1868_v15 = vadd.f32 %v5469_v41, %v1660_v3 }
 0x27e   : > { %v6261_v48 = vld [vmem:[#allocation55_spill] sm:$0xff]  ;;  %v1245_v57 = vadd.f32 %v6262_v19, %v1037_v60 }
 0x27f   : > { %vm2121_vm13 = vcmp.gt.f32.partialorder %v2074_v32, 0.0  ;;  %4374 = vmatmul.msk.f32.gmra.mxu0 %vm2299_vm2, %v5584_v47  ;;  %v622_v44 = vadd.f32 %v6261_v48, %v397_v10  ;;  %v6263_v37 = vld [vmem:[#allocation19_spill] sm:$0xff]  ;;  %v5632_v2 = vpop.f32.mrf.mxu3 }
 0x280   : > { %v2148_v40 = vsel %vm2121_vm13, %v5344_v45, 0.0  ;;  %v1453_v6 = vadd.f32 %v5483_v61, %v1245_v57 }
 0x281   : > { %v2286_v0 = vmul.f32 %v2214_v56, %v2148_v40  ;;  %v400_v56 = vadd.f32 %v5430_v28, %v6263_v37  ;;  %v6264_v40 = vld [vmem:[#allocation33_spill] sm:$0xff] }
 0x282   : > { %v2351_v27 = vld [vmem:[#allocation2 + $0x41] sm:$0xff]  ;;  %v830_v16 = vadd.f32 %v6264_v40, %v622_v44  ;;  %v1661_v10 = vadd.f32 %v5474_v52, %v1453_v6 }
 0x283   : > { %v2333_v36 = vld [vmem:[#allocation2 + $0x48] sm:$0xff]  ;;  %2310 = vst.msk [vmem:[#allocation2 + $0x50] sm:$0xff] %vm2299_vm2, %v2286_v0  ;;  %4266 = vmatmul.msk.f32.gmra.mxu1 %vm2299_vm2, %v2351_v27  ;;  %v623_v61 = vadd.f32 %v6266_v55, %v400_v56  ;;  %v6269_v44 = vld [vmem:[#allocation35_spill] sm:$0xff] }
 0x284   : > { %v5593_v1 = vld [vmem:[#allocation2 + $0x42] sm:$0xff]  ;;  %4285 = vmatmul.msk.f32.gmra.mxu2 %vm2299_vm2, %v2333_v36  ;;  %v2028_v5 = vpop.f32.mrf.mxu0  ;;  %v5641_v36 = vpop.f32.mrf.mxu1 }
 0x285   : > { %4303 = vmatmul.msk.f32.gmra.mxu3 %vm2299_vm2, %v5593_v1  ;;  %v2075_v31 = vadd.f32 %v2028_v5, %v1867_v20  ;;  %v5611_v35 = vld [vmem:[#allocation2 + $0x44] sm:$0xff]  ;;  %v2224_v20 = vpop.permute.xlu0 %2223  ;;  %v831_v3 = vadd.f32 %v6269_v44, %v623_v61  ;;  %v6273_v61 = vld [vmem:[#allocation22_spill] sm:$0xff] }
 0x286   : > { %v6265_v0 = vld [vmem:[#allocation48_spill] sm:$0xff]  ;;  %v6271_v56 = vld [vmem:[#allocation3_spill] sm:$0xff] }
 0x287   : > { %vm2122_vm14 = vcmp.gt.f32.partialorder %v2075_v31, 0.0  ;;  %4375 = vmatmul.msk.f32.gmra.mxu0 %vm2299_vm2, %v5611_v35  ;;  %v1038_v27 = vadd.f32 %v6265_v0, %v830_v16  ;;  %v6268_v52 = vld [vmem:[#allocation20_spill] sm:$0xff]  ;;  %v6272_v16 = vld [vmem:[#allocation73_spill] sm:$0xff] }
 0x288   : > { %v2149_v58 = vsel %vm2122_vm14, %v5344_v45, 0.0  ;;  %v403_v48 = vadd.f32 %v5430_v28, %v6268_v52 }
 0x289   : > { %v2287_v8 = vmul.f32 %v2219_v24, %v2149_v58  ;;  %v1246_v14 = vadd.f32 %v6267_v12, %v1038_v27  ;;  %v1869_v24 = vadd.f32 %v5503_v30, %v1661_v10  ;;  %v6270_v30 = vld [vmem:[#allocation51_spill] sm:$0xff]  ;;  %v406_v10 = vadd.f32 %v5430_v28, %v6273_v61  ;;  %v6274_v12 = vld [vmem:[#allocation38_spill] sm:$0xff] }
 0x28a   : > { %v2352_v21 = vld [vmem:[#allocation2 + $0x49] sm:$0xff]  ;;  %v624_v40 = vadd.f32 %v6271_v56, %v403_v48 }
 0x28b   : > { %v2334_v53 = vld [vmem:[#allocation2 + $0x50] sm:$0xff]  ;;  %2311 = vst.msk [vmem:[#allocation2 + $0x58] sm:$0xff] %vm2299_vm2, %v2287_v8  ;;  %4267 = vmatmul.msk.f32.gmra.mxu1 %vm2299_vm2, %v2352_v21  ;;  %v1454_v19 = vadd.f32 %v5512_v7, %v1246_v14  ;;  %v1039_v21 = vadd.f32 %v6270_v30, %v831_v3  ;;  %v6276_v48 = vld [vmem:[#allocation4_spill] sm:$0xff] }
 0x28c   : > { %v5620_v32 = vld [vmem:[#allocation2 + $0x4a] sm:$0xff]  ;;  %4286 = vmatmul.msk.f32.gmra.mxu2 %vm2299_vm2, %v2334_v53  ;;  %v2031_v11 = vpop.f32.mrf.mxu0  ;;  %v5662_v53 = vpop.f32.mrf.mxu3  ;;  %v832_v14 = vadd.f32 %v6274_v12, %v624_v40  ;;  %v625_v44 = vadd.f32 %v6276_v48, %v406_v10 }
 0x28d   : > { %4304 = vmatmul.msk.f32.gmra.mxu3 %vm2299_vm2, %v5620_v32  ;;  %v2076_v41 = vadd.f32 %v2031_v11, %v1868_v15  ;;  %v5636_v49 = vld [vmem:[#allocation2 + $0x4c] sm:$0xff]  ;;  %v5666_v15 = vpop.f32.mrf.mxu2  ;;  %v2229_v11 = vpop.permute.xlu1 %2228  ;;  %v1662_v7 = vadd.f32 %v5505_v46, %v1454_v19  ;;  %v1247_v6 = vadd.f32 %v6272_v16, %v1039_v21  ;;  %v6277_v19 = vld [vmem:[#allocation74_spill] sm:$0xff] }
 0x28e   : > { %v5672_v0 = vpop.f32.mrf.mxu1  ;;  %v6278_v16 = vld [vmem:[#allocation24_spill] sm:$0xff]  ;;  %v2239_v10 = vpop.permute.xlu0 %2238 }
 0x28f   : > { %vm2123_vm15 = vcmp.gt.f32.partialorder %v2076_v41, 0.0  ;;  %4376 = vmatmul.msk.f32.gmra.mxu0 %vm2299_vm2, %v5636_v49  ;;  %v1870_v55 = vadd.f32 %v5533_v23, %v1662_v7  ;;  %v6275_v23 = vld [vmem:[#allocation54_spill] sm:$0xff] }
 0x290   : > { %v2150_v5 = vsel %vm2123_vm15, %v5344_v45, 0.0 }
 0x291   : > { %v2288_v63 = vmul.f32 %v2224_v20, %v2150_v5 }
 0x292   : > { %v2353_v31 = vld [vmem:[#allocation2 + $0x51] sm:$0xff] }
 0x293   : > { %v2335_v26 = vld [vmem:[#allocation2 + $0x58] sm:$0xff]  ;;  %2312 = vst.msk [vmem:[#allocation2 + $0x60] sm:$0xff] %vm2299_vm2, %v2288_v63  ;;  %4268 = vmatmul.msk.f32.gmra.mxu1 %vm2299_vm2, %v2353_v31  ;;  %v1455_v63 = vadd.f32 %v5543_v9, %v1247_v6  ;;  %v409_v6 = vadd.f32 %v5430_v28, %v6278_v16 }
 0x294   : > { %v5647_v60 = vld [vmem:[#allocation2 + $0x52] sm:$0xff]  ;;  %4287 = vmatmul.msk.f32.gmra.mxu2 %vm2299_vm2, %v2335_v26  ;;  %v2034_v58 = vpop.f32.mrf.mxu0  ;;  %v5695_v30 = vpop.f32.mrf.mxu3 }
 0x295   : > { %4305 = vmatmul.msk.f32.gmra.mxu3 %vm2299_vm2, %v5647_v60  ;;  %v2077_v57 = vadd.f32 %v2034_v58, %v1869_v24  ;;  %v5659_v8 = vld [vmem:[#allocation2 + $0x54] sm:$0xff]  ;;  %v1040_v24 = vadd.f32 %v6275_v23, %v832_v14  ;;  %v2234_v58 = vpop.permute.xlu2 %2233  ;;  %v1663_v3 = vadd.f32 %v5537_v17, %v1455_v63  ;;  %v5697_v21 = vpop.f32.mrf.mxu2  ;;  %v6282_v23 = vld [vmem:[#allocation75_spill] sm:$0xff] }
 0x296   : > { %v5705_v17 = vpop.f32.mrf.mxu1  ;;  %v6281_v14 = vld [vmem:[#allocation5_spill] sm:$0xff] }
 0x297   : > { %vm2124_vm0 = vcmp.gt.f32.partialorder %v2077_v57, 0.0  ;;  %4377 = vmatmul.msk.f32.gmra.mxu0 %vm2299_vm2, %v5659_v8  ;;  %v1248_v57 = vadd.f32 %v6277_v19, %v1040_v24  ;;  %v1871_v40 = vadd.f32 %v5566_v34, %v1663_v3  ;;  %v626_v63 = vadd.f32 %v6281_v14, %v409_v6 }
 0x298   : > { %v2151_v37 = vsel %vm2124_vm0, %v5344_v45, 0.0 }
 0x299   : > { %v2289_v41 = vmul.f32 %v2229_v11, %v2151_v37 }
 0x29a   : > { %v2354_v27 = vld [vmem:[#allocation2 + $0x59] sm:$0xff] }
 0x29b   : > { %v2336_v20 = vld [vmem:[#allocation2 + $0x60] sm:$0xff]  ;;  %2313 = vst.msk [vmem:[#allocation2 + $0x68] sm:$0xff] %vm2299_vm2, %v2289_v41  ;;  %4269 = vmatmul.msk.f32.gmra.mxu1 %vm2299_vm2, %v2354_v27  ;;  %v6279_v41 = vld [vmem:[#allocation41_spill] sm:$0xff] }
 0x29c   : > { %v5674_v5 = vld [vmem:[#allocation2 + $0x5a] sm:$0xff]  ;;  %4288 = vmatmul.msk.f32.gmra.mxu2 %vm2299_vm2, %v2336_v20  ;;  %v2037_v46 = vpop.f32.mrf.mxu0  ;;  %v833_v27 = vadd.f32 %v6279_v41, %v625_v44  ;;  %v1456_v20 = vadd.f32 %v5576_v39, %v1248_v57  ;;  %v5725_v3 = vpop.f32.mrf.mxu3  ;;  %v6285_v41 = vld [vmem:[#allocation57_spill] sm:$0xff] }
 0x29d   : > { %4306 = vmatmul.msk.f32.gmra.mxu3 %vm2299_vm2, %v5674_v5  ;;  %v2078_v31 = vadd.f32 %v2037_v46, %v1870_v55  ;;  %v5686_v26 = vld [vmem:[#allocation2 + $0x5c] sm:$0xff]  ;;  %v6280_v46 = vld [vmem:[#allocation56_spill] sm:$0xff]  ;;  %v5733_v19 = vpop.f32.mrf.mxu2 }
 0x29e   : > { %v1041_v61 = vadd.f32 %v6280_v46, %v833_v27  ;;  %v5741_v16 = vpop.f32.mrf.mxu1  ;;  %v6286_v46 = vld [vmem:[#allocation6_spill] sm:$0xff] }
 0x29f   : > { %vm2125_vm3 = vcmp.gt.f32.partialorder %v2078_v31, 0.0  ;;  %4378 = vmatmul.msk.f32.gmra.mxu0 %vm2299_vm2, %v5686_v26  ;;  %v1664_v31 = vadd.f32 %v5568_v4, %v1456_v20  ;;  %v4351_v4 = vld [vmem:[%s6142_s3 + $0x28] sm:$0xff]  ;;  %v2244_v20 = vpop.permute.xlu1 %2243 }
 0x2a0   : > { %v2152_v52 = vsel %vm2125_vm3, %v5344_v45, 0.0  ;;  %v1249_v24 = vadd.f32 %v6282_v23, %v1041_v61  ;;  %3191 = vmatpush.msrb.mxu3 %v4351_v4 }
 0x2a1   : > { %v2290_v9 = vmul.f32 %v2234_v58, %v2152_v52  ;;  %v1872_v44 = vadd.f32 %v5596_v25, %v1664_v31 }
 0x2a2   : > { %v2355_v11 = vld [vmem:[#allocation2 + $0x61] sm:$0xff] }
 0x2a3   : > { %v2337_v37 = vld [vmem:[#allocation2 + $0x68] sm:$0xff]  ;;  %2314 = vst.msk [vmem:[#allocation2 + $0x70] sm:$0xff] %vm2299_vm2, %v2290_v9  ;;  %4270 = vmatmul.msk.f32.gmra.mxu1 %vm2299_vm2, %v2355_v11  ;;  %v6283_v9 = vld [vmem:[#allocation26_spill] sm:$0xff] }
 0x2a4   : > { %v5699_v56 = vld [vmem:[#allocation2 + $0x62] sm:$0xff]  ;;  %4289 = vmatmul.msk.f32.gmra.mxu2 %vm2299_vm2, %v2337_v37  ;;  %v2040_v7 = vpop.f32.mrf.mxu0  ;;  %v412_v25 = vadd.f32 %v5430_v28, %v6283_v9  ;;  %v5770_v9 = vpop.f32.mrf.mxu3 }
 0x2a5   : > { %4307 = vmatmul.msk.f32.gmra.mxu3 %vm2299_vm2, %v5699_v56  ;;  %v2079_v34 = vadd.f32 %v2040_v7, %v1871_v40  ;;  %v5713_v55 = vld [vmem:[#allocation2 + $0x64] sm:$0xff]  ;;  %v1457_v40 = vadd.f32 %v5609_v33, %v1249_v24 }
 0x2a6   : > { %v6284_v11 = vld [vmem:[#allocation44_spill] sm:$0xff]  ;;  %v627_v61 = vadd.f32 %v6286_v46, %v412_v25 }
 0x2a7   : > { %vm2126_vm4 = vcmp.gt.f32.partialorder %v2079_v34, 0.0  ;;  %4379 = vmatmul.msk.f32.gmra.mxu0 %vm2299_vm2, %v5713_v55  ;;  %v834_v37 = vadd.f32 %v6284_v11, %v626_v63  ;;  %v6287_v33 = vld [vmem:[#allocation76_spill] sm:$0xff]  ;;  %v5772_v11 = vpop.f32.mrf.mxu2 }
 0x2a8   : > { %v2153_v12 = vsel %vm2126_vm4, %v5344_v45, 0.0 }
 0x2a9   : > { %v2291_v58 = vmul.f32 %v2239_v10, %v2153_v12  ;;  %v1042_v27 = vadd.f32 %v6285_v41, %v834_v37  ;;  %v1665_v10 = vadd.f32 %v5601_v43, %v1457_v40  ;;  %v6290_v40 = vld [vmem:[#allocation58_spill] sm:$0xff]  ;;  %v5779_v41 = vpop.f32.mrf.mxu1 }
 0x2aa   : > { %v2356_v39 = vld [vmem:[#allocation2 + $0x69] sm:$0xff] }
 0x2ab   : > { %v2338_v52 = vld [vmem:[#allocation2 + $0x70] sm:$0xff]  ;;  %2315 = vst.msk [vmem:[#allocation2 + $0x78] sm:$0xff] %vm2299_vm2, %v2291_v58  ;;  %4271 = vmatmul.msk.f32.gmra.mxu1 %vm2299_vm2, %v2356_v39  ;;  %v1250_v12 = vadd.f32 %v6287_v33, %v1042_v27  ;;  %v1873_v24 = vadd.f32 %v5632_v2, %v1665_v10  ;;  %v4408_v58 = vld [vmem:[%s6142_s3 + $0x40] sm:$0xff]  ;;  %v4389_v39 = vld [vmem:[%s6142_s3 + $0x38] sm:$0xff]  ;;  %v2249_v27 = vpop.permute.xlu2 %2248 }
 0x2ac   : > { %v5722_v48 = vld [vmem:[#allocation2 + $0x6a] sm:$0xff]  ;;  %4290 = vmatmul.msk.f32.gmra.mxu2 %vm2299_vm2, %v2338_v52  ;;  %v2043_v57 = vpop.f32.mrf.mxu0  ;;  %3517 = vmatpush.msra.mxu1 %v4389_v39 }
 0x2ad   : > { %4308 = vmatmul.msk.f32.gmra.mxu3 %vm2299_vm2, %v5722_v48  ;;  %v2080_v7 = vadd.f32 %v2043_v57, %v1872_v44  ;;  %v5743_v6 = vld [vmem:[#allocation2 + $0x6c] sm:$0xff]  ;;  %3680 = vmatpush.msra.mxu2 %v4408_v58  ;;  %v6289_v44 = vld [vmem:[#allocation47_spill] sm:$0xff]  ;;  %v1458_v57 = vadd.f32 %v5641_v36, %v1250_v12 }
 0x2ae   : > { %v6288_v2 = vld [vmem:[#allocation29_spill] sm:$0xff]  ;;  %v835_v4 = vadd.f32 %v6289_v44, %v627_v61  ;;  %v6291_v36 = vld [vmem:[#allocation7_spill] sm:$0xff] }
 0x2af   : > { %vm2127_vm5 = vcmp.gt.f32.partialorder %v2080_v7, 0.0  ;;  %4380 = vmatmul.msk.f32.gmra.mxu0 %vm2299_vm2, %v5743_v6  ;;  %v415_v52 = vadd.f32 %v5430_v28, %v6288_v2  ;;  %v1666_v46 = vadd.f32 %v5634_v51, %v1458_v57  ;;  %v6292_v61 = vld [vmem:[#allocation77_spill] sm:$0xff]  ;;  %v6293_v51 = vld [vmem:[#allocation30_spill] sm:$0xff] }
 0x2b0   : > { %v2154_v34 = vsel %vm2127_vm5, %v5344_v45, 0.0  ;;  %v1043_v7 = vadd.f32 %v6290_v40, %v835_v4  ;;  %v418_v58 = vadd.f32 %v5430_v28, %v6293_v51  ;;  %v6295_v4 = vld [vmem:[#allocation61_spill] sm:$0xff]  ;;  %v2254_v40 = vpop.permute.xlu0 %2253 }
 0x2b1   : > { %v2292_v14 = vmul.f32 %v2244_v20, %v2154_v34  ;;  %v628_v34 = vadd.f32 %v6291_v36, %v415_v52  ;;  %v6297_v36 = vld [vmem:[#allocation78_spill] sm:$0xff] }
 0x2b2   : > { %v2357_v63 = vld [vmem:[#allocation2 + $0x71] sm:$0xff]  ;;  %v1251_v10 = vadd.f32 %v6292_v61, %v1043_v7 }
 0x2b3   : > { %v2339_v31 = vld [vmem:[#allocation2 + $0x78] sm:$0xff]  ;;  %2316 = vst.msk [vmem:[#allocation2 + $0x80] sm:$0xff] %vm2299_vm2, %v2292_v14  ;;  %4272 = vmatmul.msk.f32.gmra.mxu1 %vm2299_vm2, %v2357_v63 }
 0x2b4   : > { %v5752_v23 = vld [vmem:[#allocation2 + $0x72] sm:$0xff]  ;;  %4291 = vmatmul.msk.f32.gmra.mxu2 %vm2299_vm2, %v2339_v31  ;;  %v2046_v43 = vpop.f32.mrf.mxu0  ;;  %v1874_v31 = vadd.f32 %v5662_v53, %v1666_v46  ;;  %v1459_v2 = vadd.f32 %v5672_v0, %v1251_v10 }
 0x2b5   : > { %4309 = vmatmul.msk.f32.gmra.mxu3 %vm2299_vm2, %v5752_v23  ;;  %v2081_v25 = vadd.f32 %v2046_v43, %v1873_v24  ;;  %v5774_v37 = vld [vmem:[#allocation2 + $0x74] sm:$0xff] }
 0x2b6   : > { %v6294_v43 = vld [vmem:[#allocation50_spill] sm:$0xff]  ;;  %v1667_v0 = vadd.f32 %v5666_v15, %v1459_v2  ;;  %v6298_v15 = vld [vmem:[#allocation53_spill] sm:$0xff] }
 0x2b7   : > { %vm2128_vm6 = vcmp.gt.f32.partialorder %v2081_v25, 0.0  ;;  %4381 = vmatmul.msk.f32.gmra.mxu0 %vm2299_vm2, %v5774_v37  ;;  %v836_v39 = vadd.f32 %v6294_v43, %v628_v34  ;;  %v5800_v25 = vpop.f32.mrf.mxu3 }
 0x2b8   : > { %v2155_v20 = vsel %vm2128_vm6, %v5344_v45, 0.0 }
 0x2b9   : > { %v2293_v33 = vmul.f32 %v2249_v27, %v2155_v20  ;;  %v1044_v57 = vadd.f32 %v6295_v4, %v836_v39  ;;  %v6296_v27 = vld [vmem:[#allocation8_spill] sm:$0xff]  ;;  %v2259_v4 = vpop.permute.xlu1 %2258 }
 0x2ba   : > { %v2358_v12 = vld [vmem:[#allocation2 + $0x79] sm:$0xff]  ;;  %v629_v20 = vadd.f32 %v6296_v27, %v418_v58 }
 0x2bb   : > { %v2340_v14 = vld [vmem:[#allocation2 + $0x80] sm:$0xff]  ;;  %2317 = vst.msk [vmem:[#allocation2 + $0x88] sm:$0xff] %vm2299_vm2, %v2293_v33  ;;  %4273 = vmatmul.msk.f32.gmra.mxu1 %vm2299_vm2, %v2358_v12  ;;  %v1252_v34 = vadd.f32 %v6297_v36, %v1044_v57  ;;  %v1875_v12 = vadd.f32 %v5695_v30, %v1667_v0  ;;  %v2939_v0 = vld [vmem:[#allocation2 + $0x13] sm:$0xff] }
 0x2bc   : > { %v5785_v63 = vld [vmem:[#allocation2 + $0x7a] sm:$0xff]  ;;  %4292 = vmatmul.msk.f32.gmra.mxu2 %vm2299_vm2, %v2340_v14  ;;  %v2049_v24 = vpop.f32.mrf.mxu0 }
 0x2bd   : > { %4310 = vmatmul.msk.f32.gmra.mxu3 %vm2299_vm2, %v5785_v63  ;;  %v2082_v52 = vadd.f32 %v2049_v24, %v1874_v31  ;;  %v5797_v53 = vld [vmem:[#allocation2 + $0x7c] sm:$0xff]  ;;  %v837_v31 = vadd.f32 %v6298_v15, %v629_v20  ;;  %v1460_v24 = vadd.f32 %v5705_v17, %v1252_v34 }
 0x2be   : > { %v2559_v44 = vpop.f32.mrf.mxu2  ;;  %v6299_v30 = vld [vmem:[#allocation63_spill] sm:$0xff] }
 0x2bf   : > { %vm2129_vm7 = vcmp.gt.f32.partialorder %v2082_v52, 0.0  ;;  %4382 = vmatmul.msk.f32.gmra.mxu0 %vm2299_vm2, %v5797_v53  ;;  %v1045_v2 = vadd.f32 %v6299_v30, %v837_v31  ;;  %v1668_v17 = vadd.f32 %v5697_v21, %v1460_v24  ;;  %v6300_v21 = vld [vmem:[#allocation9_spill] sm:$0xff]  ;;  %v6301_v34 = vld [vmem:[#allocation67_spill] sm:$0xff]  ;;  %v2264_v24 = vpop.permute.xlu2 %2263 }
 0x2c0   : > { %v2156_v7 = vsel %vm2129_vm7, %v5344_v45, 0.0  ;;  %v2434_v28 = vpop.f32.mrf.mxu1 }
 0x2c1   : > { %v2294_v46 = vmul.f32 %v2254_v40, %v2156_v7  ;;  %v2560_v58 = vadd.f32 %v2559_v44, %v2434_v28  ;;  %v1253_v44 = vadd.f32 %v5300_v29, %v1045_v2  ;;  %v1876_v36 = vadd.f32 %v5725_v3, %v1668_v17  ;;  %v6302_v3 = vld [vmem:[#allocation70_spill] sm:$0xff]  ;;  %v6303_v2 = vld [vmem:[#allocation81_spill] sm:$0xff] }
 0x2c2   : > { %v2359_v61 = vld [vmem:[#allocation2 + $0x81] sm:$0xff]  ;;  %v838_v29 = vadd.f32 %v6301_v34, %v6300_v21  ;;  %v3102_v17 = vld [vmem:[#allocation2 + $0x14] sm:$0xff] }
 0x2c3   : > { %v2341_v10 = vld [vmem:[#allocation2 + $0x88] sm:$0xff]  ;;  %2318 = vst.msk [vmem:[#allocation2 + $0x90] sm:$0xff] %vm2299_vm2, %v2294_v46  ;;  %4274 = vmatmul.msk.f32.gmra.mxu1 %vm2299_vm2, %v2359_v61  ;;  %v1461_v46 = vadd.f32 %v5741_v16, %v1253_v44 }
 0x2c4   : > { %v5808_v33 = vld [vmem:[#allocation2 + $0x82] sm:$0xff]  ;;  %4293 = vmatmul.msk.f32.gmra.mxu2 %vm2299_vm2, %v2341_v10  ;;  %v2052_v14 = vpop.f32.mrf.mxu0  ;;  %v1046_v15 = vadd.f32 %v6302_v3, %v838_v29 }
 0x2c5   : > { %4311 = vmatmul.msk.f32.gmra.mxu3 %vm2299_vm2, %v5808_v33  ;;  %v2083_v51 = vadd.f32 %v2052_v14, %v1875_v12  ;;  %v5818_v39 = vld [vmem:[#allocation2 + $0x84] sm:$0xff] }
 0x2c7   : > { %v2562_v43 = vpop.f32.mrf.mxu2  ;;  %vm2130_vm8 = vcmp.gt.f32.partialorder %v2083_v51, 0.0  ;;  %4383 = vmatmul.msk.f32.gmra.mxu0 %vm2299_vm2, %v5818_v39  ;;  %v4448_v51 = vld [vmem:[%s6144_s5] ss:$0 sm:$0xff] }
 0x2c8   : > { %v2704_v52 = vpop.f32.mrf.mxu3  ;;  %v2157_v57 = vsel %vm2130_vm8, %v5344_v45, 0.0  ;;  %v2437_v7 = vpop.f32.mrf.mxu1 }
 0x2c9   : > { %v5824_v40 = vadd.f32 %v2704_v52, %v2560_v58  ;;  %v2295_v28 = vmul.f32 %v2259_v4, %v2157_v57  ;;  %v2563_v10 = vadd.f32 %v2562_v43, %v2437_v7  ;;  %v1669_v43 = vadd.f32 %v5733_v19, %v1461_v46  ;;  %v2940_v57 = vld [vmem:[#allocation2 + $0x1b] sm:$0xff] }
 0x2ca   : > { %v2360_v27 = vld [vmem:[#allocation2 + $0x89] sm:$0xff]  ;;  %v1254_v52 = vadd.f32 %v6303_v2, %v1046_v15 }
 0x2cb   : > { %v5828_v20 = vld [vmem:[#allocation2 + $0x8a] sm:$0xff]  ;;  %2319 = vst.msk [vmem:[#allocation2 + $0x98] sm:$0xff] %vm2299_vm2, %v2295_v28  ;;  %4275 = vmatmul.msk.f32.gmra.mxu1 %vm2299_vm2, %v2360_v27  ;;  %v1877_v7 = vadd.f32 %v5770_v9, %v1669_v43 }
 0x2cc   : > { %4333 = vmatmul.msk.f32.vlgmr.msrb.gmra.mxu2 %vm2299_vm2, %v2939_v0  ;;  %v2055_v45 = vpop.f32.mrf.mxu0  ;;  %v5839_v14 = vld [vmem:[#allocation2 + $0x8c] sm:$0xff]  ;;  %v1462_v28 = vadd.f32 %v5779_v41, %v1254_v52 }
 0x2cd   : > { %4312 = vmatmul.msk.f32.gmra.mxu3 %vm2299_vm2, %v5828_v20  ;;  %v2084_v61 = vadd.f32 %v2055_v45, %v1876_v36  ;;  %v2269_v45 = vpop.permute.xlu0 %2268  ;;  %v2942_v2 = vld [vmem:[#allocation2 + $0x2b] sm:$0xff] }
 0x2ce   : > { %v1670_v29 = vadd.f32 %v5772_v11, %v1462_v28 }
 0x2cf   : > { %v2565_v12 = vpop.f32.mrf.mxu2  ;;  %vm2131_vm9 = vcmp.gt.f32.partialorder %v2084_v61, 0.0  ;;  %4384 = vmatmul.msk.f32.gmra.mxu0 %vm2299_vm2, %v5839_v14  ;;  %v2941_v61 = vld [vmem:[#allocation2 + $0x23] sm:$0xff] }
 0x2d0   : > { %v2707_v31 = vpop.f32.mrf.mxu3  ;;  %v2158_v58 = vsel %vm2131_vm9, %v4448_v51, 0.0  ;;  %v2440_v16 = vpop.f32.mrf.mxu1  ;;  %v1878_v41 = vadd.f32 %v5800_v25, %v1670_v29  ;;  %v2945_v29 = vld [vmem:[#allocation2 + $0x43] sm:$0xff] }
 0x2d1   : > { %v5847_v30 = vadd.f32 %v2707_v31, %v2563_v10  ;;  %v2296_v4 = vmul.f32 %v2264_v24, %v2158_v58  ;;  %v2566_v27 = vadd.f32 %v2565_v12, %v2440_v16  ;;  %v3103_v10 = vld [vmem:[#allocation2 + $0x1c] sm:$0xff]  ;;  %v2274_v25 = vpop.permute.xlu1 %2273 }
 0x2d2   : > { %v5858_v36 = vld [vmem:[#allocation2 + $0x94] sm:$0xff] }
 0x2d3   : > { %2320 = vst.msk [vmem:[#allocation2 + $0xa0] sm:$0xff] %vm2299_vm2, %v2296_v4  ;;  %4314 = vmatmul.msk.f32.vlgmr.msrb.gmra.mxu1 %vm2299_vm2, %v5445_v38 }
 0x2d4   : > { %4334 = vmatmul.msk.f32.gmra.mxu2 %vm2299_vm2, %v2940_v57  ;;  %v2058_v44 = vpop.f32.mrf.mxu0 }
 0x2d5   : > { %4352 = vmatmul.msk.f32.vlgmr.msrb.gmra.mxu3 %vm2299_vm2, %v3102_v17  ;;  %v2085_v19 = vadd.f32 %v2058_v44, %v1877_v7  ;;  %v2943_v44 = vld [vmem:[#allocation2 + $0x33] sm:$0xff] }
 0x2d7   : > { %v2568_v0 = vpop.f32.mrf.mxu2  ;;  %vm2132_vm10 = vcmp.gt.f32.partialorder %v2085_v19, 0.0  ;;  %4385 = vmatmul.msk.f32.gmra.mxu0 %vm2299_vm2, %v5858_v36 }
 0x2d8   : > { %v2710_v9 = vpop.f32.mrf.mxu3  ;;  %v2159_v38 = vsel %vm2132_vm10, %v4448_v51, 0.0  ;;  %v2443_v34 = vpop.f32.mrf.mxu1 }
 0x2d9   : > { %v5862_v21 = vadd.f32 %v2710_v9, %v2566_v27  ;;  %v2297_v46 = vmul.f32 %v2269_v45, %v2159_v38  ;;  %v2569_v15 = vadd.f32 %v2568_v0, %v2443_v34  ;;  %v2944_v9 = vld [vmem:[#allocation2 + $0x3b] sm:$0xff] }
 0x2da   : > { %v5871_v24 = vld [vmem:[#allocation2 + $0x9c] sm:$0xff] }
 0x2db   : > { %2321 = vst.msk [vmem:[#allocation2 + $0xa8] sm:$0xff] %vm2299_vm2, %v2297_v46  ;;  %4315 = vmatmul.msk.f32.gmra.mxu1 %vm2299_vm2, %v5466_v50 }
 0x2dc   : > { %4335 = vmatmul.msk.f32.gmra.mxu2 %vm2299_vm2, %v2941_v61  ;;  %v2061_v12 = vpop.f32.mrf.mxu0 }
 0x2dd   : > { %4353 = vmatmul.msk.f32.gmra.mxu3 %vm2299_vm2, %v3103_v10  ;;  %v2086_v3 = vadd.f32 %v2061_v12, %v1878_v41  ;;  %v2946_v10 = vld [vmem:[#allocation2 + $0x4b] sm:$0xff] }
 0x2df   : > { %v2571_v31 = vpop.f32.mrf.mxu2  ;;  %vm2133_vm11 = vcmp.gt.f32.partialorder %v2086_v3, 0.0  ;;  %4386 = vmatmul.msk.f32.gmra.mxu0 %vm2299_vm2, %v5871_v24 }
 0x2e0   : > { %v2713_v11 = vpop.f32.mrf.mxu3  ;;  %v2160_v58 = vsel %vm2133_vm11, %v4448_v51, 0.0  ;;  %v2446_v50 = vpop.f32.mrf.mxu1 }
 0x2e1   : > { %v5875_v16 = vadd.f32 %v2713_v11, %v2569_v15  ;;  %v2298_v43 = vmul.f32 %v2274_v25, %v2160_v58  ;;  %v2572_v52 = vadd.f32 %v2571_v31, %v2446_v50  ;;  %v2947_v31 = vld [vmem:[#allocation2 + $0x53] sm:$0xff]  ;;  %v2948_v50 = vld [vmem:[#allocation2 + $0x5b] sm:$0xff] }
 0x2e2   : > { %v3281_v57 = vld [vmem:[#allocation2 + $0xa4] sm:$0xff] }
 0x2e3   : > { %2322 = vst.msk [vmem:[#allocation2 + $0xb0] sm:$0xff] %vm2299_vm2, %v2298_v43  ;;  %4316 = vmatmul.msk.f32.gmra.mxu1 %vm2299_vm2, %v5491_v54 }
 0x2e4   : > { %4336 = vmatmul.msk.f32.gmra.mxu2 %vm2299_vm2, %v2942_v2 }
 0x2e5   : > { %4354 = vmatmul.msk.f32.gmra.mxu3 %vm2299_vm2, %v5507_v22 }
 0x2e7   : > { %v2574_v4 = vpop.f32.mrf.mxu2  ;;  %4387 = vmatmul.msk.f32.gmra.mxu0 %vm2299_vm2, %v3281_v57 }
 0x2e8   : > { %v2716_v7 = vpop.f32.mrf.mxu3  ;;  %v2449_v17 = vpop.f32.mrf.mxu1 }
 0x2e9   : > { %v5884_v51 = vadd.f32 %v2716_v7, %v2572_v52  ;;  %v2575_v54 = vadd.f32 %v2574_v4, %v2449_v17  ;;  %v2949_v4 = vld [vmem:[#allocation2 + $0x63] sm:$0xff] }
 0x2ea   : > { %v3282_v28 = vld [vmem:[#allocation2 + $0xac] sm:$0xff] }
 0x2eb   : > { %4317 = vmatmul.msk.f32.gmra.mxu1 %vm2299_vm2, %v5518_v59 }
 0x2ec   : > { %4337 = vmatmul.msk.f32.gmra.mxu2 %vm2299_vm2, %v2943_v44  ;;  %v2950_v44 = vld [vmem:[#allocation2 + $0x6b] sm:$0xff] }
 0x2ed   : > { %4355 = vmatmul.msk.f32.gmra.mxu3 %vm2299_vm2, %v5530_v18 }
 0x2ef   : > { %v2577_v22 = vpop.f32.mrf.mxu2  ;;  %4388 = vmatmul.msk.f32.gmra.mxu0 %vm2299_vm2, %v3282_v28 }
 0x2f0   : > { %v2719_v19 = vpop.f32.mrf.mxu3  ;;  %v2452_v0 = vpop.f32.mrf.mxu1 }
 0x2f1   : > { %v5892_v27 = vadd.f32 %v2719_v19, %v2575_v54  ;;  %v2578_v59 = vadd.f32 %v2577_v22, %v2452_v0  ;;  %v2951_v19 = vld [vmem:[#allocation2 + $0x73] sm:$0xff] }
 0x2f3   : > { %4318 = vmatmul.msk.f32.gmra.mxu1 %vm2299_vm2, %v5545_v62 }
 0x2f4   : > { %4338 = vmatmul.msk.f32.gmra.mxu2 %vm2299_vm2, %v2944_v9 }
 0x2f5   : > { %4356 = vmatmul.msk.f32.gmra.mxu3 %vm2299_vm2, %v5557_v13 }
 0x2f7   : > { %v2580_v18 = vpop.f32.mrf.mxu2 }
 0x2f8   : > { %v2722_v45 = vpop.f32.mrf.mxu3  ;;  %v2455_v34 = vpop.f32.mrf.mxu1 }
 0x2f9   : > { %v5899_v38 = vadd.f32 %v2722_v45, %v2578_v59  ;;  %v2581_v62 = vadd.f32 %v2580_v18, %v2455_v34  ;;  %v2952_v18 = vld [vmem:[#allocation2 + $0x7b] sm:$0xff] }
 0x2fb   : > { %4319 = vmatmul.msk.f32.gmra.mxu1 %vm2299_vm2, %v5570_v42 }
 0x2fc   : > { %4339 = vmatmul.msk.f32.gmra.mxu2 %vm2299_vm2, %v2945_v29 }
 0x2fd   : > { %4357 = vmatmul.msk.f32.gmra.mxu3 %vm2299_vm2, %v5584_v47 }
 0x2ff   : > { %v2583_v46 = vpop.f32.mrf.mxu2 }
 0x300   : > { %v2725_v61 = vpop.f32.mrf.mxu3  ;;  %v2458_v13 = vpop.f32.mrf.mxu1 }
 0x301   : > { %v5906_v41 = vadd.f32 %v2725_v61, %v2581_v62  ;;  %v2584_v42 = vadd.f32 %v2583_v46, %v2458_v13  ;;  %v2953_v62 = vld [vmem:[#allocation2 + $0x83] sm:$0xff] }
 0x303   : > { %4320 = vmatmul.msk.f32.gmra.mxu1 %vm2299_vm2, %v5593_v1 }
 0x304   : > { %4340 = vmatmul.msk.f32.gmra.mxu2 %vm2299_vm2, %v2946_v10  ;;  %v2954_v10 = vld [vmem:[#allocation2 + $0x8b] sm:$0xff] }
 0x305   : > { %4358 = vmatmul.msk.f32.gmra.mxu3 %vm2299_vm2, %v5611_v35 }
 0x307   : > { %v2586_v12 = vpop.f32.mrf.mxu2 }
 0x308   : > { %v2728_v3 = vpop.f32.mrf.mxu3  ;;  %v2461_v47 = vpop.f32.mrf.mxu1 }
 0x309   : > { %v5913_v15 = vadd.f32 %v2728_v3, %v2584_v42  ;;  %v2587_v1 = vadd.f32 %v2586_v12, %v2461_v47  ;;  %v2955_v47 = vld [vmem:[#allocation2 + $0x93] sm:$0xff] }
 0x30b   : > { %4321 = vmatmul.msk.f32.gmra.mxu1 %vm2299_vm2, %v5620_v32 }
 0x30c   : > { %4341 = vmatmul.msk.f32.gmra.mxu2 %vm2299_vm2, %v2947_v31 }
 0x30d   : > { %4359 = vmatmul.msk.f32.gmra.mxu3 %vm2299_vm2, %v5636_v49 }
 0x30f   : > { %v2589_v11 = vpop.f32.mrf.mxu2 }
 0x310   : > { %v2731_v25 = vpop.f32.mrf.mxu3  ;;  %v2464_v35 = vpop.f32.mrf.mxu1 }
 0x311   : > { %v5920_v58 = vadd.f32 %v2731_v25, %v2587_v1  ;;  %v2590_v32 = vadd.f32 %v2589_v11, %v2464_v35  ;;  %v2792_v35 = vld [vmem:[#allocation2 + $0x92] sm:$0xff] }
 0x313   : > { %4322 = vmatmul.msk.f32.gmra.mxu1 %vm2299_vm2, %v5647_v60 }
 0x314   : > { %4342 = vmatmul.msk.f32.gmra.mxu2 %vm2299_vm2, %v2948_v50  ;;  %v2956_v50 = vld [vmem:[#allocation2 + $0x9b] sm:$0xff] }
 0x315   : > { %4360 = vmatmul.msk.f32.gmra.mxu3 %vm2299_vm2, %v5659_v8 }
 0x317   : > { %v2592_v43 = vpop.f32.mrf.mxu2 }
 0x318   : > { %v2734_v2 = vpop.f32.mrf.mxu3  ;;  %v2467_v49 = vpop.f32.mrf.mxu1 }
 0x319   : > { %v5927_v52 = vadd.f32 %v2734_v2, %v2590_v32  ;;  %v2593_v60 = vadd.f32 %v2592_v43, %v2467_v49  ;;  %v2793_v2 = vld [vmem:[#allocation2 + $0x9a] sm:$0xff]  ;;  %v3591_v49 = vld [vmem:[#allocation2 + $0x26] sm:$0xff] }
 0x31b   : > { %4323 = vmatmul.msk.f32.gmra.mxu1 %vm2299_vm2, %v5674_v5 }
 0x31c   : > { %4343 = vmatmul.msk.f32.gmra.mxu2 %vm2299_vm2, %v2949_v4 }
 0x31d   : > { %4361 = vmatmul.msk.f32.gmra.mxu3 %vm2299_vm2, %v5686_v26 }
 0x31f   : > { %v2595_v57 = vpop.f32.mrf.mxu2 }
 0x320   : > { %v2737_v7 = vpop.f32.mrf.mxu3  ;;  %v2470_v8 = vpop.f32.mrf.mxu1 }
 0x321   : > { %v5934_v17 = vadd.f32 %v2737_v7, %v2593_v60  ;;  %v2596_v5 = vadd.f32 %v2595_v57, %v2470_v8  ;;  %v3592_v7 = vld [vmem:[#allocation2 + $0x2e] sm:$0xff] }
 0x323   : > { %4324 = vmatmul.msk.f32.gmra.mxu1 %vm2299_vm2, %v5699_v56 }
 0x324   : > { %4344 = vmatmul.msk.f32.gmra.mxu2 %vm2299_vm2, %v2950_v44 }
 0x325   : > { %4362 = vmatmul.msk.f32.gmra.mxu3 %vm2299_vm2, %v5713_v55 }
 0x327   : > { %v2598_v54 = vpop.f32.mrf.mxu2 }
 0x328   : > { %v2740_v22 = vpop.f32.mrf.mxu3  ;;  %v2473_v26 = vpop.f32.mrf.mxu1 }
 0x329   : > { %v5941_v28 = vadd.f32 %v2740_v22, %v2596_v5  ;;  %v2599_v56 = vadd.f32 %v2598_v54, %v2473_v26  ;;  %v3429_v54 = vld [vmem:[#allocation2 + $0x2d] sm:$0xff]  ;;  %v3593_v22 = vld [vmem:[#allocation2 + $0x36] sm:$0xff] }
 0x32b   : > { %4325 = vmatmul.msk.f32.gmra.mxu1 %vm2299_vm2, %v5722_v48 }
 0x32c   : > { %4345 = vmatmul.msk.f32.gmra.mxu2 %vm2299_vm2, %v2951_v19 }
 0x32d   : > { %4363 = vmatmul.msk.f32.gmra.mxu3 %vm2299_vm2, %v5743_v6 }
 0x32f   : > { %v2601_v0 = vpop.f32.mrf.mxu2 }
 0x330   : > { %v2743_v9 = vpop.f32.mrf.mxu3  ;;  %v2476_v55 = vpop.f32.mrf.mxu1 }
 0x331   : > { %v5948_v59 = vadd.f32 %v2743_v9, %v2599_v56  ;;  %v2602_v48 = vadd.f32 %v2601_v0, %v2476_v55  ;;  %v3430_v56 = vld [vmem:[#allocation2 + $0x35] sm:$0xff]  ;;  %v3594_v0 = vld [vmem:[#allocation2 + $0x3e] sm:$0xff] }
 0x333   : > { %4326 = vmatmul.msk.f32.gmra.mxu1 %vm2299_vm2, %v5752_v23 }
 0x334   : > { %4346 = vmatmul.msk.f32.gmra.mxu2 %vm2299_vm2, %v2952_v18 }
 0x335   : > { %4364 = vmatmul.msk.f32.gmra.mxu3 %vm2299_vm2, %v5774_v37 }
 0x337   : > { %v2604_v45 = vpop.f32.mrf.mxu2 }
 0x338   : > { %v2746_v34 = vpop.f32.mrf.mxu3  ;;  %v2479_v6 = vpop.f32.mrf.mxu1 }
 0x339   : > { %v5955_v29 = vadd.f32 %v2746_v34, %v2602_v48  ;;  %v2605_v23 = vadd.f32 %v2604_v45, %v2479_v6  ;;  %v3431_v48 = vld [vmem:[#allocation2 + $0x3d] sm:$0xff]  ;;  %v3595_v45 = vld [vmem:[#allocation2 + $0x46] sm:$0xff] }
 0x33b   : > { %4327 = vmatmul.msk.f32.gmra.mxu1 %vm2299_vm2, %v5785_v63 }
 0x33c   : > { %4347 = vmatmul.msk.f32.gmra.mxu2 %vm2299_vm2, %v2953_v62 }
 0x33d   : > { %4365 = vmatmul.msk.f32.gmra.mxu3 %vm2299_vm2, %v5797_v53 }
 0x33f   : > { %v2607_v46 = vpop.f32.mrf.mxu2 }
 0x340   : > { %v2749_v61 = vpop.f32.mrf.mxu3  ;;  %v2482_v37 = vpop.f32.mrf.mxu1 }
 0x341   : > { %v5962_v13 = vadd.f32 %v2749_v61, %v2605_v23  ;;  %v2608_v63 = vadd.f32 %v2607_v46, %v2482_v37  ;;  %v3432_v23 = vld [vmem:[#allocation2 + $0x45] sm:$0xff]  ;;  %v3596_v46 = vld [vmem:[#allocation2 + $0x4e] sm:$0xff] }
 0x343   : > { %4328 = vmatmul.msk.f32.gmra.mxu1 %vm2299_vm2, %v5808_v33 }
 0x344   : > { %4348 = vmatmul.msk.f32.gmra.mxu2 %vm2299_vm2, %v2954_v10 }
 0x345   : > { %4366 = vmatmul.msk.f32.gmra.mxu3 %vm2299_vm2, %v5818_v39 }
 0x347   : > { %v2610_v42 = vpop.f32.mrf.mxu2 }
 0x348   : > { %v2752_v12 = vpop.f32.mrf.mxu3  ;;  %v2485_v53 = vpop.f32.mrf.mxu1 }
 0x349   : > { %v5969_v3 = vadd.f32 %v2752_v12, %v2608_v63  ;;  %v2611_v33 = vadd.f32 %v2610_v42, %v2485_v53  ;;  %v3433_v63 = vld [vmem:[#allocation2 + $0x4d] sm:$0xff]  ;;  %v3597_v42 = vld [vmem:[#allocation2 + $0x56] sm:$0xff] }
 0x34b   : > { %4329 = vmatmul.msk.f32.gmra.mxu1 %vm2299_vm2, %v5828_v20 }
 0x34c   : > { %4349 = vmatmul.msk.f32.gmra.mxu2 %vm2299_vm2, %v2955_v47 }
 0x34d   : > { %4367 = vmatmul.msk.f32.gmra.mxu3 %vm2299_vm2, %v5839_v14 }
 0x34f   : > { %v3030_v31 = vpop.f32.mrf.mxu2 }
 0x350   : > { %v2755_v1 = vpop.f32.mrf.mxu3  ;;  %v2867_v39 = vpop.f32.mrf.mxu1 }
 0x351   : > { %v5976_v11 = vadd.f32 %v2755_v1, %v2611_v33  ;;  %v2921_v25 = vadd.f32 %v2867_v39, %v5824_v40  ;;  %v3434_v33 = vld [vmem:[#allocation2 + $0x55] sm:$0xff] }
 0x353   : > { %4330 = vmatmul.msk.f32.gmra.mxu1 %vm2299_vm2, %v2792_v35  ;;  %v5981_v20 = vadd.f32 %v3030_v31, %v2921_v25  ;;  %v3598_v31 = vld [vmem:[#allocation2 + $0x5e] sm:$0xff] }
 0x354   : > { %4350 = vmatmul.msk.f32.gmra.mxu2 %vm2299_vm2, %v2956_v50  ;;  %v3435_v35 = vld [vmem:[#allocation2 + $0x5d] sm:$0xff]  ;;  %v3599_v50 = vld [vmem:[#allocation2 + $0x66] sm:$0xff] }
 0x355   : > { %4368 = vmatmul.msk.f32.gmra.mxu3 %vm2299_vm2, %v5858_v36  ;;  %v3428_v36 = vld [vmem:[#allocation2 + $0x25] sm:$0xff] }
 0x357   : > { %v3033_v14 = vpop.f32.mrf.mxu2 }
 0x358   : > { %v2870_v32 = vpop.f32.mrf.mxu1 }
 0x359   : > { %v2922_v43 = vadd.f32 %v2870_v32, %v5847_v30 }
 0x35b   : > { %4331 = vmatmul.msk.f32.gmra.mxu1 %vm2299_vm2, %v2793_v2  ;;  %v5988_v40 = vadd.f32 %v3033_v14, %v2922_v43  ;;  %v3436_v2 = vld [vmem:[#allocation2 + $0x65] sm:$0xff] }
 0x35c   : > { %4409 = vmatmul.msk.f32.vlgmr.msra.gmra.mxu2 %vm2299_vm2, %v3591_v49  ;;  %v3600_v49 = vld [vmem:[#allocation2 + $0x6e] sm:$0xff] }
 0x35d   : > { %4369 = vmatmul.msk.f32.gmra.mxu3 %vm2299_vm2, %v5871_v24 }
 0x35f   : > { %v3036_v4 = vpop.f32.mrf.mxu2 }
 0x360   : > { %v2873_v60 = vpop.f32.mrf.mxu1 }
 0x361   : > { %v2923_v57 = vadd.f32 %v2873_v60, %v5862_v21 }
 0x363   : > { %4390 = vmatmul.msk.f32.vlgmr.msra.gmra.mxu1 %vm2299_vm2, %v3428_v36  ;;  %v5995_v30 = vadd.f32 %v3036_v4, %v2923_v57  ;;  %v3437_v36 = vld [vmem:[#allocation2 + $0x6d] sm:$0xff] }
 0x364   : > { %4410 = vmatmul.msk.f32.gmra.mxu2 %vm2299_vm2, %v3592_v7  ;;  %v3601_v7 = vld [vmem:[#allocation2 + $0x76] sm:$0xff] }
 0x367   : > { %v3039_v8 = vpop.f32.mrf.mxu2 }
 0x368   : > { %v2876_v44 = vpop.f32.mrf.mxu1 }
 0x369   : > { %v2924_v5 = vadd.f32 %v2876_v44, %v5875_v16 }
 0x36b   : > { %4391 = vmatmul.msk.f32.gmra.mxu1 %vm2299_vm2, %v3429_v54  ;;  %v6000_v24 = vadd.f32 %v3039_v8, %v2924_v5  ;;  %v3438_v54 = vld [vmem:[#allocation2 + $0x75] sm:$0xff] }
 0x36c   : > { %4411 = vmatmul.msk.f32.gmra.mxu2 %vm2299_vm2, %v3593_v22  ;;  %v3602_v22 = vld [vmem:[#allocation2 + $0x7e] sm:$0xff] }
 0x36f   : > { %v3042_v21 = vpop.f32.mrf.mxu2 }
 0x370   : > { %v2879_v26 = vpop.f32.mrf.mxu1 }
 0x371   : > { %v2925_v19 = vadd.f32 %v2879_v26, %v5884_v51 }
 0x373   : > { %4392 = vmatmul.msk.f32.gmra.mxu1 %vm2299_vm2, %v3430_v56  ;;  %v6005_v9 = vadd.f32 %v3042_v21, %v2925_v19 }
 0x374   : > { %4412 = vmatmul.msk.f32.gmra.mxu2 %vm2299_vm2, %v3594_v0  ;;  %v3439_v0 = vld [vmem:[#allocation2 + $0x7d] sm:$0xff] }
 0x377   : > { %v3045_v16 = vpop.f32.mrf.mxu2 }
 0x378   : > { %v2882_v55 = vpop.f32.mrf.mxu1 }
 0x379   : > { %v2926_v18 = vadd.f32 %v2882_v55, %v5892_v27  ;;  %v3356_v55 = vpop.f32.mrf.mxu0 }
 0x37b   : > { %4393 = vmatmul.msk.f32.gmra.mxu1 %vm2299_vm2, %v3431_v48  ;;  %v6010_v34 = vadd.f32 %v3045_v16, %v2926_v18  ;;  %v3603_v16 = vld [vmem:[#allocation2 + $0x86] sm:$0xff] }
 0x37c   : > { %4413 = vmatmul.msk.f32.gmra.mxu2 %vm2299_vm2, %v3595_v45 }
 0x37f   : > { %v3048_v51 = vpop.f32.mrf.mxu2 }
 0x380   : > { %v2885_v6 = vpop.f32.mrf.mxu1 }
 0x381   : > { %v2927_v62 = vadd.f32 %v2885_v6, %v5899_v38  ;;  %v3440_v6 = vld [vmem:[#allocation2 + $0x85] sm:$0xff] }
 0x383   : > { %4394 = vmatmul.msk.f32.gmra.mxu1 %vm2299_vm2, %v3432_v23  ;;  %v6015_v61 = vadd.f32 %v3048_v51, %v2927_v62  ;;  %v3604_v62 = vld [vmem:[#allocation2 + $0x8e] sm:$0xff]  ;;  %v3359_v23 = vpop.f32.mrf.mxu0 }
 0x384   : > { %4414 = vmatmul.msk.f32.gmra.mxu2 %vm2299_vm2, %v3596_v46 }
 0x387   : > { %v3051_v27 = vpop.f32.mrf.mxu2 }
 0x388   : > { %v2888_v37 = vpop.f32.mrf.mxu1 }
 0x389   : > { %v2928_v10 = vadd.f32 %v2888_v37, %v5906_v41 }
 0x38b   : > { %4395 = vmatmul.msk.f32.gmra.mxu1 %vm2299_vm2, %v3433_v63  ;;  %v6020_v12 = vadd.f32 %v3051_v27, %v2928_v10  ;;  %v3441_v63 = vld [vmem:[#allocation2 + $0x8d] sm:$0xff] }
 0x38c   : > { %4415 = vmatmul.msk.f32.gmra.mxu2 %vm2299_vm2, %v3597_v42  ;;  %v3605_v42 = vld [vmem:[#allocation2 + $0x96] sm:$0xff] }
 0x38f   : > { %v3054_v38 = vpop.f32.mrf.mxu2 }
 0x390   : > { %v2891_v53 = vpop.f32.mrf.mxu1 }
 0x391   : > { %v2929_v47 = vadd.f32 %v2891_v53, %v5913_v15  ;;  %v3362_v53 = vpop.f32.mrf.mxu0 }
 0x393   : > { %4396 = vmatmul.msk.f32.gmra.mxu1 %vm2299_vm2, %v3434_v33  ;;  %v6025_v1 = vadd.f32 %v3054_v38, %v2929_v47 }
 0x394   : > { %4416 = vmatmul.msk.f32.gmra.mxu2 %vm2299_vm2, %v3598_v31  ;;  %v3442_v31 = vld [vmem:[#allocation2 + $0x95] sm:$0xff] }
 0x397   : > { %v3057_v41 = vpop.f32.mrf.mxu2 }
 0x398   : > { %v2894_v39 = vpop.f32.mrf.mxu1 }
 0x399   : > { %v2930_v25 = vadd.f32 %v2894_v39, %v5920_v58 }
 0x39b   : > { %4397 = vmatmul.msk.f32.gmra.mxu1 %vm2299_vm2, %v3435_v35  ;;  %v6030_v14 = vadd.f32 %v3057_v41, %v2930_v25  ;;  %v3606_v41 = vld [vmem:[#allocation2 + $0x9e] sm:$0xff] }
 0x39c   : > { %4417 = vmatmul.msk.f32.gmra.mxu2 %vm2299_vm2, %v3599_v50 }
 0x39f   : > { %v3060_v15 = vpop.f32.mrf.mxu2 }
 0x3a0   : > { %v2897_v32 = vpop.f32.mrf.mxu1 }
 0x3a1   : > { %v2931_v43 = vadd.f32 %v2897_v32, %v5927_v52  ;;  %v3443_v32 = vld [vmem:[#allocation2 + $0x9d] sm:$0xff] }
 0x3a3   : > { %4398 = vmatmul.msk.f32.gmra.mxu1 %vm2299_vm2, %v3436_v2  ;;  %v6035_v4 = vadd.f32 %v3060_v15, %v2931_v43  ;;  %v3365_v15 = vpop.f32.mrf.mxu0  ;;  %v3607_v43 = vld [vmem:[#allocation2 + $0xa6] sm:$0xff] }
 0x3a4   : > { %4418 = vmatmul.msk.f32.gmra.mxu2 %vm2299_vm2, %v3600_v49 }
 0x3a7   : > { %v3063_v58 = vpop.f32.mrf.mxu2 }
 0x3a8   : > { %v2900_v60 = vpop.f32.mrf.mxu1 }
 0x3a9   : > { %v2932_v57 = vadd.f32 %v2900_v60, %v5934_v17  ;;  %v3193_v17 = vpop.f32.mrf.mxu3 }
 0x3ab   : > { %4399 = vmatmul.msk.f32.gmra.mxu1 %vm2299_vm2, %v3437_v36  ;;  %v6040_v8 = vadd.f32 %v3063_v58, %v2932_v57 }
 0x3ac   : > { %4419 = vmatmul.msk.f32.gmra.mxu2 %vm2299_vm2, %v3601_v7 }
 0x3af   : > { %v3066_v52 = vpop.f32.mrf.mxu2 }
 0x3b0   : > { %v2903_v44 = vpop.f32.mrf.mxu1 }
 0x3b1   : > { %v2933_v5 = vadd.f32 %v2903_v44, %v5941_v28  ;;  %v3196_v48 = vpop.f32.mrf.mxu3  ;;  %v3368_v44 = vpop.f32.mrf.mxu0 }
 0x3b2   : > { %v3248_v7 = vadd.f32 %v3196_v48, %v5988_v40 }
 0x3b3   : > { %4400 = vmatmul.msk.f32.gmra.mxu1 %vm2299_vm2, %v3438_v54  ;;  %v6045_v21 = vadd.f32 %v3066_v52, %v2933_v5 }
 0x3b4   : > { %4420 = vmatmul.msk.f32.gmra.mxu2 %vm2299_vm2, %v3602_v22  ;;  %v3411_v22 = vadd.f32 %v3359_v23, %v3248_v7 }
 0x3b7   : > { %v3069_v26 = vpop.f32.mrf.mxu2 }
 0x3b8   : > { %v2906_v19 = vpop.f32.mrf.mxu1 }
 0x3b9   : > { %v2934_v56 = vadd.f32 %v2906_v19, %v5948_v59  ;;  %v3199_v37 = vpop.f32.mrf.mxu3  ;;  %v3445_v19 = vld [vmem:[#allocation2 + $0xad] sm:$0xff]  ;;  %v3371_v40 = vpop.f32.mrf.mxu0 }
 0x3bb   : > { %4401 = vmatmul.msk.f32.gmra.mxu1 %vm2299_vm2, %v3439_v0  ;;  %v6050_v28 = vadd.f32 %v3069_v26, %v2934_v56  ;;  %v3249_v56 = vadd.f32 %v3199_v37, %v5995_v30 }
 0x3bc   : > { %4421 = vmatmul.msk.f32.gmra.mxu2 %vm2299_vm2, %v3603_v16 }
 0x3bf   : > { %v3072_v18 = vpop.f32.mrf.mxu2 }
 0x3c0   : > { %v2909_v45 = vpop.f32.mrf.mxu1 }
 0x3c1   : > { %v2935_v51 = vadd.f32 %v2909_v45, %v5955_v29  ;;  %v3202_v39 = vpop.f32.mrf.mxu3  ;;  %v3374_v30 = vpop.f32.mrf.mxu0 }
 0x3c3   : > { %4402 = vmatmul.msk.f32.gmra.mxu1 %vm2299_vm2, %v3440_v6  ;;  %v6055_v59 = vadd.f32 %v3072_v18, %v2935_v51  ;;  %v3250_v51 = vadd.f32 %v3202_v39, %v6000_v24 }
 0x3c4   : > { %4422 = vmatmul.msk.f32.gmra.mxu2 %vm2299_vm2, %v3604_v62 }
 0x3c5   : > { %v3413_v23 = vadd.f32 %v3365_v15, %v3250_v51 }
 0x3c7   : > { %v3075_v46 = vpop.f32.mrf.mxu2 }
 0x3c8   : > { %v2912_v27 = vpop.f32.mrf.mxu1 }
 0x3c9   : > { %v2936_v10 = vadd.f32 %v2912_v27, %v5962_v13  ;;  %v3205_v49 = vpop.f32.mrf.mxu3 }
 0x3ca   : > { %v3251_v37 = vadd.f32 %v3205_v49, %v6005_v9 }
 0x3cb   : > { %4403 = vmatmul.msk.f32.gmra.mxu1 %vm2299_vm2, %v3441_v63  ;;  %v6060_v29 = vadd.f32 %v3075_v46, %v2936_v10 }
 0x3cc   : > { %4423 = vmatmul.msk.f32.gmra.mxu2 %vm2299_vm2, %v3605_v42 }
 0x3cf   : > { %v3078_v38 = vpop.f32.mrf.mxu2 }
 0x3d0   : > { %v2915_v47 = vpop.f32.mrf.mxu1 }
 0x3d1   : > { %v2937_v33 = vadd.f32 %v2915_v47, %v5969_v3  ;;  %v3247_v3 = vadd.f32 %v3193_v17, %v5981_v20  ;;  %v3608_v20 = vld [vmem:[#allocation2 + $0xae] sm:$0xff]  ;;  %v3208_v54 = vpop.f32.mrf.mxu3  ;;  %v3377_v47 = vpop.f32.mrf.mxu0 }
 0x3d3   : > { %4404 = vmatmul.msk.f32.gmra.mxu1 %vm2299_vm2, %v3442_v31  ;;  %v6065_v13 = vadd.f32 %v3078_v38, %v2937_v33  ;;  %v3410_v60 = vadd.f32 %v3356_v55, %v3247_v3  ;;  %v3412_v55 = vadd.f32 %v3362_v53, %v3249_v56  ;;  %v3414_v38 = vadd.f32 %v3368_v44, %v3251_v37 }
 0x3d4   : > { %4424 = vmatmul.msk.f32.gmra.mxu2 %vm2299_vm2, %v3606_v41  ;;  %v3252_v33 = vadd.f32 %v3208_v54, %v6010_v34 }
 0x3d7   : > { %v3081_v25 = vpop.f32.mrf.mxu2 }
 0x3d8   : > { %v2918_v35 = vpop.f32.mrf.mxu1 }
 0x3d9   : > { %v2938_v50 = vadd.f32 %v2918_v35, %v5976_v11  ;;  %v3444_v11 = vld [vmem:[#allocation2 + $0xa5] sm:$0xff]  ;;  %v3211_v48 = vpop.f32.mrf.mxu3 }
 0x3db   : > { %4405 = vmatmul.msk.f32.gmra.mxu1 %vm2299_vm2, %v3443_v32  ;;  %v6073_v2 = vadd.f32 %v3081_v25, %v2938_v50  ;;  %v3415_v25 = vadd.f32 %v3371_v40, %v3252_v33  ;;  %v3253_v50 = vadd.f32 %v3211_v48, %v6015_v61  ;;  %v3380_v32 = vpop.f32.mrf.mxu0 }
 0x3dc   : > { %4425 = vmatmul.msk.f32.gmra.mxu2 %vm2299_vm2, %v3607_v43 }
 0x3dd   : > { %v3416_v49 = vadd.f32 %v3374_v30, %v3253_v50 }
 0x3df   : > { %v3682_v58 = vpop.f32.mrf.mxu2 }
 0x3e0   : > { %v3519_v57 = vpop.f32.mrf.mxu1 }
 0x3e1   : > { %v3573_v36 = vadd.f32 %v3519_v57, %v3410_v60  ;;  %v3214_v10 = vpop.f32.mrf.mxu3 }
 0x3e2   : > { %v3254_v60 = vadd.f32 %v3214_v10, %v6020_v12 }
 0x3e3   : > { %v3736_v52 = vadd.f32 %v3682_v58, %v3573_v36  ;;  %4406 = vmatmul.msk.f32.gmra.mxu1 %vm2299_vm2, %v3444_v11  ;;  %v3383_v36 = vpop.f32.mrf.mxu0 }
 0x3e4   : > { %4426 = vmatmul.msk.f32.gmra.mxu2 %vm2299_vm2, %v3608_v20  ;;  %v3417_v20 = vadd.f32 %v3377_v47, %v3254_v60 }
 0x3e5   : > { %3754 = vst.msk [vmem:[%s6078_s10] sm:$0xff] %vm263_vm1, %v3736_v52 }
 0x3e7   : > { %v3685_v5 = vpop.f32.mrf.mxu2 }
 0x3e8   : > { %v3522_v17 = vpop.f32.mrf.mxu1 }
 0x3e9   : > { %v3574_v26 = vadd.f32 %v3522_v17, %v3411_v22  ;;  %v3217_v41 = vpop.f32.mrf.mxu3 }
 0x3ea   : > { %v3255_v44 = vadd.f32 %v3217_v41, %v6025_v1 }
 0x3eb   : > { %v3737_v0 = vadd.f32 %v3685_v5, %v3574_v26  ;;  %4407 = vmatmul.msk.f32.gmra.mxu1 %vm2299_vm2, %v3445_v19  ;;  %v3386_v17 = vpop.f32.mrf.mxu0 }
 0x3ec   : > { %v3418_v22 = vadd.f32 %v3380_v32, %v3255_v44 }
 0x3ed   : > { %3755 = vst.msk [vmem:[%s6078_s10 + $0x8] sm:$0xff] %vm263_vm1, %v3737_v0 }
 0x3ef   : > { %v3688_v16 = vpop.f32.mrf.mxu2 }
 0x3f0   : > { %v3525_v18 = vpop.f32.mrf.mxu1 }
 0x3f1   : > { %v3575_v45 = vadd.f32 %v3525_v18, %v3412_v55  ;;  %v3220_v3 = vpop.f32.mrf.mxu3 }
 0x3f2   : > { %v3256_v19 = vadd.f32 %v3220_v3, %v6030_v14 }
 0x3f3   : > { %v3738_v6 = vadd.f32 %v3688_v16, %v3575_v45  ;;  %v3389_v18 = vpop.f32.mrf.mxu0 }
 0x3f4   : > { %v3419_v16 = vadd.f32 %v3383_v36, %v3256_v19 }
 0x3f5   : > { %3756 = vst.msk [vmem:[%s6078_s10 + $0x10] sm:$0xff] %vm263_vm1, %v3738_v6 }
 0x3f7   : > { %v3691_v62 = vpop.f32.mrf.mxu2 }
 0x3f8   : > { %v3528_v46 = vpop.f32.mrf.mxu1 }
 0x3f9   : > { %v3576_v27 = vadd.f32 %v3528_v46, %v3413_v23  ;;  %v3223_v7 = vpop.f32.mrf.mxu3 }
 0x3fa   : > { %v3257_v48 = vadd.f32 %v3223_v7, %v6035_v4 }
 0x3fb   : > { %v3739_v63 = vadd.f32 %v3691_v62, %v3576_v27  ;;  %v3392_v27 = vpop.f32.mrf.mxu0 }
 0x3fc   : > { %v3420_v62 = vadd.f32 %v3386_v17, %v3257_v48 }
 0x3fd   : > { %3757 = vst.msk [vmem:[%s6078_s10 + $0x18] sm:$0xff] %vm263_vm1, %v3739_v63 }
 0x3ff   : > { %v3694_v42 = vpop.f32.mrf.mxu2 }
 0x400   : > { %v3531_v53 = vpop.f32.mrf.mxu1 }
 0x401   : > { %v3577_v24 = vadd.f32 %v3531_v53, %v3414_v38  ;;  %v3226_v56 = vpop.f32.mrf.mxu3 }
 0x402   : > { %v3258_v30 = vadd.f32 %v3226_v56, %v6040_v8 }
 0x403   : > { %v3740_v31 = vadd.f32 %v3694_v42, %v3577_v24  ;;  %v3395_v24 = vpop.f32.mrf.mxu0 }
 0x404   : > { %v3421_v63 = vadd.f32 %v3389_v18, %v3258_v30 }
 0x405   : > { %3758 = vst.msk [vmem:[%s6078_s10 + $0x20] sm:$0xff] %vm263_vm1, %v3740_v31 }
 0x407   : > { %v3697_v39 = vpop.f32.mrf.mxu2 }
 0x408   : > { %v3534_v9 = vpop.f32.mrf.mxu1 }
 0x409   : > { %v3578_v35 = vadd.f32 %v3534_v9, %v3415_v25  ;;  %v3229_v51 = vpop.f32.mrf.mxu3 }
 0x40a   : > { %v3259_v38 = vadd.f32 %v3229_v51, %v6045_v21 }
 0x40b   : > { %v3741_v15 = vadd.f32 %v3697_v39, %v3578_v35  ;;  %v3398_v50 = vpop.f32.mrf.mxu0 }
 0x40c   : > { %v3422_v33 = vadd.f32 %v3392_v27, %v3259_v38 }
 0x40d   : > { %3759 = vst.msk [vmem:[%s6078_s10 + $0x28] sm:$0xff] %vm263_vm1, %v3741_v15 }
 0x40f   : > { %v3700_v43 = vpop.f32.mrf.mxu2 }
 0x410   : > { %v3537_v34 = vpop.f32.mrf.mxu1 }
 0x411   : > { %v3579_v58 = vadd.f32 %v3537_v34, %v3416_v49  ;;  %v3232_v10 = vpop.f32.mrf.mxu3 }
 0x412   : > { %v3260_v39 = vadd.f32 %v3232_v10, %v6050_v28 }
 0x413   : > { %v3742_v57 = vadd.f32 %v3700_v43, %v3579_v58  ;;  %v3401_v60 = vpop.f32.mrf.mxu0 }
 0x414   : > { %v3423_v35 = vadd.f32 %v3395_v24, %v3260_v39 }
 0x415   : > { %3760 = vst.msk [vmem:[%s6078_s10 + $0x30] sm:$0xff] %vm263_vm1, %v3742_v57 }
 0x417   : > { %v3703_v11 = vpop.f32.mrf.mxu2 }
 0x418   : > { %v3540_v61 = vpop.f32.mrf.mxu1 }
 0x419   : > { %v3580_v52 = vadd.f32 %v3540_v61, %v3417_v20  ;;  %v3235_v31 = vpop.f32.mrf.mxu3 }
 0x41a   : > { %v3261_v32 = vadd.f32 %v3235_v31, %v6055_v59 }
 0x41b   : > { %v3743_v5 = vadd.f32 %v3703_v11, %v3580_v52 }
 0x41c   : > { %v3424_v34 = vadd.f32 %v3398_v50, %v3261_v32 }
 0x41d   : > { %3761 = vst.msk [vmem:[%s6078_s10 + $0x38] sm:$0xff] %vm263_vm1, %v3743_v5  ;;  %v3404_v5 = vpop.f32.mrf.mxu0 }
 0x41f   : > { %v3706_v54 = vpop.f32.mrf.mxu2 }
 0x420   : > { %v3543_v12 = vpop.f32.mrf.mxu1 }
 0x421   : > { %v3581_v26 = vadd.f32 %v3543_v12, %v3418_v22  ;;  %v3238_v43 = vpop.f32.mrf.mxu3 }
 0x422   : > { %v3262_v57 = vadd.f32 %v3238_v43, %v6060_v29 }
 0x423   : > { %v3744_v0 = vadd.f32 %v3706_v54, %v3581_v26 }
 0x424   : > { %v3425_v61 = vadd.f32 %v3401_v60, %v3262_v57 }
 0x425   : > { %3762 = vst.msk [vmem:[%s6078_s10 + $0x40] sm:$0xff] %vm263_vm1, %v3744_v0  ;;  %v3407_v56 = vpop.f32.mrf.mxu0 }
 0x427   : > { %v3709_v40 = vpop.f32.mrf.mxu2 }
 0x428   : > { %v3546_v55 = vpop.f32.mrf.mxu1 }
 0x429   : > { %v3582_v1 = vadd.f32 %v3546_v55, %v3419_v16  ;;  %v3241_v11 = vpop.f32.mrf.mxu3 }
 0x42a   : > { %v3263_v52 = vadd.f32 %v3241_v11, %v6065_v13 }
 0x42b   : > { %v3745_v45 = vadd.f32 %v3709_v40, %v3582_v1 }
 0x42c   : > { %v3426_v22 = vadd.f32 %v3404_v5, %v3263_v52 }
 0x42d   : > { %3763 = vst.msk [vmem:[%s6078_s10 + $0x48] sm:$0xff] %vm263_vm1, %v3745_v45 }
 0x42f   : > { %v3712_v6 = vpop.f32.mrf.mxu2 }
 0x430   : > { %v3549_v14 = vpop.f32.mrf.mxu1 }
 0x431   : > { %v3583_v23 = vadd.f32 %v3549_v14, %v3420_v62  ;;  %v3244_v54 = vpop.f32.mrf.mxu3 }
 0x432   : > { %v3264_v26 = vadd.f32 %v3244_v54, %v6073_v2 }
 0x433   : > { %v3746_v46 = vadd.f32 %v3712_v6, %v3583_v23 }
 0x434   : > { %v3427_v0 = vadd.f32 %v3407_v56, %v3264_v26 }
 0x435   : > { %3764 = vst.msk [vmem:[%s6078_s10 + $0x50] sm:$0xff] %vm263_vm1, %v3746_v46 }
 0x437   : > { %v3715_v37 = vpop.f32.mrf.mxu2 }
 0x438   : > { %v3552_v4 = vpop.f32.mrf.mxu1 }
 0x439   : > { %v3584_v42 = vadd.f32 %v3552_v4, %v3421_v63 }
 0x43b   : > { %v3747_v53 = vadd.f32 %v3715_v37, %v3584_v42 }
 0x43d   : > { %3765 = vst.msk [vmem:[%s6078_s10 + $0x58] sm:$0xff] %vm263_vm1, %v3747_v53 }
 0x43f   : > { %v3718_v47 = vpop.f32.mrf.mxu2 }
 0x440   : > { %v3555_v8 = vpop.f32.mrf.mxu1 }
 0x441   : > { %v3585_v41 = vadd.f32 %v3555_v8, %v3422_v33 }
 0x443   : > { %v3748_v25 = vadd.f32 %v3718_v47, %v3585_v41 }
 0x445   : > { %3766 = vst.msk [vmem:[%s6078_s10 + $0x60] sm:$0xff] %vm263_vm1, %v3748_v25 }
 0x447   : > { %v3721_v9 = vpop.f32.mrf.mxu2 }
 0x448   : > { %v3558_v21 = vpop.f32.mrf.mxu1 }
 0x449   : > { %v3586_v15 = vadd.f32 %v3558_v21, %v3423_v35 }
 0x44b   : > { %v3749_v3 = vadd.f32 %v3721_v9, %v3586_v15 }
 0x44d   : > { %3767 = vst.msk [vmem:[%s6078_s10 + $0x68] sm:$0xff] %vm263_vm1, %v3749_v3 }
 0x44f   : > { %v3724_v49 = vpop.f32.mrf.mxu2 }
 0x450   : > { %v3561_v58 = vpop.f32.mrf.mxu1 }
 0x451   : > { %v3587_v28 = vadd.f32 %v3561_v58, %v3424_v34 }
 0x453   : > { %v3750_v36 = vadd.f32 %v3724_v49, %v3587_v28 }
 0x455   : > { %3768 = vst.msk [vmem:[%s6078_s10 + $0x70] sm:$0xff] %vm263_vm1, %v3750_v36 }
 0x457   : > { %v3727_v20 = vpop.f32.mrf.mxu2 }
 0x458   : > { %v3564_v59 = vpop.f32.mrf.mxu1 }
 0x459   : > { %v3588_v7 = vadd.f32 %v3564_v59, %v3425_v61 }
 0x45b   : > { %v3751_v44 = vadd.f32 %v3727_v20, %v3588_v7 }
 0x45d   : > { %3769 = vst.msk [vmem:[%s6078_s10 + $0x78] sm:$0xff] %vm263_vm1, %v3751_v44 }
 0x45f   : > { %v3730_v17 = vpop.f32.mrf.mxu2 }
 0x460   : > { %v3567_v29 = vpop.f32.mrf.mxu1 }
 0x461   : > { %v3589_v12 = vadd.f32 %v3567_v29, %v3426_v22 }
 0x463   : > { %v3752_v19 = vadd.f32 %v3730_v17, %v3589_v12 }
 0x465   : > { %3770 = vst.msk [vmem:[%s6078_s10 + $0x80] sm:$0xff] %vm263_vm1, %v3752_v19 }
 0x467   : > { %v3733_v13 = vpop.f32.mrf.mxu2 }
 0x468   : > { %v3570_v40 = vpop.f32.mrf.mxu1 }
 0x469   : > { %v3590_v16 = vadd.f32 %v3570_v40, %v3427_v0 }
 0x46b   : > { %v3753_v55 = vadd.f32 %v3733_v13, %v3590_v16 }
 0x46d   : > { %3771 = vst.msk [vmem:[%s6078_s10 + $0x88] sm:$0xff] %vm263_vm1, %v3753_v55 }
 0x46e PF: > { %s16_s21 = sadd.s32 1, %s4455_s21  }
 0x46f   : > { %p13_p4 = scmp.ge.s32.totalorder %s16_s21, 4  }
 0x471   :  { %15 = sbr.rel (!%p13_p4) target bundleno = 1 (0x1), region = 97 }

</bundles_post_ra>
